<compile_context>
chip_gen: v7x
topology: tpu7x:2x2x1
jax: 0.10.0
libtpu: 0.0.40
codegen_flags: <defaults>
</compile_context>

<pallas_src>
import functools

import jax
import jax.numpy as jnp
from jax.experimental import pallas as pl
from jax.experimental.pallas import tpu as pltpu


LN_EPS = 1e-5
RF_ACTS = ("relu", "relu", "relu", "relu", "relu")
GSD_ACTS = ("relu", "relu", "relu", "relu", "none")


# ----------------------------------------------------------------------------
# Helpers
# ----------------------------------------------------------------------------

def _full_spec(shape):
    return pl.BlockSpec(shape, lambda *_: (0,) * len(shape))


def _layernorm(x, g, b):
    mu = jnp.mean(x, axis=-1, keepdims=True)
    xc = x - mu
    var = jnp.mean(xc * xc, axis=-1, keepdims=True)
    return xc * jax.lax.rsqrt(var + LN_EPS) * g + b


# ----------------------------------------------------------------------------
# Fused sensor-parameter MLP chain (5 linears in one kernel)
# ----------------------------------------------------------------------------

def _mlp_chain_kernel(*refs, acts):
    x_ref = refs[0]
    o_ref = refs[-1]
    wb = refs[1:-1]
    h = x_ref[...].astype(jnp.float32)
    for i, act in enumerate(acts):
        w = wb[2 * i][...]
        b = wb[2 * i + 1][...]
        h = jnp.dot(h, w, preferred_element_type=jnp.float32) + b
        if act == "relu":
            h = jnp.maximum(h, 0.0)
    o_ref[...] = h.astype(o_ref.dtype)


def mlp_chain(x2d, layers, acts):
    """x2d: (M, K); layers: list of (w, b(1,N)); all layers fused in one call."""
    M = x2d.shape[0]
    N = layers[-1][0].shape[1]
    args = [x2d]
    in_specs = [_full_spec(x2d.shape)]
    for (w, b) in layers:
        args += [w, b]
        in_specs += [_full_spec(w.shape), _full_spec(b.shape)]
    return pl.pallas_call(
        functools.partial(_mlp_chain_kernel, acts=acts),
        out_shape=jax.ShapeDtypeStruct((M, N), jnp.float32),
        grid=(1,),
        in_specs=in_specs,
        out_specs=_full_spec((M, N)),
    )(*args)


# ----------------------------------------------------------------------------
# Fused patch embedding: matmul + bias + pos_embedding + sensor embedding adds
# ----------------------------------------------------------------------------

def _embed_kernel(p_ref, w_ref, b_ref, pe_ref, sens_ref, o_ref):
    i = pl.program_id(0)
    y = jnp.dot(p_ref[...].astype(jnp.bfloat16), w_ref[...],
                preferred_element_type=jnp.float32)            # (Tp, E)
    y = y + b_ref[...] + pe_ref[...] + sens_ref[pl.ds(i, 1), :]
    o_ref[...] = y.astype(o_ref.dtype)


def patch_embed(patches_flat, emb_w, emb_b, pos_emb, sensor_emb):
    BC, Tp, P2 = patches_flat.shape
    E = emb_w.shape[1]
    return pl.pallas_call(
        _embed_kernel,
        out_shape=jax.ShapeDtypeStruct((BC, Tp, E), jnp.float32),
        grid=(BC,),
        in_specs=[
            pl.BlockSpec((None, Tp, P2), lambda i: (i, 0, 0)),
            pl.BlockSpec((P2, E), lambda i: (0, 0)),
            pl.BlockSpec((1, E), lambda i: (0, 0)),
            pl.BlockSpec((Tp, E), lambda i: (0, 0)),
            pl.BlockSpec((BC, E), lambda i: (0, 0)),
        ],
        out_specs=pl.BlockSpec((None, Tp, E), lambda i: (i, 0, 0)),
        compiler_params=pltpu.CompilerParams(dimension_semantics=("parallel",)),
    )(patches_flat, emb_w, emb_b, pos_emb, sensor_emb)


# ----------------------------------------------------------------------------
# Fused transformer block (whole timm Block in one kernel, grid over batch)
# ----------------------------------------------------------------------------

def _block_kernel(x_ref, n1g, n1b, qkvw, qkvb, projw, projb,
                  n2g, n2b, fc1w, fc1b, fc2w, fc2b, o_ref, *, num_head):
    x = x_ref[...].astype(jnp.float32)                          # (T, E)
    T, E = x.shape
    Dh = E // num_head
    scale = Dh ** -0.5

    # ---- attention ----
    h = _layernorm(x, n1g[...], n1b[...])
    qkv = jnp.dot(h.astype(jnp.bfloat16), qkvw[...],
                  preferred_element_type=jnp.float32) + qkvb[...]   # (T, 3E)

    proj_acc = None
    for hd in range(num_head):
        q = qkv[:, hd * Dh:(hd + 1) * Dh] * scale                   # fold scale into q
        k = qkv[:, E + hd * Dh:E + (hd + 1) * Dh]
        v = qkv[:, 2 * E + hd * Dh:2 * E + (hd + 1) * Dh]
        s = jax.lax.dot_general(q.astype(jnp.bfloat16), k.astype(jnp.bfloat16),
                                (((1,), (1,)), ((), ())),
                                preferred_element_type=jnp.float32)  # (T, T)
        m = jnp.max(s, axis=-1, keepdims=True)
        p = jnp.exp(s - m)
        l = jnp.sum(p, axis=-1, keepdims=True)
        p = p * pl.reciprocal(l, approx=True)
        o_head = jnp.dot(p.astype(jnp.bfloat16), v.astype(jnp.bfloat16),
                         preferred_element_type=jnp.float32)         # (T, Dh)
        # fold the output projection into the head loop:
        # attn @ W_proj == sum_h  o_head @ W_proj[h*Dh:(h+1)*Dh, :]
        w_h = projw[hd * Dh:(hd + 1) * Dh, :]                        # (Dh, E) bf16
        contrib = jnp.dot(o_head.astype(jnp.bfloat16), w_h,
                          preferred_element_type=jnp.float32)
        proj_acc = contrib if proj_acc is None else proj_acc + contrib

    x = x + proj_acc + projb[...]

    # ---- mlp ----
    h = _layernorm(x, n2g[...], n2b[...])
    h = jnp.dot(h.astype(jnp.bfloat16), fc1w[...],
                preferred_element_type=jnp.float32) + fc1b[...]
    # TODO(synk): timm Block uses exact-erf GELU; tanh approximation used here.
    h = jax.nn.gelu(h, approximate=True)
    h = jnp.dot(h.astype(jnp.bfloat16), fc2w[...],
                preferred_element_type=jnp.float32) + fc2b[...]
    o_ref[...] = (x + h).astype(o_ref.dtype)


def transformer_block(x, p, num_head):
    B, T, E = x.shape
    weights = [p["n1_g"], p["n1_b"], p["qkv_w"], p["qkv_b"], p["proj_w"], p["proj_b"],
               p["n2_g"], p["n2_b"], p["fc1_w"], p["fc1_b"], p["fc2_w"], p["fc2_b"]]
    w_specs = [pl.BlockSpec(w.shape, lambda b: (0, 0)) for w in weights]
    return pl.pallas_call(
        functools.partial(_block_kernel, num_head=num_head),
        out_shape=jax.ShapeDtypeStruct((B, T, E), jnp.float32),
        grid=(B,),
        in_specs=[pl.BlockSpec((None, T, E), lambda b: (b, 0, 0))] + w_specs,
        out_specs=pl.BlockSpec((None, T, E), lambda b: (b, 0, 0)),
        compiler_params=pltpu.CompilerParams(dimension_semantics=("parallel",)),
    )(x, *weights)


# ----------------------------------------------------------------------------
# Final LayerNorm
# ----------------------------------------------------------------------------

def _final_ln_kernel(x_ref, g_ref, b_ref, o_ref):
    o_ref[...] = _layernorm(x_ref[...].astype(jnp.float32),
                            g_ref[...], b_ref[...]).astype(o_ref.dtype)


def final_layernorm(x, g, b):
    B, T, E = x.shape
    return pl.pallas_call(
        _final_ln_kernel,
        out_shape=jax.ShapeDtypeStruct((B, T, E), jnp.float32),
        grid=(B,),
        in_specs=[pl.BlockSpec((None, T, E), lambda i: (i, 0, 0)),
                  pl.BlockSpec((1, E), lambda i: (0, 0)),
                  pl.BlockSpec((1, E), lambda i: (0, 0))],
        out_specs=pl.BlockSpec((None, T, E), lambda i: (i, 0, 0)),
        compiler_params=pltpu.CompilerParams(dimension_semantics=("parallel",)),
    )(x, g, b)


# ----------------------------------------------------------------------------
# Encoder forward (glue in XLA, compute in the fused Pallas kernels above)
# ----------------------------------------------------------------------------

def patchify(img, sqrt_np, patch_size):
    # 'b c (h1 h) (w1 w) -> b c (h1 w1) (h w)'
    B, C, H, W = img.shape
    x = img.reshape(B, C, sqrt_np, patch_size, sqrt_np, patch_size)
    x = jnp.transpose(x, (0, 1, 2, 4, 3, 5))
    return x.reshape(B, C, sqrt_np * sqrt_np, patch_size * patch_size)


@functools.partial(jax.jit, static_argnames=("patch_size", "num_head", "num_layer"))
def encoder_forward(img, rf, gsd, params, *, patch_size, num_head, num_layer):
    B, C, H, W = img.shape
    sqrt_np = H // patch_size
    Tp = sqrt_np * sqrt_np
    E = params["emb_w"].shape[1]

    # sensor parameter embeddings (each 5-layer chain fused into one kernel)
    rf_pad_cols = params["rf_layers"][0][0].shape[0] - rf.shape[-1]
    rf_in = jnp.pad(rf.reshape(B * C, rf.shape[-1]), ((0, 0), (0, rf_pad_cols)))
    rf_emb = mlp_chain(rf_in, params["rf_layers"], RF_ACTS)            # (B*C, E)
    gsd_emb = mlp_chain(gsd.reshape(B * C, 1), params["gsd_layers"], GSD_ACTS)
    sensor_emb = rf_emb + gsd_emb                                      # (B*C, E)

    # patchify + linear embedding + pos/sensor adds in one fused kernel
    patches = patchify(img, sqrt_np, patch_size).reshape(B * C, Tp, patch_size ** 2)
    tokens = patch_embed(patches, params["emb_w"], params["emb_b"],
                         params["pos_embedding"], sensor_emb)          # (B*C, Tp, E)

    # channels as separate tokens: 'b c t e -> b (c t) e' (contiguous reshape)
    x = tokens.reshape(B, C * Tp, E)
    T = C * Tp

    # TODO(synk): masking function is caller-supplied in the PyTorch module; an
    # identity (no-mask) shuffle is used here, so the 'T b e' transpose pair is
    # a no-op and is elided.
    backward_indexes = jnp.tile(jnp.arange(T, dtype=jnp.int32)[:, None], (1, B))

    for li in range(num_layer):
        x = transformer_block(x, params["blocks"][li], num_head)
    x = final_layernorm(x, params["ln_g"], params["ln_b"])

    features = jnp.transpose(x, (1, 0, 2))                             # (T, B, E)
    return features, backward_indexes


# ----------------------------------------------------------------------------
# Deterministic parameter init + one-time preprocessing (pre-cast / pre-pad)
# ----------------------------------------------------------------------------

def _init_linear(key, fan_in, fan_out):
    kw, _ = jax.random.split(key)
    w = jax.random.normal(kw, (fan_in, fan_out), jnp.float32) * 0.02
    b = jnp.zeros((fan_out,), jnp.float32)
    return w, b


def init_params(key, *, patch_size, emb_dim, num_patches, num_layer):
    E = emb_dim
    keys = iter(jax.random.split(key, 64))
    params = {}

    params["emb_w"], params["emb_b"] = _init_linear(next(keys), patch_size ** 2, E)
    params["pos_embedding"] = (
        jax.random.truncated_normal(next(keys), -2.0, 2.0, (1, 1, num_patches, E)) * 0.02
    ).astype(jnp.float32)

    # SensorParameterEncoding_Responsefunction: 2301->2E->E->E->E->E (ReLU after each)
    rf_dims = [(2301, 2 * E), (2 * E, E), (E, E), (E, E), (E, E)]
    params["rf_layers"] = [_init_linear(next(keys), i, o) for (i, o) in rf_dims]

    # SensorParameterEncoding_GSD: 1->E/2->E->2E->E->E (ReLU between, none at end)
    gsd_dims = [(1, E // 2), (E // 2, E), (E, 2 * E), (2 * E, E), (E, E)]
    params["gsd_layers"] = [_init_linear(next(keys), i, o) for (i, o) in gsd_dims]

    blocks = []
    for _ in range(num_layer):
        p = {}
        p["n1_g"], p["n1_b"] = jnp.ones((E,), jnp.float32), jnp.zeros((E,), jnp.float32)
        p["qkv_w"], p["qkv_b"] = _init_linear(next(keys), E, 3 * E)
        p["proj_w"], p["proj_b"] = _init_linear(next(keys), E, E)
        p["n2_g"], p["n2_b"] = jnp.ones((E,), jnp.float32), jnp.zeros((E,), jnp.float32)
        p["fc1_w"], p["fc1_b"] = _init_linear(next(keys), E, 4 * E)
        p["fc2_w"], p["fc2_b"] = _init_linear(next(keys), 4 * E, E)
        blocks.append(p)
    params["blocks"] = blocks

    params["ln_g"] = jnp.ones((E,), jnp.float32)
    params["ln_b"] = jnp.zeros((E,), jnp.float32)
    return params


def prepare_params(params):
    """One-time preprocessing outside the hot path: bf16 matmul weights,
    (1, N) row biases, sublane-aligned padding of the rf contraction dim."""
    E = params["emb_w"].shape[1]
    out = {}
    out["emb_w"] = params["emb_w"].astype(jnp.bfloat16)
    out["emb_b"] = params["emb_b"].reshape(1, E)
    out["pos_embedding"] = params["pos_embedding"].reshape(-1, E)       # (Tp, E)

    def prep_chain(layers, pad_first_to=None):
        prepped = []
        for li, (w, b) in enumerate(layers):
            if li == 0 and pad_first_to is not None and w.shape[0] != pad_first_to:
                w = jnp.pad(w, ((0, pad_first_to - w.shape[0]), (0, 0)))
            prepped.append((w, b.reshape(1, -1)))
        return prepped

    out["rf_layers"] = prep_chain(params["rf_layers"], pad_first_to=2304)
    out["gsd_layers"] = prep_chain(params["gsd_layers"])

    blocks = []
    for p in params["blocks"]:
        q = {}
        q["n1_g"], q["n1_b"] = p["n1_g"].reshape(1, E), p["n1_b"].reshape(1, E)
        q["n2_g"], q["n2_b"] = p["n2_g"].reshape(1, E), p["n2_b"].reshape(1, E)
        q["qkv_w"], q["qkv_b"] = p["qkv_w"].astype(jnp.bfloat16), p["qkv_b"].reshape(1, -1)
        q["proj_w"], q["proj_b"] = p["proj_w"].astype(jnp.bfloat16), p["proj_b"].reshape(1, -1)
        q["fc1_w"], q["fc1_b"] = p["fc1_w"].astype(jnp.bfloat16), p["fc1_b"].reshape(1, -1)
        q["fc2_w"], q["fc2_b"] = p["fc2_w"].astype(jnp.bfloat16), p["fc2_b"].reshape(1, -1)
        blocks.append(q)
    out["blocks"] = blocks
    out["ln_g"] = params["ln_g"].reshape(1, E)
    out["ln_b"] = params["ln_b"].reshape(1, E)
    return out


# ----------------------------------------------------------------------------
# Main
# ----------------------------------------------------------------------------

if __name__ == "__main__":
    image_size = 16
    patch_size = 8
    emb_dim = 32
    num_layer = 2
    num_head = 4
    num_channels = 4
    batch = 2
    num_patches = (image_size // patch_size) ** 2

    key = jax.random.PRNGKey(0)
    k_img, k_rf, k_gsd, k_par = jax.random.split(key, 4)

    img = jax.random.normal(k_img, (batch, num_channels, image_size, image_size), jnp.float32)
    rf = jax.random.uniform(k_rf, (batch, num_channels, 2301), jnp.float32)
    gsd = jax.random.uniform(k_gsd, (batch, num_channels), jnp.float32) * 10.0 + 1.0

    raw_params = init_params(
        k_par, patch_size=patch_size, emb_dim=emb_dim,
        num_patches=num_patches, num_layer=num_layer)
    params = prepare_params(raw_params)

    features, backward_indexes = encoder_forward(
        img, rf, gsd, params,
        patch_size=patch_size, num_head=num_head, num_layer=num_layer,
    )
    jax.block_until_ready(features)
    jax.block_until_ready(backward_indexes)

    expected_T = num_channels * num_patches
    assert features.shape == (expected_T, batch, emb_dim), features.shape
    assert backward_indexes.shape == (expected_T, batch), backward_indexes.shape
    print("KERNEL_OK")
</pallas_src>

<mosaic_0001>
module attributes {stable_mosaic.version = 11 : i64} {
  func.func @_mlp_chain_kernel(%arg0: i32, %arg1: memref<8x1xf32, #tpu.memory_space<vmem>>, %arg2: memref<1x16xf32, #tpu.memory_space<vmem>>, %arg3: memref<1x16xf32, #tpu.memory_space<vmem>>, %arg4: memref<16x32xf32, #tpu.memory_space<vmem>>, %arg5: memref<1x32xf32, #tpu.memory_space<vmem>>, %arg6: memref<32x64xf32, #tpu.memory_space<vmem>>, %arg7: memref<1x64xf32, #tpu.memory_space<vmem>>, %arg8: memref<64x32xf32, #tpu.memory_space<vmem>>, %arg9: memref<1x32xf32, #tpu.memory_space<vmem>>, %arg10: memref<32x32xf32, #tpu.memory_space<vmem>>, %arg11: memref<1x32xf32, #tpu.memory_space<vmem>>, %arg12: memref<8x32xf32, #tpu.memory_space<vmem>>) attributes {dimension_semantics = [#tpu.dimension_semantics<arbitrary>], iteration_bounds = array<i64: 1>, scalar_prefetch = 0 : i64, scratch_operands = 0 : i64, tpu.core_type = #tpu.core_type<tc>, window_params = [{pipeline_mode = #tpu.pipeline_mode<synchronous>, transform_indices = @transform_0, window_bounds = array<i64: 8, 1>}, {pipeline_mode = #tpu.pipeline_mode<synchronous>, transform_indices = @transform_1, window_bounds = array<i64: 1, 16>}, {pipeline_mode = #tpu.pipeline_mode<synchronous>, transform_indices = @transform_2, window_bounds = array<i64: 1, 16>}, {pipeline_mode = #tpu.pipeline_mode<synchronous>, transform_indices = @transform_3, window_bounds = array<i64: 16, 32>}, {pipeline_mode = #tpu.pipeline_mode<synchronous>, transform_indices = @transform_4, window_bounds = array<i64: 1, 32>}, {pipeline_mode = #tpu.pipeline_mode<synchronous>, transform_indices = @transform_5, window_bounds = array<i64: 32, 64>}, {pipeline_mode = #tpu.pipeline_mode<synchronous>, transform_indices = @transform_6, window_bounds = array<i64: 1, 64>}, {pipeline_mode = #tpu.pipeline_mode<synchronous>, transform_indices = @transform_7, window_bounds = array<i64: 64, 32>}, {pipeline_mode = #tpu.pipeline_mode<synchronous>, transform_indices = @transform_8, window_bounds = array<i64: 1, 32>}, {pipeline_mode = #tpu.pipeline_mode<synchronous>, transform_indices = @transform_9, window_bounds = array<i64: 32, 32>}, {pipeline_mode = #tpu.pipeline_mode<synchronous>, transform_indices = @transform_10, window_bounds = array<i64: 1, 32>}, {pipeline_mode = #tpu.pipeline_mode<synchronous>, transform_indices = @transform_11, window_bounds = array<i64: 8, 32>}]} {
    %c0 = arith.constant 0 : index
    %c0_0 = arith.constant 0 : index
    %0 = vector.load %arg1[%c0, %c0_0] : memref<8x1xf32, #tpu.memory_space<vmem>>, vector<8x1xf32>
    %c0_1 = arith.constant 0 : index
    %c0_2 = arith.constant 0 : index
    %1 = vector.load %arg2[%c0_1, %c0_2] : memref<1x16xf32, #tpu.memory_space<vmem>>, vector<1x16xf32>
    %c0_3 = arith.constant 0 : index
    %c0_4 = arith.constant 0 : index
    %2 = vector.load %arg3[%c0_3, %c0_4] : memref<1x16xf32, #tpu.memory_space<vmem>>, vector<1x16xf32>
    %cst = arith.constant dense<0.000000e+00> : vector<8x16xf32>
    %3 = tpu.matmul %0, %1, %cst {dimension_numbers = #tpu.dot_dimension_numbers<[1], [0], [0], [1], [0, 0, 1, 1], [], []>} : vector<8x1xf32>, vector<1x16xf32>, vector<8x16xf32> -> vector<8x16xf32>
    %4 = vector.broadcast %2 : vector<1x16xf32> to vector<8x16xf32>
    %5 = arith.addf %3, %4 : vector<8x16xf32>
    %cst_5 = arith.constant 0.000000e+00 : f32
    %6 = vector.broadcast %cst_5 : f32 to vector<8x16xf32>
    %7 = arith.maximumf %5, %6 : vector<8x16xf32>
    %c0_6 = arith.constant 0 : index
    %c0_7 = arith.constant 0 : index
    %8 = vector.load %arg4[%c0_6, %c0_7] : memref<16x32xf32, #tpu.memory_space<vmem>>, vector<16x32xf32>
    %c0_8 = arith.constant 0 : index
    %c0_9 = arith.constant 0 : index
    %9 = vector.load %arg5[%c0_8, %c0_9] : memref<1x32xf32, #tpu.memory_space<vmem>>, vector<1x32xf32>
    %cst_10 = arith.constant dense<0.000000e+00> : vector<8x32xf32>
    %10 = tpu.matmul %7, %8, %cst_10 {dimension_numbers = #tpu.dot_dimension_numbers<[1], [0], [0], [1], [0, 0, 1, 1], [], []>} : vector<8x16xf32>, vector<16x32xf32>, vector<8x32xf32> -> vector<8x32xf32>
    %11 = vector.broadcast %9 : vector<1x32xf32> to vector<8x32xf32>
    %12 = arith.addf %10, %11 : vector<8x32xf32>
    %cst_11 = arith.constant 0.000000e+00 : f32
    %13 = vector.broadcast %cst_11 : f32 to vector<8x32xf32>
    %14 = arith.maximumf %12, %13 : vector<8x32xf32>
    %c0_12 = arith.constant 0 : index
    %c0_13 = arith.constant 0 : index
    %15 = vector.load %arg6[%c0_12, %c0_13] : memref<32x64xf32, #tpu.memory_space<vmem>>, vector<32x64xf32>
    %c0_14 = arith.constant 0 : index
    %c0_15 = arith.constant 0 : index
    %16 = vector.load %arg7[%c0_14, %c0_15] : memref<1x64xf32, #tpu.memory_space<vmem>>, vector<1x64xf32>
    %cst_16 = arith.constant dense<0.000000e+00> : vector<8x64xf32>
    %17 = tpu.matmul %14, %15, %cst_16 {dimension_numbers = #tpu.dot_dimension_numbers<[1], [0], [0], [1], [0, 0, 1, 1], [], []>} : vector<8x32xf32>, vector<32x64xf32>, vector<8x64xf32> -> vector<8x64xf32>
    %18 = vector.broadcast %16 : vector<1x64xf32> to vector<8x64xf32>
    %19 = arith.addf %17, %18 : vector<8x64xf32>
    %cst_17 = arith.constant 0.000000e+00 : f32
    %20 = vector.broadcast %cst_17 : f32 to vector<8x64xf32>
    %21 = arith.maximumf %19, %20 : vector<8x64xf32>
    %c0_18 = arith.constant 0 : index
    %c0_19 = arith.constant 0 : index
    %22 = vector.load %arg8[%c0_18, %c0_19] : memref<64x32xf32, #tpu.memory_space<vmem>>, vector<64x32xf32>
    %c0_20 = arith.constant 0 : index
    %c0_21 = arith.constant 0 : index
    %23 = vector.load %arg9[%c0_20, %c0_21] : memref<1x32xf32, #tpu.memory_space<vmem>>, vector<1x32xf32>
    %cst_22 = arith.constant dense<0.000000e+00> : vector<8x32xf32>
    %24 = tpu.matmul %21, %22, %cst_22 {dimension_numbers = #tpu.dot_dimension_numbers<[1], [0], [0], [1], [0, 0, 1, 1], [], []>} : vector<8x64xf32>, vector<64x32xf32>, vector<8x32xf32> -> vector<8x32xf32>
    %25 = vector.broadcast %23 : vector<1x32xf32> to vector<8x32xf32>
    %26 = arith.addf %24, %25 : vector<8x32xf32>
    %cst_23 = arith.constant 0.000000e+00 : f32
    %27 = vector.broadcast %cst_23 : f32 to vector<8x32xf32>
    %28 = arith.maximumf %26, %27 : vector<8x32xf32>
    %c0_24 = arith.constant 0 : index
    %c0_25 = arith.constant 0 : index
    %29 = vector.load %arg10[%c0_24, %c0_25] : memref<32x32xf32, #tpu.memory_space<vmem>>, vector<32x32xf32>
    %c0_26 = arith.constant 0 : index
    %c0_27 = arith.constant 0 : index
    %30 = vector.load %arg11[%c0_26, %c0_27] : memref<1x32xf32, #tpu.memory_space<vmem>>, vector<1x32xf32>
    %cst_28 = arith.constant dense<0.000000e+00> : vector<8x32xf32>
    %31 = tpu.matmul %28, %29, %cst_28 {dimension_numbers = #tpu.dot_dimension_numbers<[1], [0], [0], [1], [0, 0, 1, 1], [], []>} : vector<8x32xf32>, vector<32x32xf32>, vector<8x32xf32> -> vector<8x32xf32>
    %32 = vector.broadcast %30 : vector<1x32xf32> to vector<8x32xf32>
    %33 = arith.addf %31, %32 : vector<8x32xf32>
    %c0_29 = arith.constant 0 : index
    %c0_30 = arith.constant 0 : index
    %34 = vector.load %arg12[%c0_29, %c0_30] : memref<8x32xf32, #tpu.memory_space<vmem>>, vector<8x32xf32>
    tpu.vector_store %arg12[%c0_29, %c0_30], %33 {strides = array<i32>} : memref<8x32xf32, #tpu.memory_space<vmem>>, vector<8x32xf32>,
    return
  }
  func.func @transform_0(%arg0: i32) -> (i32, i32) {
    %c0_i32 = arith.constant 0 : i32
    %c0_i32_0 = arith.constant 0 : i32
    %c0_i32_1 = arith.constant 0 : i32
    return %c0_i32, %c0_i32_0 : i32, i32
  }
  func.func @transform_1(%arg0: i32) -> (i32, i32) {
    %c0_i32 = arith.constant 0 : i32
    %c0_i32_0 = arith.constant 0 : i32
    %c0_i32_1 = arith.constant 0 : i32
    return %c0_i32, %c0_i32_0 : i32, i32
  }
  func.func @transform_2(%arg0: i32) -> (i32, i32) {
    %c0_i32 = arith.constant 0 : i32
    %c0_i32_0 = arith.constant 0 : i32
    %c0_i32_1 = arith.constant 0 : i32
    return %c0_i32, %c0_i32_0 : i32, i32
  }
  func.func @transform_3(%arg0: i32) -> (i32, i32) {
    %c0_i32 = arith.constant 0 : i32
    %c0_i32_0 = arith.constant 0 : i32
    %c0_i32_1 = arith.constant 0 : i32
    return %c0_i32, %c0_i32_0 : i32, i32
  }
  func.func @transform_4(%arg0: i32) -> (i32, i32) {
    %c0_i32 = arith.constant 0 : i32
    %c0_i32_0 = arith.constant 0 : i32
    %c0_i32_1 = arith.constant 0 : i32
    return %c0_i32, %c0_i32_0 : i32, i32
  }
  func.func @transform_5(%arg0: i32) -> (i32, i32) {
    %c0_i32 = arith.constant 0 : i32
    %c0_i32_0 = arith.constant 0 : i32
    %c0_i32_1 = arith.constant 0 : i32
    return %c0_i32, %c0_i32_0 : i32, i32
  }
  func.func @transform_6(%arg0: i32) -> (i32, i32) {
    %c0_i32 = arith.constant 0 : i32
    %c0_i32_0 = arith.constant 0 : i32
    %c0_i32_1 = arith.constant 0 : i32
    return %c0_i32, %c0_i32_0 : i32, i32
  }
  func.func @transform_7(%arg0: i32) -> (i32, i32) {
    %c0_i32 = arith.constant 0 : i32
    %c0_i32_0 = arith.constant 0 : i32
    %c0_i32_1 = arith.constant 0 : i32
    return %c0_i32, %c0_i32_0 : i32, i32
  }
  func.func @transform_8(%arg0: i32) -> (i32, i32) {
    %c0_i32 = arith.constant 0 : i32
    %c0_i32_0 = arith.constant 0 : i32
    %c0_i32_1 = arith.constant 0 : i32
    return %c0_i32, %c0_i32_0 : i32, i32
  }
  func.func @transform_9(%arg0: i32) -> (i32, i32) {
    %c0_i32 = arith.constant 0 : i32
    %c0_i32_0 = arith.constant 0 : i32
    %c0_i32_1 = arith.constant 0 : i32
    return %c0_i32, %c0_i32_0 : i32, i32
  }
  func.func @transform_10(%arg0: i32) -> (i32, i32) {
    %c0_i32 = arith.constant 0 : i32
    %c0_i32_0 = arith.constant 0 : i32
    %c0_i32_1 = arith.constant 0 : i32
    return %c0_i32, %c0_i32_0 : i32, i32
  }
  func.func @transform_11(%arg0: i32) -> (i32, i32) {
    %c0_i32 = arith.constant 0 : i32
    %c0_i32_0 = arith.constant 0 : i32
    %c0_i32_1 = arith.constant 0 : i32
    return %c0_i32, %c0_i32_0 : i32, i32
  }
}

module attributes {stable_mosaic.version = 11 : i64} {
  func.func @_mlp_chain_kernel(%arg0: i32, %arg1: memref<8x2304xf32, #tpu.memory_space<vmem>>, %arg2: memref<2304x64xf32, #tpu.memory_space<vmem>>, %arg3: memref<1x64xf32, #tpu.memory_space<vmem>>, %arg4: memref<64x32xf32, #tpu.memory_space<vmem>>, %arg5: memref<1x32xf32, #tpu.memory_space<vmem>>, %arg6: memref<32x32xf32, #tpu.memory_space<vmem>>, %arg7: memref<1x32xf32, #tpu.memory_space<vmem>>, %arg8: memref<32x32xf32, #tpu.memory_space<vmem>>, %arg9: memref<1x32xf32, #tpu.memory_space<vmem>>, %arg10: memref<32x32xf32, #tpu.memory_space<vmem>>, %arg11: memref<1x32xf32, #tpu.memory_space<vmem>>, %arg12: memref<8x32xf32, #tpu.memory_space<vmem>>) attributes {dimension_semantics = [#tpu.dimension_semantics<arbitrary>], iteration_bounds = array<i64: 1>, scalar_prefetch = 0 : i64, scratch_operands = 0 : i64, tpu.core_type = #tpu.core_type<tc>, window_params = [{pipeline_mode = #tpu.pipeline_mode<synchronous>, transform_indices = @transform_0, window_bounds = array<i64: 8, 2304>}, {pipeline_mode = #tpu.pipeline_mode<synchronous>, transform_indices = @transform_1, window_bounds = array<i64: 2304, 64>}, {pipeline_mode = #tpu.pipeline_mode<synchronous>, transform_indices = @transform_2, window_bounds = array<i64: 1, 64>}, {pipeline_mode = #tpu.pipeline_mode<synchronous>, transform_indices = @transform_3, window_bounds = array<i64: 64, 32>}, {pipeline_mode = #tpu.pipeline_mode<synchronous>, transform_indices = @transform_4, window_bounds = array<i64: 1, 32>}, {pipeline_mode = #tpu.pipeline_mode<synchronous>, transform_indices = @transform_5, window_bounds = array<i64: 32, 32>}, {pipeline_mode = #tpu.pipeline_mode<synchronous>, transform_indices = @transform_6, window_bounds = array<i64: 1, 32>}, {pipeline_mode = #tpu.pipeline_mode<synchronous>, transform_indices = @transform_7, window_bounds = array<i64: 32, 32>}, {pipeline_mode = #tpu.pipeline_mode<synchronous>, transform_indices = @transform_8, window_bounds = array<i64: 1, 32>}, {pipeline_mode = #tpu.pipeline_mode<synchronous>, transform_indices = @transform_9, window_bounds = array<i64: 32, 32>}, {pipeline_mode = #tpu.pipeline_mode<synchronous>, transform_indices = @transform_10, window_bounds = array<i64: 1, 32>}, {pipeline_mode = #tpu.pipeline_mode<synchronous>, transform_indices = @transform_11, window_bounds = array<i64: 8, 32>}]} {
    %c0 = arith.constant 0 : index
    %c0_0 = arith.constant 0 : index
    %0 = vector.load %arg1[%c0, %c0_0] : memref<8x2304xf32, #tpu.memory_space<vmem>>, vector<8x2304xf32>
    %c0_1 = arith.constant 0 : index
    %c0_2 = arith.constant 0 : index
    %1 = vector.load %arg2[%c0_1, %c0_2] : memref<2304x64xf32, #tpu.memory_space<vmem>>, vector<2304x64xf32>
    %c0_3 = arith.constant 0 : index
    %c0_4 = arith.constant 0 : index
    %2 = vector.load %arg3[%c0_3, %c0_4] : memref<1x64xf32, #tpu.memory_space<vmem>>, vector<1x64xf32>
    %cst = arith.constant dense<0.000000e+00> : vector<8x64xf32>
    %3 = tpu.matmul %0, %1, %cst {dimension_numbers = #tpu.dot_dimension_numbers<[1], [0], [0], [1], [0, 0, 1, 1], [], []>} : vector<8x2304xf32>, vector<2304x64xf32>, vector<8x64xf32> -> vector<8x64xf32>
    %4 = vector.broadcast %2 : vector<1x64xf32> to vector<8x64xf32>
    %5 = arith.addf %3, %4 : vector<8x64xf32>
    %cst_5 = arith.constant 0.000000e+00 : f32
    %6 = vector.broadcast %cst_5 : f32 to vector<8x64xf32>
    %7 = arith.maximumf %5, %6 : vector<8x64xf32>
    %c0_6 = arith.constant 0 : index
    %c0_7 = arith.constant 0 : index
    %8 = vector.load %arg4[%c0_6, %c0_7] : memref<64x32xf32, #tpu.memory_space<vmem>>, vector<64x32xf32>
    %c0_8 = arith.constant 0 : index
    %c0_9 = arith.constant 0 : index
    %9 = vector.load %arg5[%c0_8, %c0_9] : memref<1x32xf32, #tpu.memory_space<vmem>>, vector<1x32xf32>
    %cst_10 = arith.constant dense<0.000000e+00> : vector<8x32xf32>
    %10 = tpu.matmul %7, %8, %cst_10 {dimension_numbers = #tpu.dot_dimension_numbers<[1], [0], [0], [1], [0, 0, 1, 1], [], []>} : vector<8x64xf32>, vector<64x32xf32>, vector<8x32xf32> -> vector<8x32xf32>
    %11 = vector.broadcast %9 : vector<1x32xf32> to vector<8x32xf32>
    %12 = arith.addf %10, %11 : vector<8x32xf32>
    %cst_11 = arith.constant 0.000000e+00 : f32
    %13 = vector.broadcast %cst_11 : f32 to vector<8x32xf32>
    %14 = arith.maximumf %12, %13 : vector<8x32xf32>
    %c0_12 = arith.constant 0 : index
    %c0_13 = arith.constant 0 : index
    %15 = vector.load %arg6[%c0_12, %c0_13] : memref<32x32xf32, #tpu.memory_space<vmem>>, vector<32x32xf32>
    %c0_14 = arith.constant 0 : index
    %c0_15 = arith.constant 0 : index
    %16 = vector.load %arg7[%c0_14, %c0_15] : memref<1x32xf32, #tpu.memory_space<vmem>>, vector<1x32xf32>
    %cst_16 = arith.constant dense<0.000000e+00> : vector<8x32xf32>
    %17 = tpu.matmul %14, %15, %cst_16 {dimension_numbers = #tpu.dot_dimension_numbers<[1], [0], [0], [1], [0, 0, 1, 1], [], []>} : vector<8x32xf32>, vector<32x32xf32>, vector<8x32xf32> -> vector<8x32xf32>
    %18 = vector.broadcast %16 : vector<1x32xf32> to vector<8x32xf32>
    %19 = arith.addf %17, %18 : vector<8x32xf32>
    %cst_17 = arith.constant 0.000000e+00 : f32
    %20 = vector.broadcast %cst_17 : f32 to vector<8x32xf32>
    %21 = arith.maximumf %19, %20 : vector<8x32xf32>
    %c0_18 = arith.constant 0 : index
    %c0_19 = arith.constant 0 : index
    %22 = vector.load %arg8[%c0_18, %c0_19] : memref<32x32xf32, #tpu.memory_space<vmem>>, vector<32x32xf32>
    %c0_20 = arith.constant 0 : index
    %c0_21 = arith.constant 0 : index
    %23 = vector.load %arg9[%c0_20, %c0_21] : memref<1x32xf32, #tpu.memory_space<vmem>>, vector<1x32xf32>
    %cst_22 = arith.constant dense<0.000000e+00> : vector<8x32xf32>
    %24 = tpu.matmul %21, %22, %cst_22 {dimension_numbers = #tpu.dot_dimension_numbers<[1], [0], [0], [1], [0, 0, 1, 1], [], []>} : vector<8x32xf32>, vector<32x32xf32>, vector<8x32xf32> -> vector<8x32xf32>
    %25 = vector.broadcast %23 : vector<1x32xf32> to vector<8x32xf32>
    %26 = arith.addf %24, %25 : vector<8x32xf32>
    %cst_23 = arith.constant 0.000000e+00 : f32
    %27 = vector.broadcast %cst_23 : f32 to vector<8x32xf32>
    %28 = arith.maximumf %26, %27 : vector<8x32xf32>
    %c0_24 = arith.constant 0 : index
    %c0_25 = arith.constant 0 : index
    %29 = vector.load %arg10[%c0_24, %c0_25] : memref<32x32xf32, #tpu.memory_space<vmem>>, vector<32x32xf32>
    %c0_26 = arith.constant 0 : index
    %c0_27 = arith.constant 0 : index
    %30 = vector.load %arg11[%c0_26, %c0_27] : memref<1x32xf32, #tpu.memory_space<vmem>>, vector<1x32xf32>
    %cst_28 = arith.constant dense<0.000000e+00> : vector<8x32xf32>
    %31 = tpu.matmul %28, %29, %cst_28 {dimension_numbers = #tpu.dot_dimension_numbers<[1], [0], [0], [1], [0, 0, 1, 1], [], []>} : vector<8x32xf32>, vector<32x32xf32>, vector<8x32xf32> -> vector<8x32xf32>
    %32 = vector.broadcast %30 : vector<1x32xf32> to vector<8x32xf32>
    %33 = arith.addf %31, %32 : vector<8x32xf32>
    %cst_29 = arith.constant 0.000000e+00 : f32
    %34 = vector.broadcast %cst_29 : f32 to vector<8x32xf32>
    %35 = arith.maximumf %33, %34 : vector<8x32xf32>
    %c0_30 = arith.constant 0 : index
    %c0_31 = arith.constant 0 : index
    %36 = vector.load %arg12[%c0_30, %c0_31] : memref<8x32xf32, #tpu.memory_space<vmem>>, vector<8x32xf32>
    tpu.vector_store %arg12[%c0_30, %c0_31], %35 {strides = array<i32>} : memref<8x32xf32, #tpu.memory_space<vmem>>, vector<8x32xf32>,
    return
  }
  func.func @transform_0(%arg0: i32) -> (i32, i32) {
    %c0_i32 = arith.constant 0 : i32
    %c0_i32_0 = arith.constant 0 : i32
    %c0_i32_1 = arith.constant 0 : i32
    return %c0_i32, %c0_i32_0 : i32, i32
  }
  func.func @transform_1(%arg0: i32) -> (i32, i32) {
    %c0_i32 = arith.constant 0 : i32
    %c0_i32_0 = arith.constant 0 : i32
    %c0_i32_1 = arith.constant 0 : i32
    return %c0_i32, %c0_i32_0 : i32, i32
  }
  func.func @transform_2(%arg0: i32) -> (i32, i32) {
    %c0_i32 = arith.constant 0 : i32
    %c0_i32_0 = arith.constant 0 : i32
    %c0_i32_1 = arith.constant 0 : i32
    return %c0_i32, %c0_i32_0 : i32, i32
  }
  func.func @transform_3(%arg0: i32) -> (i32, i32) {
    %c0_i32 = arith.constant 0 : i32
    %c0_i32_0 = arith.constant 0 : i32
    %c0_i32_1 = arith.constant 0 : i32
    return %c0_i32, %c0_i32_0 : i32, i32
  }
  func.func @transform_4(%arg0: i32) -> (i32, i32) {
    %c0_i32 = arith.constant 0 : i32
    %c0_i32_0 = arith.constant 0 : i32
    %c0_i32_1 = arith.constant 0 : i32
    return %c0_i32, %c0_i32_0 : i32, i32
  }
  func.func @transform_5(%arg0: i32) -> (i32, i32) {
    %c0_i32 = arith.constant 0 : i32
    %c0_i32_0 = arith.constant 0 : i32
    %c0_i32_1 = arith.constant 0 : i32
    return %c0_i32, %c0_i32_0 : i32, i32
  }
  func.func @transform_6(%arg0: i32) -> (i32, i32) {
    %c0_i32 = arith.constant 0 : i32
    %c0_i32_0 = arith.constant 0 : i32
    %c0_i32_1 = arith.constant 0 : i32
    return %c0_i32, %c0_i32_0 : i32, i32
  }
  func.func @transform_7(%arg0: i32) -> (i32, i32) {
    %c0_i32 = arith.constant 0 : i32
    %c0_i32_0 = arith.constant 0 : i32
    %c0_i32_1 = arith.constant 0 : i32
    return %c0_i32, %c0_i32_0 : i32, i32
  }
  func.func @transform_8(%arg0: i32) -> (i32, i32) {
    %c0_i32 = arith.constant 0 : i32
    %c0_i32_0 = arith.constant 0 : i32
    %c0_i32_1 = arith.constant 0 : i32
    return %c0_i32, %c0_i32_0 : i32, i32
  }
  func.func @transform_9(%arg0: i32) -> (i32, i32) {
    %c0_i32 = arith.constant 0 : i32
    %c0_i32_0 = arith.constant 0 : i32
    %c0_i32_1 = arith.constant 0 : i32
    return %c0_i32, %c0_i32_0 : i32, i32
  }
  func.func @transform_10(%arg0: i32) -> (i32, i32) {
    %c0_i32 = arith.constant 0 : i32
    %c0_i32_0 = arith.constant 0 : i32
    %c0_i32_1 = arith.constant 0 : i32
    return %c0_i32, %c0_i32_0 : i32, i32
  }
  func.func @transform_11(%arg0: i32) -> (i32, i32) {
    %c0_i32 = arith.constant 0 : i32
    %c0_i32_0 = arith.constant 0 : i32
    %c0_i32_1 = arith.constant 0 : i32
    return %c0_i32, %c0_i32_0 : i32, i32
  }
}

module attributes {stable_mosaic.version = 11 : i64} {
  func.func @_embed_kernel(%arg0: i32, %arg1: memref<1x4x64xf32, #tpu.memory_space<vmem>>, %arg2: memref<64x32xbf16, #tpu.memory_space<vmem>>, %arg3: memref<1x32xf32, #tpu.memory_space<vmem>>, %arg4: memref<4x32xf32, #tpu.memory_space<vmem>>, %arg5: memref<8x32xf32, #tpu.memory_space<vmem>>, %arg6: memref<1x4x32xf32, #tpu.memory_space<vmem>>) attributes {dimension_semantics = [#tpu.dimension_semantics<parallel>], iteration_bounds = array<i64: 8>, scalar_prefetch = 0 : i64, scratch_operands = 0 : i64, tpu.core_type = #tpu.core_type<tc>, window_params = [{transform_indices = @transform_0, window_bounds = array<i64: 1, 4, 64>}, {pipeline_mode = #tpu.pipeline_mode<synchronous>, transform_indices = @transform_1, window_bounds = array<i64: 64, 32>}, {pipeline_mode = #tpu.pipeline_mode<synchronous>, transform_indices = @transform_2, window_bounds = array<i64: 1, 32>}, {pipeline_mode = #tpu.pipeline_mode<synchronous>, transform_indices = @transform_3, window_bounds = array<i64: 4, 32>}, {pipeline_mode = #tpu.pipeline_mode<synchronous>, transform_indices = @transform_4, window_bounds = array<i64: 8, 32>}, {transform_indices = @transform_5, window_bounds = array<i64: 1, 4, 32>}]} {
    %c0 = arith.constant 0 : index
    %c0_0 = arith.constant 0 : index
    %c0_1 = arith.constant 0 : index
    %0 = vector.load %arg1[%c0, %c0_0, %c0_1] : memref<1x4x64xf32, #tpu.memory_space<vmem>>, vector<1x4x64xf32>
    %1 = vector.shape_cast %0 : vector<1x4x64xf32> to vector<4x64xf32>
    %2 = arith.truncf %1 : vector<4x64xf32> to vector<4x64xbf16>
    %c0_2 = arith.constant 0 : index
    %c0_3 = arith.constant 0 : index
    %3 = vector.load %arg2[%c0_2, %c0_3] : memref<64x32xbf16, #tpu.memory_space<vmem>>, vector<64x32xbf16>
    %cst = arith.constant dense<0.000000e+00> : vector<4x32xf32>
    %4 = tpu.matmul %2, %3, %cst {dimension_numbers = #tpu.dot_dimension_numbers<[1], [0], [0], [1], [0, 0, 1, 1], [], []>} : vector<4x64xbf16>, vector<64x32xbf16>, vector<4x32xf32> -> vector<4x32xf32>
    %c0_4 = arith.constant 0 : index
    %c0_5 = arith.constant 0 : index
    %5 = vector.load %arg3[%c0_4, %c0_5] : memref<1x32xf32, #tpu.memory_space<vmem>>, vector<1x32xf32>
    %6 = vector.broadcast %5 : vector<1x32xf32> to vector<4x32xf32>
    %7 = arith.addf %4, %6 : vector<4x32xf32>
    %c0_6 = arith.constant 0 : index
    %c0_7 = arith.constant 0 : index
    %8 = vector.load %arg4[%c0_6, %c0_7] : memref<4x32xf32, #tpu.memory_space<vmem>>, vector<4x32xf32>
    %9 = arith.addf %7, %8 : vector<4x32xf32>
    %10 = arith.index_cast %arg0 : i32 to index
    %c0_8 = arith.constant 0 : index
    %11 = vector.load %arg5[%10, %c0_8] : memref<8x32xf32, #tpu.memory_space<vmem>>, vector<1x32xf32>
    %12 = vector.broadcast %11 : vector<1x32xf32> to vector<4x32xf32>
    %13 = arith.addf %9, %12 : vector<4x32xf32>
    %c0_9 = arith.constant 0 : index
    %c0_10 = arith.constant 0 : index
    %c0_11 = arith.constant 0 : index
    %14 = vector.load %arg6[%c0_9, %c0_10, %c0_11] : memref<1x4x32xf32, #tpu.memory_space<vmem>>, vector<1x4x32xf32>
    %15 = vector.shape_cast %14 : vector<1x4x32xf32> to vector<4x32xf32>
    %16 = vector.shape_cast %13 : vector<4x32xf32> to vector<1x4x32xf32>
    tpu.vector_store %arg6[%c0_9, %c0_10, %c0_11], %16 {strides = array<i32>} : memref<1x4x32xf32, #tpu.memory_space<vmem>>, vector<1x4x32xf32>,
    return
  }
  func.func @transform_0(%arg0: i32) -> (i32, i32, i32) {
    %c0_i32 = arith.constant 0 : i32
    %c0_i32_0 = arith.constant 0 : i32
    %c0_i32_1 = arith.constant 0 : i32
    return %arg0, %c0_i32, %c0_i32_0 : i32, i32, i32
  }
  func.func @transform_1(%arg0: i32) -> (i32, i32) {
    %c0_i32 = arith.constant 0 : i32
    %c0_i32_0 = arith.constant 0 : i32
    %c0_i32_1 = arith.constant 0 : i32
    return %c0_i32, %c0_i32_0 : i32, i32
  }
  func.func @transform_2(%arg0: i32) -> (i32, i32) {
    %c0_i32 = arith.constant 0 : i32
    %c0_i32_0 = arith.constant 0 : i32
    %c0_i32_1 = arith.constant 0 : i32
    return %c0_i32, %c0_i32_0 : i32, i32
  }
  func.func @transform_3(%arg0: i32) -> (i32, i32) {
    %c0_i32 = arith.constant 0 : i32
    %c0_i32_0 = arith.constant 0 : i32
    %c0_i32_1 = arith.constant 0 : i32
    return %c0_i32, %c0_i32_0 : i32, i32
  }
  func.func @transform_4(%arg0: i32) -> (i32, i32) {
    %c0_i32 = arith.constant 0 : i32
    %c0_i32_0 = arith.constant 0 : i32
    %c0_i32_1 = arith.constant 0 : i32
    return %c0_i32, %c0_i32_0 : i32, i32
  }
  func.func @transform_5(%arg0: i32) -> (i32, i32, i32) {
    %c0_i32 = arith.constant 0 : i32
    %c0_i32_0 = arith.constant 0 : i32
    %c0_i32_1 = arith.constant 0 : i32
    return %arg0, %c0_i32, %c0_i32_0 : i32, i32, i32
  }
}

module attributes {stable_mosaic.version = 11 : i64} {
  func.func @_final_ln_kernel(%arg0: i32, %arg1: memref<1x16x32xf32, #tpu.memory_space<vmem>>, %arg2: memref<1x32xf32, #tpu.memory_space<vmem>>, %arg3: memref<1x32xf32, #tpu.memory_space<vmem>>, %arg4: memref<1x16x32xf32, #tpu.memory_space<vmem>>) attributes {dimension_semantics = [#tpu.dimension_semantics<parallel>], iteration_bounds = array<i64: 2>, scalar_prefetch = 0 : i64, scratch_operands = 0 : i64, tpu.core_type = #tpu.core_type<tc>, window_params = [{transform_indices = @transform_0, window_bounds = array<i64: 1, 16, 32>}, {pipeline_mode = #tpu.pipeline_mode<synchronous>, transform_indices = @transform_1, window_bounds = array<i64: 1, 32>}, {pipeline_mode = #tpu.pipeline_mode<synchronous>, transform_indices = @transform_2, window_bounds = array<i64: 1, 32>}, {transform_indices = @transform_3, window_bounds = array<i64: 1, 16, 32>}]} {
    %c0 = arith.constant 0 : index
    %c0_0 = arith.constant 0 : index
    %c0_1 = arith.constant 0 : index
    %0 = vector.load %arg1[%c0, %c0_0, %c0_1] : memref<1x16x32xf32, #tpu.memory_space<vmem>>, vector<1x16x32xf32>
    %1 = vector.shape_cast %0 : vector<1x16x32xf32> to vector<16x32xf32>
    %c0_2 = arith.constant 0 : index
    %c0_3 = arith.constant 0 : index
    %2 = vector.load %arg2[%c0_2, %c0_3] : memref<1x32xf32, #tpu.memory_space<vmem>>, vector<1x32xf32>
    %c0_4 = arith.constant 0 : index
    %c0_5 = arith.constant 0 : index
    %3 = vector.load %arg3[%c0_4, %c0_5] : memref<1x32xf32, #tpu.memory_space<vmem>>, vector<1x32xf32>
    %cst = arith.constant dense<0.000000e+00> : vector<16xf32>
    %4 = vector.multi_reduction <add>, %1, %cst [1] : vector<16x32xf32> to vector<16xf32>
    %5 = vector.shape_cast %4 : vector<16xf32> to vector<16x1xf32>
    %cst_6 = arith.constant 3.200000e+01 : f32
    %6 = vector.broadcast %cst_6 : f32 to vector<16x1xf32>
    %7 = arith.divf %5, %6 : vector<16x1xf32>
    %8 = vector.broadcast %7 : vector<16x1xf32> to vector<16x32xf32>
    %9 = arith.subf %1, %8 : vector<16x32xf32>
    %10 = arith.mulf %9, %9 : vector<16x32xf32>
    %cst_7 = arith.constant dense<0.000000e+00> : vector<16xf32>
    %11 = vector.multi_reduction <add>, %10, %cst_7 [1] : vector<16x32xf32> to vector<16xf32>
    %12 = vector.shape_cast %11 : vector<16xf32> to vector<16x1xf32>
    %cst_8 = arith.constant 3.200000e+01 : f32
    %13 = vector.broadcast %cst_8 : f32 to vector<16x1xf32>
    %14 = arith.divf %12, %13 : vector<16x1xf32>
    %cst_9 = arith.constant 9.99999974E-6 : f32
    %15 = vector.broadcast %cst_9 : f32 to vector<16x1xf32>
    %16 = arith.addf %14, %15 : vector<16x1xf32>
    %17 = math.rsqrt %16 : vector<16x1xf32>
    %18 = vector.broadcast %17 : vector<16x1xf32> to vector<16x32xf32>
    %19 = arith.mulf %9, %18 : vector<16x32xf32>
    %20 = vector.broadcast %2 : vector<1x32xf32> to vector<16x32xf32>
    %21 = arith.mulf %19, %20 : vector<16x32xf32>
    %22 = vector.broadcast %3 : vector<1x32xf32> to vector<16x32xf32>
    %23 = arith.addf %21, %22 : vector<16x32xf32>
    %c0_10 = arith.constant 0 : index
    %c0_11 = arith.constant 0 : index
    %c0_12 = arith.constant 0 : index
    %24 = vector.load %arg4[%c0_10, %c0_11, %c0_12] : memref<1x16x32xf32, #tpu.memory_space<vmem>>, vector<1x16x32xf32>
    %25 = vector.shape_cast %24 : vector<1x16x32xf32> to vector<16x32xf32>
    %26 = vector.shape_cast %23 : vector<16x32xf32> to vector<1x16x32xf32>
    tpu.vector_store %arg4[%c0_10, %c0_11, %c0_12], %26 {strides = array<i32>} : memref<1x16x32xf32, #tpu.memory_space<vmem>>, vector<1x16x32xf32>,
    return
  }
  func.func @transform_0(%arg0: i32) -> (i32, i32, i32) {
    %c0_i32 = arith.constant 0 : i32
    %c0_i32_0 = arith.constant 0 : i32
    %c0_i32_1 = arith.constant 0 : i32
    return %arg0, %c0_i32, %c0_i32_0 : i32, i32, i32
  }
  func.func @transform_1(%arg0: i32) -> (i32, i32) {
    %c0_i32 = arith.constant 0 : i32
    %c0_i32_0 = arith.constant 0 : i32
    %c0_i32_1 = arith.constant 0 : i32
    return %c0_i32, %c0_i32_0 : i32, i32
  }
  func.func @transform_2(%arg0: i32) -> (i32, i32) {
    %c0_i32 = arith.constant 0 : i32
    %c0_i32_0 = arith.constant 0 : i32
    %c0_i32_1 = arith.constant 0 : i32
    return %c0_i32, %c0_i32_0 : i32, i32
  }
  func.func @transform_3(%arg0: i32) -> (i32, i32, i32) {
    %c0_i32 = arith.constant 0 : i32
    %c0_i32_0 = arith.constant 0 : i32
    %c0_i32_1 = arith.constant 0 : i32
    return %arg0, %c0_i32, %c0_i32_0 : i32, i32, i32
  }
}

module attributes {stable_mosaic.version = 11 : i64} {
  func.func @_block_kernel(%arg0: i32, %arg1: memref<1x16x32xf32, #tpu.memory_space<vmem>>, %arg2: memref<1x32xf32, #tpu.memory_space<vmem>>, %arg3: memref<1x32xf32, #tpu.memory_space<vmem>>, %arg4: memref<32x96xbf16, #tpu.memory_space<vmem>>, %arg5: memref<1x96xf32, #tpu.memory_space<vmem>>, %arg6: memref<32x32xbf16, #tpu.memory_space<vmem>>, %arg7: memref<1x32xf32, #tpu.memory_space<vmem>>, %arg8: memref<1x32xf32, #tpu.memory_space<vmem>>, %arg9: memref<1x32xf32, #tpu.memory_space<vmem>>, %arg10: memref<32x128xbf16, #tpu.memory_space<vmem>>, %arg11: memref<1x128xf32, #tpu.memory_space<vmem>>, %arg12: memref<128x32xbf16, #tpu.memory_space<vmem>>, %arg13: memref<1x32xf32, #tpu.memory_space<vmem>>, %arg14: memref<1x16x32xf32, #tpu.memory_space<vmem>>) attributes {dimension_semantics = [#tpu.dimension_semantics<parallel>], iteration_bounds = array<i64: 2>, scalar_prefetch = 0 : i64, scratch_operands = 0 : i64, tpu.core_type = #tpu.core_type<tc>, window_params = [{transform_indices = @transform_0, window_bounds = array<i64: 1, 16, 32>}, {pipeline_mode = #tpu.pipeline_mode<synchronous>, transform_indices = @transform_1, window_bounds = array<i64: 1, 32>}, {pipeline_mode = #tpu.pipeline_mode<synchronous>, transform_indices = @transform_2, window_bounds = array<i64: 1, 32>}, {pipeline_mode = #tpu.pipeline_mode<synchronous>, transform_indices = @transform_3, window_bounds = array<i64: 32, 96>}, {pipeline_mode = #tpu.pipeline_mode<synchronous>, transform_indices = @transform_4, window_bounds = array<i64: 1, 96>}, {pipeline_mode = #tpu.pipeline_mode<synchronous>, transform_indices = @transform_5, window_bounds = array<i64: 32, 32>}, {pipeline_mode = #tpu.pipeline_mode<synchronous>, transform_indices = @transform_6, window_bounds = array<i64: 1, 32>}, {pipeline_mode = #tpu.pipeline_mode<synchronous>, transform_indices = @transform_7, window_bounds = array<i64: 1, 32>}, {pipeline_mode = #tpu.pipeline_mode<synchronous>, transform_indices = @transform_8, window_bounds = array<i64: 1, 32>}, {pipeline_mode = #tpu.pipeline_mode<synchronous>, transform_indices = @transform_9, window_bounds = array<i64: 32, 128>}, {pipeline_mode = #tpu.pipeline_mode<synchronous>, transform_indices = @transform_10, window_bounds = array<i64: 1, 128>}, {pipeline_mode = #tpu.pipeline_mode<synchronous>, transform_indices = @transform_11, window_bounds = array<i64: 128, 32>}, {pipeline_mode = #tpu.pipeline_mode<synchronous>, transform_indices = @transform_12, window_bounds = array<i64: 1, 32>}, {transform_indices = @transform_13, window_bounds = array<i64: 1, 16, 32>}]} {
    %c0 = arith.constant 0 : index
    %c0_0 = arith.constant 0 : index
    %c0_1 = arith.constant 0 : index
    %0 = vector.load %arg1[%c0, %c0_0, %c0_1] : memref<1x16x32xf32, #tpu.memory_space<vmem>>, vector<1x16x32xf32>
    %1 = vector.shape_cast %0 : vector<1x16x32xf32> to vector<16x32xf32>
    %c0_2 = arith.constant 0 : index
    %c0_3 = arith.constant 0 : index
    %2 = vector.load %arg2[%c0_2, %c0_3] : memref<1x32xf32, #tpu.memory_space<vmem>>, vector<1x32xf32>
    %c0_4 = arith.constant 0 : index
    %c0_5 = arith.constant 0 : index
    %3 = vector.load %arg3[%c0_4, %c0_5] : memref<1x32xf32, #tpu.memory_space<vmem>>, vector<1x32xf32>
    %cst = arith.constant dense<0.000000e+00> : vector<16xf32>
    %4 = vector.multi_reduction <add>, %1, %cst [1] : vector<16x32xf32> to vector<16xf32>
    %5 = vector.shape_cast %4 : vector<16xf32> to vector<16x1xf32>
    %cst_6 = arith.constant 3.200000e+01 : f32
    %6 = vector.broadcast %cst_6 : f32 to vector<16x1xf32>
    %7 = arith.divf %5, %6 : vector<16x1xf32>
    %8 = vector.broadcast %7 : vector<16x1xf32> to vector<16x32xf32>
    %9 = arith.subf %1, %8 : vector<16x32xf32>
    %10 = arith.mulf %9, %9 : vector<16x32xf32>
    %cst_7 = arith.constant dense<0.000000e+00> : vector<16xf32>
    %11 = vector.multi_reduction <add>, %10, %cst_7 [1] : vector<16x32xf32> to vector<16xf32>
    %12 = vector.shape_cast %11 : vector<16xf32> to vector<16x1xf32>
    %cst_8 = arith.constant 3.200000e+01 : f32
    %13 = vector.broadcast %cst_8 : f32 to vector<16x1xf32>
    %14 = arith.divf %12, %13 : vector<16x1xf32>
    %cst_9 = arith.constant 9.99999974E-6 : f32
    %15 = vector.broadcast %cst_9 : f32 to vector<16x1xf32>
    %16 = arith.addf %14, %15 : vector<16x1xf32>
    %17 = math.rsqrt %16 : vector<16x1xf32>
    %18 = vector.broadcast %17 : vector<16x1xf32> to vector<16x32xf32>
    %19 = arith.mulf %9, %18 : vector<16x32xf32>
    %20 = vector.broadcast %2 : vector<1x32xf32> to vector<16x32xf32>
    %21 = arith.mulf %19, %20 : vector<16x32xf32>
    %22 = vector.broadcast %3 : vector<1x32xf32> to vector<16x32xf32>
    %23 = arith.addf %21, %22 : vector<16x32xf32>
    %24 = arith.truncf %23 : vector<16x32xf32> to vector<16x32xbf16>
    %c0_10 = arith.constant 0 : index
    %c0_11 = arith.constant 0 : index
    %25 = vector.load %arg4[%c0_10, %c0_11] : memref<32x96xbf16, #tpu.memory_space<vmem>>, vector<32x96xbf16>
    %cst_12 = arith.constant dense<0.000000e+00> : vector<16x96xf32>
    %26 = tpu.matmul %24, %25, %cst_12 {dimension_numbers = #tpu.dot_dimension_numbers<[1], [0], [0], [1], [0, 0, 1, 1], [], []>} : vector<16x32xbf16>, vector<32x96xbf16>, vector<16x96xf32> -> vector<16x96xf32>
    %c0_13 = arith.constant 0 : index
    %c0_14 = arith.constant 0 : index
    %27 = vector.load %arg5[%c0_13, %c0_14] : memref<1x96xf32, #tpu.memory_space<vmem>>, vector<1x96xf32>
    %28 = vector.broadcast %27 : vector<1x96xf32> to vector<16x96xf32>
    %29 = arith.addf %26, %28 : vector<16x96xf32>
    %30 = vector.extract_strided_slice %29 {offsets = [0, 0], sizes = [16, 8], strides = [1, 1]} : vector<16x96xf32> to vector<16x8xf32>
    %cst_15 = arith.constant 0.353553385 : f32
    %31 = vector.broadcast %cst_15 : f32 to vector<16x8xf32>
    %32 = arith.mulf %30, %31 : vector<16x8xf32>
    %33 = vector.extract_strided_slice %29 {offsets = [0, 32], sizes = [16, 8], strides = [1, 1]} : vector<16x96xf32> to vector<16x8xf32>
    %34 = vector.extract_strided_slice %29 {offsets = [0, 64], sizes = [16, 8], strides = [1, 1]} : vector<16x96xf32> to vector<16x8xf32>
    %35 = arith.truncf %32 : vector<16x8xf32> to vector<16x8xbf16>
    %36 = arith.truncf %33 : vector<16x8xf32> to vector<16x8xbf16>
    %cst_16 = arith.constant dense<0.000000e+00> : vector<16x16xf32>
    %37 = tpu.matmul %35, %36, %cst_16 {dimension_numbers = #tpu.dot_dimension_numbers<[1], [1], [0], [0], [0, 0, 1, 0], [], []>} : vector<16x8xbf16>, vector<16x8xbf16>, vector<16x16xf32> -> vector<16x16xf32>
    %cst_17 = arith.constant dense<0xFF800000> : vector<16xf32>
    %38 = vector.multi_reduction <maximumf>, %37, %cst_17 [1] : vector<16x16xf32> to vector<16xf32>
    %39 = vector.shape_cast %38 : vector<16xf32> to vector<16x1xf32>
    %40 = vector.broadcast %39 : vector<16x1xf32> to vector<16x16xf32>
    %41 = arith.subf %37, %40 : vector<16x16xf32>
    %42 = math.exp %41 : vector<16x16xf32>
    %cst_18 = arith.constant dense<0.000000e+00> : vector<16xf32>
    %43 = vector.multi_reduction <add>, %42, %cst_18 [1] : vector<16x16xf32> to vector<16xf32>
    %44 = vector.shape_cast %43 : vector<16xf32> to vector<16x1xf32>
    %45 = tpu.reciprocal %44 {approx = true} : vector<16x1xf32> -> vector<16x1xf32>
    %46 = vector.broadcast %45 : vector<16x1xf32> to vector<16x16xf32>
    %47 = arith.mulf %42, %46 : vector<16x16xf32>
    %48 = arith.truncf %47 : vector<16x16xf32> to vector<16x16xbf16>
    %49 = arith.truncf %34 : vector<16x8xf32> to vector<16x8xbf16>
    %cst_19 = arith.constant dense<0.000000e+00> : vector<16x8xf32>
    %50 = tpu.matmul %48, %49, %cst_19 {dimension_numbers = #tpu.dot_dimension_numbers<[1], [0], [0], [1], [0, 0, 1, 1], [], []>} : vector<16x16xbf16>, vector<16x8xbf16>, vector<16x8xf32> -> vector<16x8xf32>
    %c0_20 = arith.constant 0 : index
    %c0_21 = arith.constant 0 : index
    %51 = vector.load %arg6[%c0_20, %c0_21] : memref<32x32xbf16, #tpu.memory_space<vmem>>, vector<8x32xbf16>
    %52 = arith.truncf %50 : vector<16x8xf32> to vector<16x8xbf16>
    %cst_22 = arith.constant dense<0.000000e+00> : vector<16x32xf32>
    %53 = tpu.matmul %52, %51, %cst_22 {dimension_numbers = #tpu.dot_dimension_numbers<[1], [0], [0], [1], [0, 0, 1, 1], [], []>} : vector<16x8xbf16>, vector<8x32xbf16>, vector<16x32xf32> -> vector<16x32xf32>
    %54 = vector.extract_strided_slice %29 {offsets = [0, 8], sizes = [16, 8], strides = [1, 1]} : vector<16x96xf32> to vector<16x8xf32>
    %cst_23 = arith.constant 0.353553385 : f32
    %55 = vector.broadcast %cst_23 : f32 to vector<16x8xf32>
    %56 = arith.mulf %54, %55 : vector<16x8xf32>
    %57 = vector.extract_strided_slice %29 {offsets = [0, 40], sizes = [16, 8], strides = [1, 1]} : vector<16x96xf32> to vector<16x8xf32>
    %58 = vector.extract_strided_slice %29 {offsets = [0, 72], sizes = [16, 8], strides = [1, 1]} : vector<16x96xf32> to vector<16x8xf32>
    %59 = arith.truncf %56 : vector<16x8xf32> to vector<16x8xbf16>
    %60 = arith.truncf %57 : vector<16x8xf32> to vector<16x8xbf16>
    %cst_24 = arith.constant dense<0.000000e+00> : vector<16x16xf32>
    %61 = tpu.matmul %59, %60, %cst_24 {dimension_numbers = #tpu.dot_dimension_numbers<[1], [1], [0], [0], [0, 0, 1, 0], [], []>} : vector<16x8xbf16>, vector<16x8xbf16>, vector<16x16xf32> -> vector<16x16xf32>
    %cst_25 = arith.constant dense<0xFF800000> : vector<16xf32>
    %62 = vector.multi_reduction <maximumf>, %61, %cst_25 [1] : vector<16x16xf32> to vector<16xf32>
    %63 = vector.shape_cast %62 : vector<16xf32> to vector<16x1xf32>
    %64 = vector.broadcast %63 : vector<16x1xf32> to vector<16x16xf32>
    %65 = arith.subf %61, %64 : vector<16x16xf32>
    %66 = math.exp %65 : vector<16x16xf32>
    %cst_26 = arith.constant dense<0.000000e+00> : vector<16xf32>
    %67 = vector.multi_reduction <add>, %66, %cst_26 [1] : vector<16x16xf32> to vector<16xf32>
    %68 = vector.shape_cast %67 : vector<16xf32> to vector<16x1xf32>
    %69 = tpu.reciprocal %68 {approx = true} : vector<16x1xf32> -> vector<16x1xf32>
    %70 = vector.broadcast %69 : vector<16x1xf32> to vector<16x16xf32>
    %71 = arith.mulf %66, %70 : vector<16x16xf32>
    %72 = arith.truncf %71 : vector<16x16xf32> to vector<16x16xbf16>
    %73 = arith.truncf %58 : vector<16x8xf32> to vector<16x8xbf16>
    %cst_27 = arith.constant dense<0.000000e+00> : vector<16x8xf32>
    %74 = tpu.matmul %72, %73, %cst_27 {dimension_numbers = #tpu.dot_dimension_numbers<[1], [0], [0], [1], [0, 0, 1, 1], [], []>} : vector<16x16xbf16>, vector<16x8xbf16>, vector<16x8xf32> -> vector<16x8xf32>
    %c8 = arith.constant 8 : index
    %c0_28 = arith.constant 0 : index
    %75 = vector.load %arg6[%c8, %c0_28] : memref<32x32xbf16, #tpu.memory_space<vmem>>, vector<8x32xbf16>
    %76 = arith.truncf %74 : vector<16x8xf32> to vector<16x8xbf16>
    %cst_29 = arith.constant dense<0.000000e+00> : vector<16x32xf32>
    %77 = tpu.matmul %76, %75, %cst_29 {dimension_numbers = #tpu.dot_dimension_numbers<[1], [0], [0], [1], [0, 0, 1, 1], [], []>} : vector<16x8xbf16>, vector<8x32xbf16>, vector<16x32xf32> -> vector<16x32xf32>
    %78 = arith.addf %53, %77 : vector<16x32xf32>
    %79 = vector.extract_strided_slice %29 {offsets = [0, 16], sizes = [16, 8], strides = [1, 1]} : vector<16x96xf32> to vector<16x8xf32>
    %cst_30 = arith.constant 0.353553385 : f32
    %80 = vector.broadcast %cst_30 : f32 to vector<16x8xf32>
    %81 = arith.mulf %79, %80 : vector<16x8xf32>
    %82 = vector.extract_strided_slice %29 {offsets = [0, 48], sizes = [16, 8], strides = [1, 1]} : vector<16x96xf32> to vector<16x8xf32>
    %83 = vector.extract_strided_slice %29 {offsets = [0, 80], sizes = [16, 8], strides = [1, 1]} : vector<16x96xf32> to vector<16x8xf32>
    %84 = arith.truncf %81 : vector<16x8xf32> to vector<16x8xbf16>
    %85 = arith.truncf %82 : vector<16x8xf32> to vector<16x8xbf16>
    %cst_31 = arith.constant dense<0.000000e+00> : vector<16x16xf32>
    %86 = tpu.matmul %84, %85, %cst_31 {dimension_numbers = #tpu.dot_dimension_numbers<[1], [1], [0], [0], [0, 0, 1, 0], [], []>} : vector<16x8xbf16>, vector<16x8xbf16>, vector<16x16xf32> -> vector<16x16xf32>
    %cst_32 = arith.constant dense<0xFF800000> : vector<16xf32>
    %87 = vector.multi_reduction <maximumf>, %86, %cst_32 [1] : vector<16x16xf32> to vector<16xf32>
    %88 = vector.shape_cast %87 : vector<16xf32> to vector<16x1xf32>
    %89 = vector.broadcast %88 : vector<16x1xf32> to vector<16x16xf32>
    %90 = arith.subf %86, %89 : vector<16x16xf32>
    %91 = math.exp %90 : vector<16x16xf32>
    %cst_33 = arith.constant dense<0.000000e+00> : vector<16xf32>
    %92 = vector.multi_reduction <add>, %91, %cst_33 [1] : vector<16x16xf32> to vector<16xf32>
    %93 = vector.shape_cast %92 : vector<16xf32> to vector<16x1xf32>
    %94 = tpu.reciprocal %93 {approx = true} : vector<16x1xf32> -> vector<16x1xf32>
    %95 = vector.broadcast %94 : vector<16x1xf32> to vector<16x16xf32>
    %96 = arith.mulf %91, %95 : vector<16x16xf32>
    %97 = arith.truncf %96 : vector<16x16xf32> to vector<16x16xbf16>
    %98 = arith.truncf %83 : vector<16x8xf32> to vector<16x8xbf16>
    %cst_34 = arith.constant dense<0.000000e+00> : vector<16x8xf32>
    %99 = tpu.matmul %97, %98, %cst_34 {dimension_numbers = #tpu.dot_dimension_numbers<[1], [0], [0], [1], [0, 0, 1, 1], [], []>} : vector<16x16xbf16>, vector<16x8xbf16>, vector<16x8xf32> -> vector<16x8xf32>
    %c16 = arith.constant 16 : index
    %c0_35 = arith.constant 0 : index
    %100 = vector.load %arg6[%c16, %c0_35] : memref<32x32xbf16, #tpu.memory_space<vmem>>, vector<8x32xbf16>
    %101 = arith.truncf %99 : vector<16x8xf32> to vector<16x8xbf16>
    %cst_36 = arith.constant dense<0.000000e+00> : vector<16x32xf32>
    %102 = tpu.matmul %101, %100, %cst_36 {dimension_numbers = #tpu.dot_dimension_numbers<[1], [0], [0], [1], [0, 0, 1, 1], [], []>} : vector<16x8xbf16>, vector<8x32xbf16>, vector<16x32xf32> -> vector<16x32xf32>
    %103 = arith.addf %78, %102 : vector<16x32xf32>
    %104 = vector.extract_strided_slice %29 {offsets = [0, 24], sizes = [16, 8], strides = [1, 1]} : vector<16x96xf32> to vector<16x8xf32>
    %cst_37 = arith.constant 0.353553385 : f32
    %105 = vector.broadcast %cst_37 : f32 to vector<16x8xf32>
    %106 = arith.mulf %104, %105 : vector<16x8xf32>
    %107 = vector.extract_strided_slice %29 {offsets = [0, 56], sizes = [16, 8], strides = [1, 1]} : vector<16x96xf32> to vector<16x8xf32>
    %108 = vector.extract_strided_slice %29 {offsets = [0, 88], sizes = [16, 8], strides = [1, 1]} : vector<16x96xf32> to vector<16x8xf32>
    %109 = arith.truncf %106 : vector<16x8xf32> to vector<16x8xbf16>
    %110 = arith.truncf %107 : vector<16x8xf32> to vector<16x8xbf16>
    %cst_38 = arith.constant dense<0.000000e+00> : vector<16x16xf32>
    %111 = tpu.matmul %109, %110, %cst_38 {dimension_numbers = #tpu.dot_dimension_numbers<[1], [1], [0], [0], [0, 0, 1, 0], [], []>} : vector<16x8xbf16>, vector<16x8xbf16>, vector<16x16xf32> -> vector<16x16xf32>
    %cst_39 = arith.constant dense<0xFF800000> : vector<16xf32>
    %112 = vector.multi_reduction <maximumf>, %111, %cst_39 [1] : vector<16x16xf32> to vector<16xf32>
    %113 = vector.shape_cast %112 : vector<16xf32> to vector<16x1xf32>
    %114 = vector.broadcast %113 : vector<16x1xf32> to vector<16x16xf32>
    %115 = arith.subf %111, %114 : vector<16x16xf32>
    %116 = math.exp %115 : vector<16x16xf32>
    %cst_40 = arith.constant dense<0.000000e+00> : vector<16xf32>
    %117 = vector.multi_reduction <add>, %116, %cst_40 [1] : vector<16x16xf32> to vector<16xf32>
    %118 = vector.shape_cast %117 : vector<16xf32> to vector<16x1xf32>
    %119 = tpu.reciprocal %118 {approx = true} : vector<16x1xf32> -> vector<16x1xf32>
    %120 = vector.broadcast %119 : vector<16x1xf32> to vector<16x16xf32>
    %121 = arith.mulf %116, %120 : vector<16x16xf32>
    %122 = arith.truncf %121 : vector<16x16xf32> to vector<16x16xbf16>
    %123 = arith.truncf %108 : vector<16x8xf32> to vector<16x8xbf16>
    %cst_41 = arith.constant dense<0.000000e+00> : vector<16x8xf32>
    %124 = tpu.matmul %122, %123, %cst_41 {dimension_numbers = #tpu.dot_dimension_numbers<[1], [0], [0], [1], [0, 0, 1, 1], [], []>} : vector<16x16xbf16>, vector<16x8xbf16>, vector<16x8xf32> -> vector<16x8xf32>
    %c24 = arith.constant 24 : index
    %c0_42 = arith.constant 0 : index
    %125 = vector.load %arg6[%c24, %c0_42] : memref<32x32xbf16, #tpu.memory_space<vmem>>, vector<8x32xbf16>
    %126 = arith.truncf %124 : vector<16x8xf32> to vector<16x8xbf16>
    %cst_43 = arith.constant dense<0.000000e+00> : vector<16x32xf32>
    %127 = tpu.matmul %126, %125, %cst_43 {dimension_numbers = #tpu.dot_dimension_numbers<[1], [0], [0], [1], [0, 0, 1, 1], [], []>} : vector<16x8xbf16>, vector<8x32xbf16>, vector<16x32xf32> -> vector<16x32xf32>
    %128 = arith.addf %103, %127 : vector<16x32xf32>
    %129 = arith.addf %1, %128 : vector<16x32xf32>
    %c0_44 = arith.constant 0 : index
    %c0_45 = arith.constant 0 : index
    %130 = vector.load %arg7[%c0_44, %c0_45] : memref<1x32xf32, #tpu.memory_space<vmem>>, vector<1x32xf32>
    %131 = vector.broadcast %130 : vector<1x32xf32> to vector<16x32xf32>
    %132 = arith.addf %129, %131 : vector<16x32xf32>
    %c0_46 = arith.constant 0 : index
    %c0_47 = arith.constant 0 : index
    %133 = vector.load %arg8[%c0_46, %c0_47] : memref<1x32xf32, #tpu.memory_space<vmem>>, vector<1x32xf32>
    %c0_48 = arith.constant 0 : index
    %c0_49 = arith.constant 0 : index
    %134 = vector.load %arg9[%c0_48, %c0_49] : memref<1x32xf32, #tpu.memory_space<vmem>>, vector<1x32xf32>
    %cst_50 = arith.constant dense<0.000000e+00> : vector<16xf32>
    %135 = vector.multi_reduction <add>, %132, %cst_50 [1] : vector<16x32xf32> to vector<16xf32>
    %136 = vector.shape_cast %135 : vector<16xf32> to vector<16x1xf32>
    %cst_51 = arith.constant 3.200000e+01 : f32
    %137 = vector.broadcast %cst_51 : f32 to vector<16x1xf32>
    %138 = arith.divf %136, %137 : vector<16x1xf32>
    %139 = vector.broadcast %138 : vector<16x1xf32> to vector<16x32xf32>
    %140 = arith.subf %132, %139 : vector<16x32xf32>
    %141 = arith.mulf %140, %140 : vector<16x32xf32>
    %cst_52 = arith.constant dense<0.000000e+00> : vector<16xf32>
    %142 = vector.multi_reduction <add>, %141, %cst_52 [1] : vector<16x32xf32> to vector<16xf32>
    %143 = vector.shape_cast %142 : vector<16xf32> to vector<16x1xf32>
    %cst_53 = arith.constant 3.200000e+01 : f32
    %144 = vector.broadcast %cst_53 : f32 to vector<16x1xf32>
    %145 = arith.divf %143, %144 : vector<16x1xf32>
    %cst_54 = arith.constant 9.99999974E-6 : f32
    %146 = vector.broadcast %cst_54 : f32 to vector<16x1xf32>
    %147 = arith.addf %145, %146 : vector<16x1xf32>
    %148 = math.rsqrt %147 : vector<16x1xf32>
    %149 = vector.broadcast %148 : vector<16x1xf32> to vector<16x32xf32>
    %150 = arith.mulf %140, %149 : vector<16x32xf32>
    %151 = vector.broadcast %133 : vector<1x32xf32> to vector<16x32xf32>
    %152 = arith.mulf %150, %151 : vector<16x32xf32>
    %153 = vector.broadcast %134 : vector<1x32xf32> to vector<16x32xf32>
    %154 = arith.addf %152, %153 : vector<16x32xf32>
    %155 = arith.truncf %154 : vector<16x32xf32> to vector<16x32xbf16>
    %c0_55 = arith.constant 0 : index
    %c0_56 = arith.constant 0 : index
    %156 = vector.load %arg10[%c0_55, %c0_56] : memref<32x128xbf16, #tpu.memory_space<vmem>>, vector<32x128xbf16>
    %cst_57 = arith.constant dense<0.000000e+00> : vector<16x128xf32>
    %157 = tpu.matmul %155, %156, %cst_57 {dimension_numbers = #tpu.dot_dimension_numbers<[1], [0], [0], [1], [0, 0, 1, 1], [], []>} : vector<16x32xbf16>, vector<32x128xbf16>, vector<16x128xf32> -> vector<16x128xf32>
    %c0_58 = arith.constant 0 : index
    %c0_59 = arith.constant 0 : index
    %158 = vector.load %arg11[%c0_58, %c0_59] : memref<1x128xf32, #tpu.memory_space<vmem>>, vector<1x128xf32>
    %159 = vector.broadcast %158 : vector<1x128xf32> to vector<16x128xf32>
    %160 = arith.addf %157, %159 : vector<16x128xf32>
    %161 = arith.mulf %160, %160 : vector<16x128xf32>
    %162 = arith.mulf %160, %161 : vector<16x128xf32>
    %cst_60 = arith.constant 4.471500e-02 : f32
    %163 = vector.broadcast %cst_60 : f32 to vector<16x128xf32>
    %164 = arith.mulf %163, %162 : vector<16x128xf32>
    %165 = arith.addf %160, %164 : vector<16x128xf32>
    %cst_61 = arith.constant 0.797884583 : f32
    %166 = vector.broadcast %cst_61 : f32 to vector<16x128xf32>
    %167 = arith.mulf %166, %165 : vector<16x128xf32>
    %168 = math.tanh %167 : vector<16x128xf32>
    %cst_62 = arith.constant 1.000000e+00 : f32
    %169 = vector.broadcast %cst_62 : f32 to vector<16x128xf32>
    %170 = arith.addf %169, %168 : vector<16x128xf32>
    %cst_63 = arith.constant 5.000000e-01 : f32
    %171 = vector.broadcast %cst_63 : f32 to vector<16x128xf32>
    %172 = arith.mulf %171, %170 : vector<16x128xf32>
    %173 = arith.mulf %160, %172 : vector<16x128xf32>
    %174 = arith.truncf %173 : vector<16x128xf32> to vector<16x128xbf16>
    %c0_64 = arith.constant 0 : index
    %c0_65 = arith.constant 0 : index
    %175 = vector.load %arg12[%c0_64, %c0_65] : memref<128x32xbf16, #tpu.memory_space<vmem>>, vector<128x32xbf16>
    %cst_66 = arith.constant dense<0.000000e+00> : vector<16x32xf32>
    %176 = tpu.matmul %174, %175, %cst_66 {dimension_numbers = #tpu.dot_dimension_numbers<[1], [0], [0], [1], [0, 0, 1, 1], [], []>} : vector<16x128xbf16>, vector<128x32xbf16>, vector<16x32xf32> -> vector<16x32xf32>
    %c0_67 = arith.constant 0 : index
    %c0_68 = arith.constant 0 : index
    %177 = vector.load %arg13[%c0_67, %c0_68] : memref<1x32xf32, #tpu.memory_space<vmem>>, vector<1x32xf32>
    %178 = vector.broadcast %177 : vector<1x32xf32> to vector<16x32xf32>
    %179 = arith.addf %176, %178 : vector<16x32xf32>
    %180 = arith.addf %132, %179 : vector<16x32xf32>
    %c0_69 = arith.constant 0 : index
    %c0_70 = arith.constant 0 : index
    %c0_71 = arith.constant 0 : index
    %181 = vector.load %arg14[%c0_69, %c0_70, %c0_71] : memref<1x16x32xf32, #tpu.memory_space<vmem>>, vector<1x16x32xf32>
    %182 = vector.shape_cast %181 : vector<1x16x32xf32> to vector<16x32xf32>
    %183 = vector.shape_cast %180 : vector<16x32xf32> to vector<1x16x32xf32>
    tpu.vector_store %arg14[%c0_69, %c0_70, %c0_71], %183 {strides = array<i32>} : memref<1x16x32xf32, #tpu.memory_space<vmem>>, vector<1x16x32xf32>,
    return
  }
  func.func @transform_0(%arg0: i32) -> (i32, i32, i32) {
    %c0_i32 = arith.constant 0 : i32
    %c0_i32_0 = arith.constant 0 : i32
    %c0_i32_1 = arith.constant 0 : i32
    return %arg0, %c0_i32, %c0_i32_0 : i32, i32, i32
  }
  func.func @transform_1(%arg0: i32) -> (i32, i32) {
    %c0_i32 = arith.constant 0 : i32
    %c0_i32_0 = arith.constant 0 : i32
    %c0_i32_1 = arith.constant 0 : i32
    return %c0_i32, %c0_i32_0 : i32, i32
  }
  func.func @transform_2(%arg0: i32) -> (i32, i32) {
    %c0_i32 = arith.constant 0 : i32
    %c0_i32_0 = arith.constant 0 : i32
    %c0_i32_1 = arith.constant 0 : i32
    return %c0_i32, %c0_i32_0 : i32, i32
  }
  func.func @transform_3(%arg0: i32) -> (i32, i32) {
    %c0_i32 = arith.constant 0 : i32
    %c0_i32_0 = arith.constant 0 : i32
    %c0_i32_1 = arith.constant 0 : i32
    return %c0_i32, %c0_i32_0 : i32, i32
  }
  func.func @transform_4(%arg0: i32) -> (i32, i32) {
    %c0_i32 = arith.constant 0 : i32
    %c0_i32_0 = arith.constant 0 : i32
    %c0_i32_1 = arith.constant 0 : i32
    return %c0_i32, %c0_i32_0 : i32, i32
  }
  func.func @transform_5(%arg0: i32) -> (i32, i32) {
    %c0_i32 = arith.constant 0 : i32
    %c0_i32_0 = arith.constant 0 : i32
    %c0_i32_1 = arith.constant 0 : i32
    return %c0_i32, %c0_i32_0 : i32, i32
  }
  func.func @transform_6(%arg0: i32) -> (i32, i32) {
    %c0_i32 = arith.constant 0 : i32
    %c0_i32_0 = arith.constant 0 : i32
    %c0_i32_1 = arith.constant 0 : i32
    return %c0_i32, %c0_i32_0 : i32, i32
  }
  func.func @transform_7(%arg0: i32) -> (i32, i32) {
    %c0_i32 = arith.constant 0 : i32
    %c0_i32_0 = arith.constant 0 : i32
    %c0_i32_1 = arith.constant 0 : i32
    return %c0_i32, %c0_i32_0 : i32, i32
  }
  func.func @transform_8(%arg0: i32) -> (i32, i32) {
    %c0_i32 = arith.constant 0 : i32
    %c0_i32_0 = arith.constant 0 : i32
    %c0_i32_1 = arith.constant 0 : i32
    return %c0_i32, %c0_i32_0 : i32, i32
  }
  func.func @transform_9(%arg0: i32) -> (i32, i32) {
    %c0_i32 = arith.constant 0 : i32
    %c0_i32_0 = arith.constant 0 : i32
    %c0_i32_1 = arith.constant 0 : i32
    return %c0_i32, %c0_i32_0 : i32, i32
  }
  func.func @transform_10(%arg0: i32) -> (i32, i32) {
    %c0_i32 = arith.constant 0 : i32
    %c0_i32_0 = arith.constant 0 : i32
    %c0_i32_1 = arith.constant 0 : i32
    return %c0_i32, %c0_i32_0 : i32, i32
  }
  func.func @transform_11(%arg0: i32) -> (i32, i32) {
    %c0_i32 = arith.constant 0 : i32
    %c0_i32_0 = arith.constant 0 : i32
    %c0_i32_1 = arith.constant 0 : i32
    return %c0_i32, %c0_i32_0 : i32, i32
  }
  func.func @transform_12(%arg0: i32) -> (i32, i32) {
    %c0_i32 = arith.constant 0 : i32
    %c0_i32_0 = arith.constant 0 : i32
    %c0_i32_1 = arith.constant 0 : i32
    return %c0_i32, %c0_i32_0 : i32, i32
  }
  func.func @transform_13(%arg0: i32) -> (i32, i32, i32) {
    %c0_i32 = arith.constant 0 : i32
    %c0_i32_0 = arith.constant 0 : i32
    %c0_i32_1 = arith.constant 0 : i32
    return %arg0, %c0_i32, %c0_i32_0 : i32, i32, i32
  }
}

module attributes {stable_mosaic.version = 11 : i64} {
  func.func @_block_kernel(%arg0: i32, %arg1: memref<1x16x32xf32, #tpu.memory_space<vmem>>, %arg2: memref<1x32xf32, #tpu.memory_space<vmem>>, %arg3: memref<1x32xf32, #tpu.memory_space<vmem>>, %arg4: memref<32x96xbf16, #tpu.memory_space<vmem>>, %arg5: memref<1x96xf32, #tpu.memory_space<vmem>>, %arg6: memref<32x32xbf16, #tpu.memory_space<vmem>>, %arg7: memref<1x32xf32, #tpu.memory_space<vmem>>, %arg8: memref<1x32xf32, #tpu.memory_space<vmem>>, %arg9: memref<1x32xf32, #tpu.memory_space<vmem>>, %arg10: memref<32x128xbf16, #tpu.memory_space<vmem>>, %arg11: memref<1x128xf32, #tpu.memory_space<vmem>>, %arg12: memref<128x32xbf16, #tpu.memory_space<vmem>>, %arg13: memref<1x32xf32, #tpu.memory_space<vmem>>, %arg14: memref<1x16x32xf32, #tpu.memory_space<vmem>>) attributes {dimension_semantics = [#tpu.dimension_semantics<parallel>], iteration_bounds = array<i64: 2>, scalar_prefetch = 0 : i64, scratch_operands = 0 : i64, tpu.core_type = #tpu.core_type<tc>, window_params = [{transform_indices = @transform_0, window_bounds = array<i64: 1, 16, 32>}, {pipeline_mode = #tpu.pipeline_mode<synchronous>, transform_indices = @transform_1, window_bounds = array<i64: 1, 32>}, {pipeline_mode = #tpu.pipeline_mode<synchronous>, transform_indices = @transform_2, window_bounds = array<i64: 1, 32>}, {pipeline_mode = #tpu.pipeline_mode<synchronous>, transform_indices = @transform_3, window_bounds = array<i64: 32, 96>}, {pipeline_mode = #tpu.pipeline_mode<synchronous>, transform_indices = @transform_4, window_bounds = array<i64: 1, 96>}, {pipeline_mode = #tpu.pipeline_mode<synchronous>, transform_indices = @transform_5, window_bounds = array<i64: 32, 32>}, {pipeline_mode = #tpu.pipeline_mode<synchronous>, transform_indices = @transform_6, window_bounds = array<i64: 1, 32>}, {pipeline_mode = #tpu.pipeline_mode<synchronous>, transform_indices = @transform_7, window_bounds = array<i64: 1, 32>}, {pipeline_mode = #tpu.pipeline_mode<synchronous>, transform_indices = @transform_8, window_bounds = array<i64: 1, 32>}, {pipeline_mode = #tpu.pipeline_mode<synchronous>, transform_indices = @transform_9, window_bounds = array<i64: 32, 128>}, {pipeline_mode = #tpu.pipeline_mode<synchronous>, transform_indices = @transform_10, window_bounds = array<i64: 1, 128>}, {pipeline_mode = #tpu.pipeline_mode<synchronous>, transform_indices = @transform_11, window_bounds = array<i64: 128, 32>}, {pipeline_mode = #tpu.pipeline_mode<synchronous>, transform_indices = @transform_12, window_bounds = array<i64: 1, 32>}, {transform_indices = @transform_13, window_bounds = array<i64: 1, 16, 32>}]} {
    %c0 = arith.constant 0 : index
    %c0_0 = arith.constant 0 : index
    %c0_1 = arith.constant 0 : index
    %0 = vector.load %arg1[%c0, %c0_0, %c0_1] : memref<1x16x32xf32, #tpu.memory_space<vmem>>, vector<1x16x32xf32>
    %1 = vector.shape_cast %0 : vector<1x16x32xf32> to vector<16x32xf32>
    %c0_2 = arith.constant 0 : index
    %c0_3 = arith.constant 0 : index
    %2 = vector.load %arg2[%c0_2, %c0_3] : memref<1x32xf32, #tpu.memory_space<vmem>>, vector<1x32xf32>
    %c0_4 = arith.constant 0 : index
    %c0_5 = arith.constant 0 : index
    %3 = vector.load %arg3[%c0_4, %c0_5] : memref<1x32xf32, #tpu.memory_space<vmem>>, vector<1x32xf32>
    %cst = arith.constant dense<0.000000e+00> : vector<16xf32>
    %4 = vector.multi_reduction <add>, %1, %cst [1] : vector<16x32xf32> to vector<16xf32>
    %5 = vector.shape_cast %4 : vector<16xf32> to vector<16x1xf32>
    %cst_6 = arith.constant 3.200000e+01 : f32
    %6 = vector.broadcast %cst_6 : f32 to vector<16x1xf32>
    %7 = arith.divf %5, %6 : vector<16x1xf32>
    %8 = vector.broadcast %7 : vector<16x1xf32> to vector<16x32xf32>
    %9 = arith.subf %1, %8 : vector<16x32xf32>
    %10 = arith.mulf %9, %9 : vector<16x32xf32>
    %cst_7 = arith.constant dense<0.000000e+00> : vector<16xf32>
    %11 = vector.multi_reduction <add>, %10, %cst_7 [1] : vector<16x32xf32> to vector<16xf32>
    %12 = vector.shape_cast %11 : vector<16xf32> to vector<16x1xf32>
    %cst_8 = arith.constant 3.200000e+01 : f32
    %13 = vector.broadcast %cst_8 : f32 to vector<16x1xf32>
    %14 = arith.divf %12, %13 : vector<16x1xf32>
    %cst_9 = arith.constant 9.99999974E-6 : f32
    %15 = vector.broadcast %cst_9 : f32 to vector<16x1xf32>
    %16 = arith.addf %14, %15 : vector<16x1xf32>
    %17 = math.rsqrt %16 : vector<16x1xf32>
    %18 = vector.broadcast %17 : vector<16x1xf32> to vector<16x32xf32>
    %19 = arith.mulf %9, %18 : vector<16x32xf32>
    %20 = vector.broadcast %2 : vector<1x32xf32> to vector<16x32xf32>
    %21 = arith.mulf %19, %20 : vector<16x32xf32>
    %22 = vector.broadcast %3 : vector<1x32xf32> to vector<16x32xf32>
    %23 = arith.addf %21, %22 : vector<16x32xf32>
    %24 = arith.truncf %23 : vector<16x32xf32> to vector<16x32xbf16>
    %c0_10 = arith.constant 0 : index
    %c0_11 = arith.constant 0 : index
    %25 = vector.load %arg4[%c0_10, %c0_11] : memref<32x96xbf16, #tpu.memory_space<vmem>>, vector<32x96xbf16>
    %cst_12 = arith.constant dense<0.000000e+00> : vector<16x96xf32>
    %26 = tpu.matmul %24, %25, %cst_12 {dimension_numbers = #tpu.dot_dimension_numbers<[1], [0], [0], [1], [0, 0, 1, 1], [], []>} : vector<16x32xbf16>, vector<32x96xbf16>, vector<16x96xf32> -> vector<16x96xf32>
    %c0_13 = arith.constant 0 : index
    %c0_14 = arith.constant 0 : index
    %27 = vector.load %arg5[%c0_13, %c0_14] : memref<1x96xf32, #tpu.memory_space<vmem>>, vector<1x96xf32>
    %28 = vector.broadcast %27 : vector<1x96xf32> to vector<16x96xf32>
    %29 = arith.addf %26, %28 : vector<16x96xf32>
    %30 = vector.extract_strided_slice %29 {offsets = [0, 0], sizes = [16, 8], strides = [1, 1]} : vector<16x96xf32> to vector<16x8xf32>
    %cst_15 = arith.constant 0.353553385 : f32
    %31 = vector.broadcast %cst_15 : f32 to vector<16x8xf32>
    %32 = arith.mulf %30, %31 : vector<16x8xf32>
    %33 = vector.extract_strided_slice %29 {offsets = [0, 32], sizes = [16, 8], strides = [1, 1]} : vector<16x96xf32> to vector<16x8xf32>
    %34 = vector.extract_strided_slice %29 {offsets = [0, 64], sizes = [16, 8], strides = [1, 1]} : vector<16x96xf32> to vector<16x8xf32>
    %35 = arith.truncf %32 : vector<16x8xf32> to vector<16x8xbf16>
    %36 = arith.truncf %33 : vector<16x8xf32> to vector<16x8xbf16>
    %cst_16 = arith.constant dense<0.000000e+00> : vector<16x16xf32>
    %37 = tpu.matmul %35, %36, %cst_16 {dimension_numbers = #tpu.dot_dimension_numbers<[1], [1], [0], [0], [0, 0, 1, 0], [], []>} : vector<16x8xbf16>, vector<16x8xbf16>, vector<16x16xf32> -> vector<16x16xf32>
    %cst_17 = arith.constant dense<0xFF800000> : vector<16xf32>
    %38 = vector.multi_reduction <maximumf>, %37, %cst_17 [1] : vector<16x16xf32> to vector<16xf32>
    %39 = vector.shape_cast %38 : vector<16xf32> to vector<16x1xf32>
    %40 = vector.broadcast %39 : vector<16x1xf32> to vector<16x16xf32>
    %41 = arith.subf %37, %40 : vector<16x16xf32>
    %42 = math.exp %41 : vector<16x16xf32>
    %cst_18 = arith.constant dense<0.000000e+00> : vector<16xf32>
    %43 = vector.multi_reduction <add>, %42, %cst_18 [1] : vector<16x16xf32> to vector<16xf32>
    %44 = vector.shape_cast %43 : vector<16xf32> to vector<16x1xf32>
    %45 = tpu.reciprocal %44 {approx = true} : vector<16x1xf32> -> vector<16x1xf32>
    %46 = vector.broadcast %45 : vector<16x1xf32> to vector<16x16xf32>
    %47 = arith.mulf %42, %46 : vector<16x16xf32>
    %48 = arith.truncf %47 : vector<16x16xf32> to vector<16x16xbf16>
    %49 = arith.truncf %34 : vector<16x8xf32> to vector<16x8xbf16>
    %cst_19 = arith.constant dense<0.000000e+00> : vector<16x8xf32>
    %50 = tpu.matmul %48, %49, %cst_19 {dimension_numbers = #tpu.dot_dimension_numbers<[1], [0], [0], [1], [0, 0, 1, 1], [], []>} : vector<16x16xbf16>, vector<16x8xbf16>, vector<16x8xf32> -> vector<16x8xf32>
    %c0_20 = arith.constant 0 : index
    %c0_21 = arith.constant 0 : index
    %51 = vector.load %arg6[%c0_20, %c0_21] : memref<32x32xbf16, #tpu.memory_space<vmem>>, vector<8x32xbf16>
    %52 = arith.truncf %50 : vector<16x8xf32> to vector<16x8xbf16>
    %cst_22 = arith.constant dense<0.000000e+00> : vector<16x32xf32>
    %53 = tpu.matmul %52, %51, %cst_22 {dimension_numbers = #tpu.dot_dimension_numbers<[1], [0], [0], [1], [0, 0, 1, 1], [], []>} : vector<16x8xbf16>, vector<8x32xbf16>, vector<16x32xf32> -> vector<16x32xf32>
    %54 = vector.extract_strided_slice %29 {offsets = [0, 8], sizes = [16, 8], strides = [1, 1]} : vector<16x96xf32> to vector<16x8xf32>
    %cst_23 = arith.constant 0.353553385 : f32
    %55 = vector.broadcast %cst_23 : f32 to vector<16x8xf32>
    %56 = arith.mulf %54, %55 : vector<16x8xf32>
    %57 = vector.extract_strided_slice %29 {offsets = [0, 40], sizes = [16, 8], strides = [1, 1]} : vector<16x96xf32> to vector<16x8xf32>
    %58 = vector.extract_strided_slice %29 {offsets = [0, 72], sizes = [16, 8], strides = [1, 1]} : vector<16x96xf32> to vector<16x8xf32>
    %59 = arith.truncf %56 : vector<16x8xf32> to vector<16x8xbf16>
    %60 = arith.truncf %57 : vector<16x8xf32> to vector<16x8xbf16>
    %cst_24 = arith.constant dense<0.000000e+00> : vector<16x16xf32>
    %61 = tpu.matmul %59, %60, %cst_24 {dimension_numbers = #tpu.dot_dimension_numbers<[1], [1], [0], [0], [0, 0, 1, 0], [], []>} : vector<16x8xbf16>, vector<16x8xbf16>, vector<16x16xf32> -> vector<16x16xf32>
    %cst_25 = arith.constant dense<0xFF800000> : vector<16xf32>
    %62 = vector.multi_reduction <maximumf>, %61, %cst_25 [1] : vector<16x16xf32> to vector<16xf32>
    %63 = vector.shape_cast %62 : vector<16xf32> to vector<16x1xf32>
    %64 = vector.broadcast %63 : vector<16x1xf32> to vector<16x16xf32>
    %65 = arith.subf %61, %64 : vector<16x16xf32>
    %66 = math.exp %65 : vector<16x16xf32>
    %cst_26 = arith.constant dense<0.000000e+00> : vector<16xf32>
    %67 = vector.multi_reduction <add>, %66, %cst_26 [1] : vector<16x16xf32> to vector<16xf32>
    %68 = vector.shape_cast %67 : vector<16xf32> to vector<16x1xf32>
    %69 = tpu.reciprocal %68 {approx = true} : vector<16x1xf32> -> vector<16x1xf32>
    %70 = vector.broadcast %69 : vector<16x1xf32> to vector<16x16xf32>
    %71 = arith.mulf %66, %70 : vector<16x16xf32>
    %72 = arith.truncf %71 : vector<16x16xf32> to vector<16x16xbf16>
    %73 = arith.truncf %58 : vector<16x8xf32> to vector<16x8xbf16>
    %cst_27 = arith.constant dense<0.000000e+00> : vector<16x8xf32>
    %74 = tpu.matmul %72, %73, %cst_27 {dimension_numbers = #tpu.dot_dimension_numbers<[1], [0], [0], [1], [0, 0, 1, 1], [], []>} : vector<16x16xbf16>, vector<16x8xbf16>, vector<16x8xf32> -> vector<16x8xf32>
    %c8 = arith.constant 8 : index
    %c0_28 = arith.constant 0 : index
    %75 = vector.load %arg6[%c8, %c0_28] : memref<32x32xbf16, #tpu.memory_space<vmem>>, vector<8x32xbf16>
    %76 = arith.truncf %74 : vector<16x8xf32> to vector<16x8xbf16>
    %cst_29 = arith.constant dense<0.000000e+00> : vector<16x32xf32>
    %77 = tpu.matmul %76, %75, %cst_29 {dimension_numbers = #tpu.dot_dimension_numbers<[1], [0], [0], [1], [0, 0, 1, 1], [], []>} : vector<16x8xbf16>, vector<8x32xbf16>, vector<16x32xf32> -> vector<16x32xf32>
    %78 = arith.addf %53, %77 : vector<16x32xf32>
    %79 = vector.extract_strided_slice %29 {offsets = [0, 16], sizes = [16, 8], strides = [1, 1]} : vector<16x96xf32> to vector<16x8xf32>
    %cst_30 = arith.constant 0.353553385 : f32
    %80 = vector.broadcast %cst_30 : f32 to vector<16x8xf32>
    %81 = arith.mulf %79, %80 : vector<16x8xf32>
    %82 = vector.extract_strided_slice %29 {offsets = [0, 48], sizes = [16, 8], strides = [1, 1]} : vector<16x96xf32> to vector<16x8xf32>
    %83 = vector.extract_strided_slice %29 {offsets = [0, 80], sizes = [16, 8], strides = [1, 1]} : vector<16x96xf32> to vector<16x8xf32>
    %84 = arith.truncf %81 : vector<16x8xf32> to vector<16x8xbf16>
    %85 = arith.truncf %82 : vector<16x8xf32> to vector<16x8xbf16>
    %cst_31 = arith.constant dense<0.000000e+00> : vector<16x16xf32>
    %86 = tpu.matmul %84, %85, %cst_31 {dimension_numbers = #tpu.dot_dimension_numbers<[1], [1], [0], [0], [0, 0, 1, 0], [], []>} : vector<16x8xbf16>, vector<16x8xbf16>, vector<16x16xf32> -> vector<16x16xf32>
    %cst_32 = arith.constant dense<0xFF800000> : vector<16xf32>
    %87 = vector.multi_reduction <maximumf>, %86, %cst_32 [1] : vector<16x16xf32> to vector<16xf32>
    %88 = vector.shape_cast %87 : vector<16xf32> to vector<16x1xf32>
    %89 = vector.broadcast %88 : vector<16x1xf32> to vector<16x16xf32>
    %90 = arith.subf %86, %89 : vector<16x16xf32>
    %91 = math.exp %90 : vector<16x16xf32>
    %cst_33 = arith.constant dense<0.000000e+00> : vector<16xf32>
    %92 = vector.multi_reduction <add>, %91, %cst_33 [1] : vector<16x16xf32> to vector<16xf32>
    %93 = vector.shape_cast %92 : vector<16xf32> to vector<16x1xf32>
    %94 = tpu.reciprocal %93 {approx = true} : vector<16x1xf32> -> vector<16x1xf32>
    %95 = vector.broadcast %94 : vector<16x1xf32> to vector<16x16xf32>
    %96 = arith.mulf %91, %95 : vector<16x16xf32>
    %97 = arith.truncf %96 : vector<16x16xf32> to vector<16x16xbf16>
    %98 = arith.truncf %83 : vector<16x8xf32> to vector<16x8xbf16>
    %cst_34 = arith.constant dense<0.000000e+00> : vector<16x8xf32>
    %99 = tpu.matmul %97, %98, %cst_34 {dimension_numbers = #tpu.dot_dimension_numbers<[1], [0], [0], [1], [0, 0, 1, 1], [], []>} : vector<16x16xbf16>, vector<16x8xbf16>, vector<16x8xf32> -> vector<16x8xf32>
    %c16 = arith.constant 16 : index
    %c0_35 = arith.constant 0 : index
    %100 = vector.load %arg6[%c16, %c0_35] : memref<32x32xbf16, #tpu.memory_space<vmem>>, vector<8x32xbf16>
    %101 = arith.truncf %99 : vector<16x8xf32> to vector<16x8xbf16>
    %cst_36 = arith.constant dense<0.000000e+00> : vector<16x32xf32>
    %102 = tpu.matmul %101, %100, %cst_36 {dimension_numbers = #tpu.dot_dimension_numbers<[1], [0], [0], [1], [0, 0, 1, 1], [], []>} : vector<16x8xbf16>, vector<8x32xbf16>, vector<16x32xf32> -> vector<16x32xf32>
    %103 = arith.addf %78, %102 : vector<16x32xf32>
    %104 = vector.extract_strided_slice %29 {offsets = [0, 24], sizes = [16, 8], strides = [1, 1]} : vector<16x96xf32> to vector<16x8xf32>
    %cst_37 = arith.constant 0.353553385 : f32
    %105 = vector.broadcast %cst_37 : f32 to vector<16x8xf32>
    %106 = arith.mulf %104, %105 : vector<16x8xf32>
    %107 = vector.extract_strided_slice %29 {offsets = [0, 56], sizes = [16, 8], strides = [1, 1]} : vector<16x96xf32> to vector<16x8xf32>
    %108 = vector.extract_strided_slice %29 {offsets = [0, 88], sizes = [16, 8], strides = [1, 1]} : vector<16x96xf32> to vector<16x8xf32>
    %109 = arith.truncf %106 : vector<16x8xf32> to vector<16x8xbf16>
    %110 = arith.truncf %107 : vector<16x8xf32> to vector<16x8xbf16>
    %cst_38 = arith.constant dense<0.000000e+00> : vector<16x16xf32>
    %111 = tpu.matmul %109, %110, %cst_38 {dimension_numbers = #tpu.dot_dimension_numbers<[1], [1], [0], [0], [0, 0, 1, 0], [], []>} : vector<16x8xbf16>, vector<16x8xbf16>, vector<16x16xf32> -> vector<16x16xf32>
    %cst_39 = arith.constant dense<0xFF800000> : vector<16xf32>
    %112 = vector.multi_reduction <maximumf>, %111, %cst_39 [1] : vector<16x16xf32> to vector<16xf32>
    %113 = vector.shape_cast %112 : vector<16xf32> to vector<16x1xf32>
    %114 = vector.broadcast %113 : vector<16x1xf32> to vector<16x16xf32>
    %115 = arith.subf %111, %114 : vector<16x16xf32>
    %116 = math.exp %115 : vector<16x16xf32>
    %cst_40 = arith.constant dense<0.000000e+00> : vector<16xf32>
    %117 = vector.multi_reduction <add>, %116, %cst_40 [1] : vector<16x16xf32> to vector<16xf32>
    %118 = vector.shape_cast %117 : vector<16xf32> to vector<16x1xf32>
    %119 = tpu.reciprocal %118 {approx = true} : vector<16x1xf32> -> vector<16x1xf32>
    %120 = vector.broadcast %119 : vector<16x1xf32> to vector<16x16xf32>
    %121 = arith.mulf %116, %120 : vector<16x16xf32>
    %122 = arith.truncf %121 : vector<16x16xf32> to vector<16x16xbf16>
    %123 = arith.truncf %108 : vector<16x8xf32> to vector<16x8xbf16>
    %cst_41 = arith.constant dense<0.000000e+00> : vector<16x8xf32>
    %124 = tpu.matmul %122, %123, %cst_41 {dimension_numbers = #tpu.dot_dimension_numbers<[1], [0], [0], [1], [0, 0, 1, 1], [], []>} : vector<16x16xbf16>, vector<16x8xbf16>, vector<16x8xf32> -> vector<16x8xf32>
    %c24 = arith.constant 24 : index
    %c0_42 = arith.constant 0 : index
    %125 = vector.load %arg6[%c24, %c0_42] : memref<32x32xbf16, #tpu.memory_space<vmem>>, vector<8x32xbf16>
    %126 = arith.truncf %124 : vector<16x8xf32> to vector<16x8xbf16>
    %cst_43 = arith.constant dense<0.000000e+00> : vector<16x32xf32>
    %127 = tpu.matmul %126, %125, %cst_43 {dimension_numbers = #tpu.dot_dimension_numbers<[1], [0], [0], [1], [0, 0, 1, 1], [], []>} : vector<16x8xbf16>, vector<8x32xbf16>, vector<16x32xf32> -> vector<16x32xf32>
    %128 = arith.addf %103, %127 : vector<16x32xf32>
    %129 = arith.addf %1, %128 : vector<16x32xf32>
    %c0_44 = arith.constant 0 : index
    %c0_45 = arith.constant 0 : index
    %130 = vector.load %arg7[%c0_44, %c0_45] : memref<1x32xf32, #tpu.memory_space<vmem>>, vector<1x32xf32>
    %131 = vector.broadcast %130 : vector<1x32xf32> to vector<16x32xf32>
    %132 = arith.addf %129, %131 : vector<16x32xf32>
    %c0_46 = arith.constant 0 : index
    %c0_47 = arith.constant 0 : index
    %133 = vector.load %arg8[%c0_46, %c0_47] : memref<1x32xf32, #tpu.memory_space<vmem>>, vector<1x32xf32>
    %c0_48 = arith.constant 0 : index
    %c0_49 = arith.constant 0 : index
    %134 = vector.load %arg9[%c0_48, %c0_49] : memref<1x32xf32, #tpu.memory_space<vmem>>, vector<1x32xf32>
    %cst_50 = arith.constant dense<0.000000e+00> : vector<16xf32>
    %135 = vector.multi_reduction <add>, %132, %cst_50 [1] : vector<16x32xf32> to vector<16xf32>
    %136 = vector.shape_cast %135 : vector<16xf32> to vector<16x1xf32>
    %cst_51 = arith.constant 3.200000e+01 : f32
    %137 = vector.broadcast %cst_51 : f32 to vector<16x1xf32>
    %138 = arith.divf %136, %137 : vector<16x1xf32>
    %139 = vector.broadcast %138 : vector<16x1xf32> to vector<16x32xf32>
    %140 = arith.subf %132, %139 : vector<16x32xf32>
    %141 = arith.mulf %140, %140 : vector<16x32xf32>
    %cst_52 = arith.constant dense<0.000000e+00> : vector<16xf32>
    %142 = vector.multi_reduction <add>, %141, %cst_52 [1] : vector<16x32xf32> to vector<16xf32>
    %143 = vector.shape_cast %142 : vector<16xf32> to vector<16x1xf32>
    %cst_53 = arith.constant 3.200000e+01 : f32
    %144 = vector.broadcast %cst_53 : f32 to vector<16x1xf32>
    %145 = arith.divf %143, %144 : vector<16x1xf32>
    %cst_54 = arith.constant 9.99999974E-6 : f32
    %146 = vector.broadcast %cst_54 : f32 to vector<16x1xf32>
    %147 = arith.addf %145, %146 : vector<16x1xf32>
    %148 = math.rsqrt %147 : vector<16x1xf32>
    %149 = vector.broadcast %148 : vector<16x1xf32> to vector<16x32xf32>
    %150 = arith.mulf %140, %149 : vector<16x32xf32>
    %151 = vector.broadcast %133 : vector<1x32xf32> to vector<16x32xf32>
    %152 = arith.mulf %150, %151 : vector<16x32xf32>
    %153 = vector.broadcast %134 : vector<1x32xf32> to vector<16x32xf32>
    %154 = arith.addf %152, %153 : vector<16x32xf32>
    %155 = arith.truncf %154 : vector<16x32xf32> to vector<16x32xbf16>
    %c0_55 = arith.constant 0 : index
    %c0_56 = arith.constant 0 : index
    %156 = vector.load %arg10[%c0_55, %c0_56] : memref<32x128xbf16, #tpu.memory_space<vmem>>, vector<32x128xbf16>
    %cst_57 = arith.constant dense<0.000000e+00> : vector<16x128xf32>
    %157 = tpu.matmul %155, %156, %cst_57 {dimension_numbers = #tpu.dot_dimension_numbers<[1], [0], [0], [1], [0, 0, 1, 1], [], []>} : vector<16x32xbf16>, vector<32x128xbf16>, vector<16x128xf32> -> vector<16x128xf32>
    %c0_58 = arith.constant 0 : index
    %c0_59 = arith.constant 0 : index
    %158 = vector.load %arg11[%c0_58, %c0_59] : memref<1x128xf32, #tpu.memory_space<vmem>>, vector<1x128xf32>
    %159 = vector.broadcast %158 : vector<1x128xf32> to vector<16x128xf32>
    %160 = arith.addf %157, %159 : vector<16x128xf32>
    %161 = arith.mulf %160, %160 : vector<16x128xf32>
    %162 = arith.mulf %160, %161 : vector<16x128xf32>
    %cst_60 = arith.constant 4.471500e-02 : f32
    %163 = vector.broadcast %cst_60 : f32 to vector<16x128xf32>
    %164 = arith.mulf %163, %162 : vector<16x128xf32>
    %165 = arith.addf %160, %164 : vector<16x128xf32>
    %cst_61 = arith.constant 0.797884583 : f32
    %166 = vector.broadcast %cst_61 : f32 to vector<16x128xf32>
    %167 = arith.mulf %166, %165 : vector<16x128xf32>
    %168 = math.tanh %167 : vector<16x128xf32>
    %cst_62 = arith.constant 1.000000e+00 : f32
    %169 = vector.broadcast %cst_62 : f32 to vector<16x128xf32>
    %170 = arith.addf %169, %168 : vector<16x128xf32>
    %cst_63 = arith.constant 5.000000e-01 : f32
    %171 = vector.broadcast %cst_63 : f32 to vector<16x128xf32>
    %172 = arith.mulf %171, %170 : vector<16x128xf32>
    %173 = arith.mulf %160, %172 : vector<16x128xf32>
    %174 = arith.truncf %173 : vector<16x128xf32> to vector<16x128xbf16>
    %c0_64 = arith.constant 0 : index
    %c0_65 = arith.constant 0 : index
    %175 = vector.load %arg12[%c0_64, %c0_65] : memref<128x32xbf16, #tpu.memory_space<vmem>>, vector<128x32xbf16>
    %cst_66 = arith.constant dense<0.000000e+00> : vector<16x32xf32>
    %176 = tpu.matmul %174, %175, %cst_66 {dimension_numbers = #tpu.dot_dimension_numbers<[1], [0], [0], [1], [0, 0, 1, 1], [], []>} : vector<16x128xbf16>, vector<128x32xbf16>, vector<16x32xf32> -> vector<16x32xf32>
    %c0_67 = arith.constant 0 : index
    %c0_68 = arith.constant 0 : index
    %177 = vector.load %arg13[%c0_67, %c0_68] : memref<1x32xf32, #tpu.memory_space<vmem>>, vector<1x32xf32>
    %178 = vector.broadcast %177 : vector<1x32xf32> to vector<16x32xf32>
    %179 = arith.addf %176, %178 : vector<16x32xf32>
    %180 = arith.addf %132, %179 : vector<16x32xf32>
    %c0_69 = arith.constant 0 : index
    %c0_70 = arith.constant 0 : index
    %c0_71 = arith.constant 0 : index
    %181 = vector.load %arg14[%c0_69, %c0_70, %c0_71] : memref<1x16x32xf32, #tpu.memory_space<vmem>>, vector<1x16x32xf32>
    %182 = vector.shape_cast %181 : vector<1x16x32xf32> to vector<16x32xf32>
    %183 = vector.shape_cast %180 : vector<16x32xf32> to vector<1x16x32xf32>
    tpu.vector_store %arg14[%c0_69, %c0_70, %c0_71], %183 {strides = array<i32>} : memref<1x16x32xf32, #tpu.memory_space<vmem>>, vector<1x16x32xf32>,
    return
  }
  func.func @transform_0(%arg0: i32) -> (i32, i32, i32) {
    %c0_i32 = arith.constant 0 : i32
    %c0_i32_0 = arith.constant 0 : i32
    %c0_i32_1 = arith.constant 0 : i32
    return %arg0, %c0_i32, %c0_i32_0 : i32, i32, i32
  }
  func.func @transform_1(%arg0: i32) -> (i32, i32) {
    %c0_i32 = arith.constant 0 : i32
    %c0_i32_0 = arith.constant 0 : i32
    %c0_i32_1 = arith.constant 0 : i32
    return %c0_i32, %c0_i32_0 : i32, i32
  }
  func.func @transform_2(%arg0: i32) -> (i32, i32) {
    %c0_i32 = arith.constant 0 : i32
    %c0_i32_0 = arith.constant 0 : i32
    %c0_i32_1 = arith.constant 0 : i32
    return %c0_i32, %c0_i32_0 : i32, i32
  }
  func.func @transform_3(%arg0: i32) -> (i32, i32) {
    %c0_i32 = arith.constant 0 : i32
    %c0_i32_0 = arith.constant 0 : i32
    %c0_i32_1 = arith.constant 0 : i32
    return %c0_i32, %c0_i32_0 : i32, i32
  }
  func.func @transform_4(%arg0: i32) -> (i32, i32) {
    %c0_i32 = arith.constant 0 : i32
    %c0_i32_0 = arith.constant 0 : i32
    %c0_i32_1 = arith.constant 0 : i32
    return %c0_i32, %c0_i32_0 : i32, i32
  }
  func.func @transform_5(%arg0: i32) -> (i32, i32) {
    %c0_i32 = arith.constant 0 : i32
    %c0_i32_0 = arith.constant 0 : i32
    %c0_i32_1 = arith.constant 0 : i32
    return %c0_i32, %c0_i32_0 : i32, i32
  }
  func.func @transform_6(%arg0: i32) -> (i32, i32) {
    %c0_i32 = arith.constant 0 : i32
    %c0_i32_0 = arith.constant 0 : i32
    %c0_i32_1 = arith.constant 0 : i32
    return %c0_i32, %c0_i32_0 : i32, i32
  }
  func.func @transform_7(%arg0: i32) -> (i32, i32) {
    %c0_i32 = arith.constant 0 : i32
    %c0_i32_0 = arith.constant 0 : i32
    %c0_i32_1 = arith.constant 0 : i32
    return %c0_i32, %c0_i32_0 : i32, i32
  }
  func.func @transform_8(%arg0: i32) -> (i32, i32) {
    %c0_i32 = arith.constant 0 : i32
    %c0_i32_0 = arith.constant 0 : i32
    %c0_i32_1 = arith.constant 0 : i32
    return %c0_i32, %c0_i32_0 : i32, i32
  }
  func.func @transform_9(%arg0: i32) -> (i32, i32) {
    %c0_i32 = arith.constant 0 : i32
    %c0_i32_0 = arith.constant 0 : i32
    %c0_i32_1 = arith.constant 0 : i32
    return %c0_i32, %c0_i32_0 : i32, i32
  }
  func.func @transform_10(%arg0: i32) -> (i32, i32) {
    %c0_i32 = arith.constant 0 : i32
    %c0_i32_0 = arith.constant 0 : i32
    %c0_i32_1 = arith.constant 0 : i32
    return %c0_i32, %c0_i32_0 : i32, i32
  }
  func.func @transform_11(%arg0: i32) -> (i32, i32) {
    %c0_i32 = arith.constant 0 : i32
    %c0_i32_0 = arith.constant 0 : i32
    %c0_i32_1 = arith.constant 0 : i32
    return %c0_i32, %c0_i32_0 : i32, i32
  }
  func.func @transform_12(%arg0: i32) -> (i32, i32) {
    %c0_i32 = arith.constant 0 : i32
    %c0_i32_0 = arith.constant 0 : i32
    %c0_i32_1 = arith.constant 0 : i32
    return %c0_i32, %c0_i32_0 : i32, i32
  }
  func.func @transform_13(%arg0: i32) -> (i32, i32, i32) {
    %c0_i32 = arith.constant 0 : i32
    %c0_i32_0 = arith.constant 0 : i32
    %c0_i32_1 = arith.constant 0 : i32
    return %arg0, %c0_i32, %c0_i32_0 : i32, i32, i32
  }
}

</mosaic_0001>

<bundles_post_ra>
// kernel: encoder_forward.8
= control target key start
LH: loop header
LB: loop body
LE: loop exit
PB: predicated region body
PF: predicated region fallthrough
CT: control target
= control target key end

     0   :  { %s458_s18 = smov 0   ;;  %s501_s0 = inlined_call_operand.vmem [shape: f32[8,4,64], index: 0, kind: input, shape index: {}]   ;;  %s502_s1 = inlined_call_operand.vmem [shape: bf16[64,32], index: 1, kind: input, shape index: {}]   ;;  %s503_s2 = inlined_call_operand.vmem [shape: f32[1,32], index: 2, kind: input, shape index: {}]   ;;  %s504_s3 = inlined_call_operand.vmem [shape: f32[4,32], index: 3, kind: input, shape index: {}]   ;;  %s505_s4 = inlined_call_operand.vmem [shape: f32[8,32], index: 4, kind: input, shape index: {}]   ;;  %s506_s5 = inlined_call_operand.vmem [shape: f32[8,4,32], index: 5, kind: output, shape index: {}]  }
   0x1 LB: > { %s464_s19 = sadd.s32 4294967295, %s424_s18   ;;  %p375_p0 = scmp.ge.s32.totalorder %s424_s18, 1  ;;  %s424_s18 = sphi %s458_s18, %s15_s18  }
   0x2   : > { %p186_p1 = scmp.lt.s32.totalorder %s424_s18, 9 }
   0x4   : > { %p187_p2 = pnand %p375_p0, %p186_p1 }
   0x5   : > { %v414_v0 = vld [vmem:[%s502_s1] sm:$0xff] (!%p187_p2)   ;;  %v426_v1 = vmov (!%p187_p2), 0.0   ;;  %v415_v2 = vld [vmem:[%s502_s1 + $0x8] sm:$0xff] (!%p187_p2)   ;;  %vm427_vm0 = vmmov (!%p187_p2), 0   ;;  %p212_p3 = scmp.lt.s32.totalorder (!%p187_p2), %s464_s19, 7  ;;  %v416_v3 = vld [vmem:[%s502_s1 + $0x10] sm:$0xff] (!%p187_p2)   ;;  %s308_s12 = scalar_lea.vmem (!%p187_p2), %s505_s4, %s464_s19 }
   0x6   : > { %190 = sbr.rel (%p187_p2) target bundleno = 241 (0xf1), region = 40  ;;  %392 = vmatprep.subr.bf16.mxu0 (!%p187_p2), %v426_v1  ;;  %400 = vmatprep.mubr.msk.bf16.mxu0 (!%p187_p2), %vm427_vm0, %v426_v1  ;;  %v417_v4 = vld [vmem:[%s502_s1 + $0x18] sm:$0xff] (!%p187_p2)   ;;  %vm262_vm1 = vcmask (!%p187_p2), 523264   ;;  %v378_v7 = vld [vmem:[%s503_s2] ss:$0 sm:$0xff] (!%p187_p2)  ;;  %vm315_vm2 = vcmask (!%p187_p2), 257024  }
   0x7   : > { %393 = vmatpush3.bf16.msra.mxu0 (!%p187_p2), %v414_v0  ;;  %v306_v9 = vld [vmem:[%s504_s3] sm:$0xf] (!%p187_p2) }
   0x8   : > { %394 = vmatprep.subr.bf16.mxu0 (!%p187_p2), %v426_v1  ;;  %v384_v12 = vld [vmem:[%s308_s12] ss:$0 sm:$0xff] (!%p187_p2) }
   0xb   : > { %395 = vmatpush3.bf16.msra.mxu0 (!%p187_p2), %v415_v2 }
   0xc   : > { %396 = vmatprep.subr.bf16.mxu0 (!%p187_p2), %v426_v1 }
   0xd   : > { %s213_s24 = scalar_select %p212_p3, %s464_s19, 7 }
   0xf   : > { %s376_s27 = sshll.u32 %s213_s24, 2  ;;  %397 = vmatpush3.bf16.msra.mxu0 %v416_v3 }
  0x10   : > { %s215_s30 = scalar_lea.vmem %s501_s0, %s376_s27  ;;  %398 = vmatprep.subr.bf16.mxu0 %v426_v1  ;;  %s219_s17 = scalar_lea.vmem %s506_s5, %s376_s27 }
  0x11   : > { %v221_v5 = vld [vmem:[%s215_s30] sm:$0xf] }
  0x12   : > { %v222_v6 = vpack.c.bf16 %v221_v5, %v221_v5 }
  0x13   : > { %399 = vmatpush3.bf16.msra.mxu0 %v417_v4 }
  0x16   : > { %401 = vmatmul.mubr.msk.bf16.vlgmr.msra.gmra.mrb[0].mxu0 %vm262_vm1, %v222_v6 }
  0xe9   : > { %v300_v8 = vpop.f32.mrb[0].mxu0 }
  0xea   : > { %v301_v10 = vadd.f32 %v378_v7, %v300_v8  ;;  %v402_v11 = vpop.f32.mrb[1].mxu0 }
  0xeb   : > { %v303_v13 = vpop.f32.mrb[2].mxu0 }
  0xec   : > { %v307_v14 = vadd.f32 %v306_v9, %v301_v10  ;;  %v403_v15 = vpop.f32.mrb[3].mxu0 }
  0xee   : > { %v314_v16 = vadd.f32 %v384_v12, %v307_v14 }
  0xf0   : > { %316 = vst.msk [vmem:[%s219_s17] sm:$0xf] %vm315_vm2, %v314_v16 }
  0xf1 PF: > { %s15_s18 = sadd.s32 1, %s424_s18  }
  0xf2   : > { %p12_p4 = scmp.ge.s32.totalorder %s15_s18, 10  }
  0xf4   :  { %14 = sbr.rel (!%p12_p4) target bundleno = 1 (0x1), region = 71 }

// kernel: encoder_forward.7
= control target key start
LH: loop header
LB: loop body
LE: loop exit
PB: predicated region body
PF: predicated region fallthrough
CT: control target
= control target key end

     0   :  { %vm51_vm0 = vcmask 1040384   ;;  %vm47_vm1 = vcmask 7168   ;;  %v593_v0 = vmov 0.0   ;;  %vm594_vm2 = vmmov 0   ;;  %s748_s1 = inlined_call_operand.vmem [shape: f32[1,16], index: 1, kind: input, shape index: {}]   ;;  %s749_s0 = inlined_call_operand.vmem [shape: f32[8,1], index: 0, kind: input, shape index: {}]   ;;  %s750_s3 = inlined_call_operand.vmem [shape: f32[16,32], index: 3, kind: input, shape index: {}]   ;;  %s751_s5 = inlined_call_operand.vmem [shape: f32[32,64], index: 5, kind: input, shape index: {}]   ;;  %s752_s2 = inlined_call_operand.vmem [shape: f32[1,16], index: 2, kind: input, shape index: {}]   ;;  %s753_s7 = inlined_call_operand.vmem [shape: f32[64,32], index: 7, kind: input, shape index: {}]   ;;  %s754_s4 = inlined_call_operand.vmem [shape: f32[1,32], index: 4, kind: input, shape index: {}]   ;;  %s755_s9 = inlined_call_operand.vmem [shape: f32[32,32], index: 9, kind: input, shape index: {}]   ;;  %s756_s6 = inlined_call_operand.vmem [shape: f32[1,64], index: 6, kind: input, shape index: {}]   ;;  %s757_s8 = inlined_call_operand.vmem [shape: f32[1,32], index: 8, kind: input, shape index: {}]   ;;  %s758_s10 = inlined_call_operand.vmem [shape: f32[1,32], index: 10, kind: input, shape index: {}]   ;;  %s759_s11 = inlined_call_operand.vmem [shape: f32[8,32], index: 11, kind: output, shape index: {}]  }
   0x1   :  { %510 = vmatprep.subr.mxu0 %v593_v0  ;;  %v39_v1 = vld [vmem:[%s748_s1] sm:$0x1]  ;;  %512 = vmatprep.mubr.msk.f32.mxu0 %vm594_vm2, %v593_v0  ;;  %v127_v4 = vld [vmem:[%s750_s3 + $0x8] sm:$0xff]  ;;  %v595_v6 = vmov 0.0|0.0   ;;  %vm135_vm3 = vcmask 130048   ;;  %v212_v15 = vld [vmem:[%s751_s5 + $0x10] sm:$0xff] }
   0x2   :  { %v38_v2 = vld [vmem:[%s749_s0] sm:$0xff]  ;;  %511 = vmatpush3.msk.msra.mxu0 %vm51_vm0, %v39_v1  ;;  %519 = vmatprep.mubr.msk.f32.mxu1 %vm594_vm2, %v593_v0  ;;  %v211_v8 = vld [vmem:[%s751_s5 + $0x8] sm:$0xff]  ;;  %v213_v16 = vld [vmem:[%s751_s5 + $0x18] sm:$0xff]  ;;  %vm221_vm4 = vcmask 261120   ;;  %vm311_vm5 = vcmask 523264  }
   0x3   :  { %513 = vmatmul.mubr.msk.f32.vlgmr.msra.gmra.mrb[0].mxu0 %vm47_vm1, %v38_v2  ;;  %v126_v3 = vld [vmem:[%s750_s3] sm:$0xff]  ;;  %563 = vmatprep.subr.bf16.mxu1 %v595_v6  ;;  %v570_v17 = vpack.c.bf16 %v213_v16, %v212_v15  ;;  %v297_v19 = vld [vmem:[%s753_s7 + $0x8] sm:$0xff]  ;;  %v298_v20 = vld [vmem:[%s753_s7 + $0x10] sm:$0xff] }
   0x4   :  { %530 = vmatprep.mubr.msk.f32.mxu0 %vm594_vm2, %v593_v0  ;;  %v564_v5 = vpack.c.bf16 %v127_v4, %v126_v3  ;;  %566 = vmatprep.subr.bf16.mxu0 %v595_v6  ;;  %v210_v7 = vld [vmem:[%s751_s5] sm:$0xff]  ;;  %v299_v22 = vld [vmem:[%s753_s7 + $0x18] sm:$0xff]  ;;  %v301_v25 = vld [vmem:[%s753_s7 + $0x28] sm:$0xff] }
   0x5   :  { %v567_v9 = vpack.c.bf16 %v211_v8, %v210_v7  ;;  %v475_v10 = vld [vmem:[%s752_s2] ss:$0 sm:$0xff]  ;;  %v576_v23 = vpack.c.bf16 %v299_v22, %v298_v20  ;;  %v302_v32 = vld [vmem:[%s753_s7 + $0x30] sm:$0xff]  ;;  %v303_v33 = vld [vmem:[%s753_s7 + $0x38] sm:$0xff] }
   0x6   :  { %565 = vmatpush3.bf16.msra.mxu1 %v564_v5  ;;  %v296_v18 = vld [vmem:[%s753_s7] sm:$0xff]  ;;  %v582_v34 = vpack.c.bf16 %v303_v33, %v302_v32  ;;  %v387_v36 = vld [vmem:[%s755_s9 + $0x8] sm:$0xff]  ;;  %v388_v43 = vld [vmem:[%s755_s9 + $0x10] sm:$0xff] }
   0x7   :  { %572 = vmatprep.subr.bf16.mxu1 %v595_v6  ;;  %568 = vmatpush3.bf16.msra.mxu0 %v567_v9  ;;  %v573_v21 = vpack.c.bf16 %v297_v19, %v296_v18  ;;  %v300_v24 = vld [vmem:[%s753_s7 + $0x20] sm:$0xff]  ;;  %v389_v44 = vld [vmem:[%s755_s9 + $0x18] sm:$0xff] }
   0x8   :  { %569 = vmatprep.subr.bf16.mxu0 %v595_v6  ;;  %v579_v26 = vpack.c.bf16 %v301_v25, %v300_v24  ;;  %v478_v27 = vld [vmem:[%s754_s4] ss:$0 sm:$0xff]  ;;  %v588_v45 = vpack.c.bf16 %v389_v44, %v388_v43 }
   0x9   :  { %v386_v35 = vld [vmem:[%s755_s9] sm:$0xff] }
   0xa   :  { %v585_v37 = vpack.c.bf16 %v387_v36, %v386_v35  ;;  %v480_v38 = vld [vmem:[%s756_s6] ss:$0 sm:$0xff] }
   0xb   :  { %571 = vmatpush3.bf16.msra.mxu0 %v570_v17  ;;  %v482_v46 = vld [vmem:[%s757_s8] ss:$0 sm:$0xff] }
   0xc   :  { %584 = vmatprep.subr.bf16.mxu0 %v595_v6  ;;  %v484_v51 = vld [vmem:[%s758_s10] ss:$0 sm:$0xff] }
  0xd6   :  { %v121_v11 = vpop.f32.mrb[0].mxu0 }
  0xd7   :  { %v122_v12 = vadd.f32 %v475_v10, %v121_v11  ;;  %v514_v13 = vpop.f32.mrb[1].mxu0 }
  0xd9   :  { %v125_v14 = vmax.f32 %v122_v12, 0.0 }
  0xdb   :  { %520 = vmatmul.mubr.msk.f32.vlgmr.msra.gmra.mrb[0].mxu1 %vm135_vm3, %v125_v14 }
  0xdc   :  { %549 = vmatprep.mubr.msk.f32.mxu1 %vm594_vm2, %v593_v0  ;;  %574 = vmatpush3.bf16.msra.mxu1 %v573_v21 }
  0xdd   :  { %575 = vmatprep.subr.bf16.mxu1 %v595_v6 }
  0xe0   :  { %577 = vmatpush3.bf16.msra.mxu1 %v576_v23 }
  0xe1   :  { %578 = vmatprep.subr.bf16.mxu1 %v595_v6 }
  0xe4   :  { %580 = vmatpush3.bf16.msra.mxu1 %v579_v26 }
  0xe5   :  { %581 = vmatprep.subr.bf16.mxu1 %v595_v6 }
  0xe8   :  { %583 = vmatpush3.bf16.msra.mxu1 %v582_v34 }
 0x1ae   :  { %v205_v28 = vpop.f32.mrb[0].mxu1 }
 0x1af   :  { %v206_v29 = vadd.f32 %v478_v27, %v205_v28  ;;  %v521_v30 = vpop.f32.mrb[1].mxu1 }
 0x1b1   :  { %v209_v31 = vmax.f32 %v206_v29, 0.0 }
 0x1b3   :  { %531 = vmatmul.mubr.msk.f32.vlgmr.msra.gmra.mrb[2].mxu0 %vm221_vm4, %v209_v31 }
 0x1b4   :  { %560 = vmatprep.mubr.msk.f32.mxu0 %vm594_vm2, %v593_v0  ;;  %586 = vmatpush3.bf16.msra.mxu0 %v585_v37 }
 0x1b5   :  { %587 = vmatprep.subr.bf16.mxu0 %v595_v6 }
 0x1b8   :  { %589 = vmatpush3.bf16.msra.mxu0 %v588_v45 }
 0x286   :  { %v291_v39 = vpop.f32.mrb[2].mxu0 }
 0x287   :  { %v292_v40 = vadd.f32 %v480_v38, %v291_v39  ;;  %v532_v41 = vpop.f32.mrb[3].mxu0 }
 0x289   :  { %v295_v42 = vmax.f32 %v292_v40, 0.0 }
 0x28b   :  { %550 = vmatmul.mubr.msk.f32.vlgmr.msra.gmra.mrb[2].mxu1 %vm311_vm5, %v295_v42 }
 0x35e   :  { %v381_v47 = vpop.f32.mrb[2].mxu1 }
 0x35f   :  { %v382_v48 = vadd.f32 %v482_v46, %v381_v47  ;;  %v551_v49 = vpop.f32.mrb[3].mxu1 }
 0x361   :  { %v385_v50 = vmax.f32 %v382_v48, 0.0 }
 0x363   :  { %561 = vmatmul.mubr.msk.f32.vlgmr.msra.gmra.mrb[4].mxu0 %vm221_vm4, %v385_v50 }
 0x436   :  { %v466_v52 = vpop.f32.mrb[4].mxu0 }
 0x437   :  { %v467_v53 = vadd.f32 %v484_v51, %v466_v52  ;;  %v562_v54 = vpop.f32.mrb[5].mxu0 }
 0x439   :  { %470 = vst.msk [vmem:[%s759_s11] sm:$0xff] %vm221_vm4, %v467_v53 }

// kernel: encoder_forward.6
= control target key start
LH: loop header
LB: loop body
LE: loop exit
PB: predicated region body
PF: predicated region fallthrough
CT: control target
= control target key end

     0   :  { %vm2055_vm0 = vmmov 0   ;;  %vm997_vm1 = vcmask 523264   ;;  %vm1083_vm2 = vcmask 261120   ;;  %s3131_s1 = inlined_call_operand.vmem [shape: f32[2304,64], index: 1, kind: input, shape index: {}]   ;;  %s3132_s0 = inlined_call_operand.vmem [shape: f32[8,2304], index: 0, kind: input, shape index: {}]   ;;  %s3133_s3 = inlined_call_operand.vmem [shape: f32[64,32], index: 3, kind: input, shape index: {}]   ;;  %s3134_s2 = inlined_call_operand.vmem [shape: f32[1,64], index: 2, kind: input, shape index: {}]   ;;  %s3135_s5 = inlined_call_operand.vmem [shape: f32[32,32], index: 5, kind: input, shape index: {}]   ;;  %s3136_s4 = inlined_call_operand.vmem [shape: f32[1,32], index: 4, kind: input, shape index: {}]   ;;  %s3137_s7 = inlined_call_operand.vmem [shape: f32[32,32], index: 7, kind: input, shape index: {}]   ;;  %s3138_s9 = inlined_call_operand.vmem [shape: f32[32,32], index: 9, kind: input, shape index: {}]   ;;  %s3139_s6 = inlined_call_operand.vmem [shape: f32[1,32], index: 6, kind: input, shape index: {}]   ;;  %s3140_s8 = inlined_call_operand.vmem [shape: f32[1,32], index: 8, kind: input, shape index: {}]   ;;  %s3141_s10 = inlined_call_operand.vmem [shape: f32[1,32], index: 10, kind: input, shape index: {}]   ;;  %s3142_s11 = inlined_call_operand.vmem [shape: f32[8,32], index: 11, kind: output, shape index: {}]  }
   0x1   :  { %v72_v0 = vld [vmem:[%s3131_s1 + $0x80] sm:$0xff]  ;;  %v73_v1 = vld [vmem:[%s3131_s1 + $0x88] sm:$0xff]  ;;  %v74_v11 = vld [vmem:[%s3131_s1 + $0x90] sm:$0xff] }
   0x2   :  { %v56_v2 = vld [vmem:[%s3131_s1] sm:$0xff]  ;;  %v1733_v3 = vpack.c.bf16 %v73_v1, %v72_v0  ;;  %v57_v4 = vld [vmem:[%s3131_s1 + $0x8] sm:$0xff]  ;;  %v75_v13 = vld [vmem:[%s3131_s1 + $0x98] sm:$0xff] }
   0x3   :  { %v104_v5 = vld [vmem:[%s3131_s1 + $0x180] sm:$0xff]  ;;  %v105_v6 = vld [vmem:[%s3131_s1 + $0x188] sm:$0xff]  ;;  %v1735_v7 = vpack.c.bf16 %v57_v4, %v56_v2  ;;  %v58_v14 = vld [vmem:[%s3131_s1 + $0x10] sm:$0xff]  ;;  %v1737_v16 = vpack.c.bf16 %v75_v13, %v74_v11 }
   0x4   :  { %v1765_v8 = vpack.c.bf16 %v105_v6, %v104_v5  ;;  %v88_v9 = vld [vmem:[%s3131_s1 + $0x100] sm:$0xff]  ;;  %v89_v10 = vld [vmem:[%s3131_s1 + $0x108] sm:$0xff]  ;;  %1734 = vmatprep.subr.bf16.mxu0 %v1733_v3  ;;  %v59_v15 = vld [vmem:[%s3131_s1 + $0x18] sm:$0xff] }
   0x5   :  { %v1767_v12 = vpack.c.bf16 %v89_v10, %v88_v9  ;;  %1736 = vmatpush3.bf16.msra.mxu0 %v1735_v7  ;;  %v1739_v17 = vpack.c.bf16 %v59_v15, %v58_v14  ;;  %v106_v18 = vld [vmem:[%s3131_s1 + $0x190] sm:$0xff]  ;;  %v107_v19 = vld [vmem:[%s3131_s1 + $0x198] sm:$0xff]  ;;  %v76_v23 = vld [vmem:[%s3131_s1 + $0xa0] sm:$0xff] }
   0x6   :  { %1766 = vmatprep.subr.bf16.mxu1 %v1765_v8  ;;  %v90_v20 = vld [vmem:[%s3131_s1 + $0x110] sm:$0xff]  ;;  %v1769_v21 = vpack.c.bf16 %v107_v19, %v106_v18  ;;  %v91_v22 = vld [vmem:[%s3131_s1 + $0x118] sm:$0xff]  ;;  %v77_v24 = vld [vmem:[%s3131_s1 + $0xa8] sm:$0xff]  ;;  %1738 = vmatprep.subr.bf16.mxu0 %v1737_v16 }
   0x7   :  { %1768 = vmatpush3.bf16.msra.mxu1 %v1767_v12  ;;  %v1771_v25 = vpack.c.bf16 %v91_v22, %v90_v20  ;;  %v1741_v26 = vpack.c.bf16 %v77_v24, %v76_v23  ;;  %v60_v27 = vld [vmem:[%s3131_s1 + $0x20] sm:$0xff]  ;;  %v61_v28 = vld [vmem:[%s3131_s1 + $0x28] sm:$0xff]  ;;  %v78_v35 = vld [vmem:[%s3131_s1 + $0xb0] sm:$0xff] }
   0x8   :  { %v108_v29 = vld [vmem:[%s3131_s1 + $0x1a0] sm:$0xff]  ;;  %1770 = vmatprep.subr.bf16.mxu1 %v1769_v21  ;;  %v109_v30 = vld [vmem:[%s3131_s1 + $0x1a8] sm:$0xff]  ;;  %v1743_v33 = vpack.c.bf16 %v61_v28, %v60_v27  ;;  %v79_v36 = vld [vmem:[%s3131_s1 + $0xb8] sm:$0xff] }
   0x9   :  { %v92_v31 = vld [vmem:[%s3131_s1 + $0x120] sm:$0xff]  ;;  %v93_v32 = vld [vmem:[%s3131_s1 + $0x128] sm:$0xff]  ;;  %1740 = vmatpush3.bf16.msra.mxu0 %v1739_v17  ;;  %v1773_v34 = vpack.c.bf16 %v109_v30, %v108_v29  ;;  %v62_v37 = vld [vmem:[%s3131_s1 + $0x30] sm:$0xff]  ;;  %v1745_v39 = vpack.c.bf16 %v79_v36, %v78_v35 }
   0xa   :  { %1742 = vmatprep.subr.bf16.mxu0 %v1741_v26  ;;  %v1775_v38 = vpack.c.bf16 %v93_v32, %v92_v31  ;;  %v63_v40 = vld [vmem:[%s3131_s1 + $0x38] sm:$0xff]  ;;  %v110_v41 = vld [vmem:[%s3131_s1 + $0x1b0] sm:$0xff]  ;;  %v80_v46 = vld [vmem:[%s3131_s1 + $0xc0] sm:$0xff] }
   0xb   :  { %1772 = vmatpush3.bf16.msra.mxu1 %v1771_v25  ;;  %v111_v42 = vld [vmem:[%s3131_s1 + $0x1b8] sm:$0xff]  ;;  %v94_v44 = vld [vmem:[%s3131_s1 + $0x130] sm:$0xff]  ;;  %v81_v47 = vld [vmem:[%s3131_s1 + $0xc8] sm:$0xff]  ;;  %v1747_v48 = vpack.c.bf16 %v63_v40, %v62_v37 }
   0xc   :  { %1774 = vmatprep.subr.bf16.mxu1 %v1773_v34  ;;  %v1777_v43 = vpack.c.bf16 %v111_v42, %v110_v41  ;;  %v95_v45 = vld [vmem:[%s3131_s1 + $0x138] sm:$0xff]  ;;  %v112_v49 = vld [vmem:[%s3131_s1 + $0x1c0] sm:$0xff]  ;;  %v113_v50 = vld [vmem:[%s3131_s1 + $0x1c8] sm:$0xff]  ;;  %v1749_v52 = vpack.c.bf16 %v81_v47, %v80_v46 }
   0xd   :  { %1744 = vmatpush3.bf16.msra.mxu0 %v1743_v33  ;;  %v1779_v51 = vpack.c.bf16 %v95_v45, %v94_v44  ;;  %v64_v53 = vld [vmem:[%s3131_s1 + $0x40] sm:$0xff]  ;;  %v65_v54 = vld [vmem:[%s3131_s1 + $0x48] sm:$0xff]  ;;  %v1781_v56 = vpack.c.bf16 %v113_v50, %v112_v49  ;;  %v82_v58 = vld [vmem:[%s3131_s1 + $0xd0] sm:$0xff] }
   0xe   :  { %1746 = vmatprep.subr.bf16.mxu0 %v1745_v39  ;;  %v96_v55 = vld [vmem:[%s3131_s1 + $0x140] sm:$0xff]  ;;  %v97_v57 = vld [vmem:[%s3131_s1 + $0x148] sm:$0xff]  ;;  %v83_v59 = vld [vmem:[%s3131_s1 + $0xd8] sm:$0xff]  ;;  %v1751_v62 = vpack.c.bf16 %v65_v54, %v64_v53 }
   0xf   :  { %1776 = vmatpush3.bf16.msra.mxu1 %v1775_v38  ;;  %v114_v60 = vld [vmem:[%s3131_s1 + $0x1d0] sm:$0xff]  ;;  %v115_v61 = vld [vmem:[%s3131_s1 + $0x1d8] sm:$0xff]  ;;  %v1783_v63 = vpack.c.bf16 %v97_v57, %v96_v55  ;;  %v1753_v0 = vpack.c.bf16 %v83_v59, %v82_v58  ;;  %v84_v6 = vld [vmem:[%s3131_s1 + $0xe0] sm:$0xff] }
  0x10   :  { %1778 = vmatprep.subr.bf16.mxu1 %v1777_v43  ;;  %v66_v1 = vld [vmem:[%s3131_s1 + $0x50] sm:$0xff]  ;;  %v67_v2 = vld [vmem:[%s3131_s1 + $0x58] sm:$0xff]  ;;  %v1785_v4 = vpack.c.bf16 %v115_v61, %v114_v60  ;;  %v85_v7 = vld [vmem:[%s3131_s1 + $0xe8] sm:$0xff] }
  0x11   :  { %1748 = vmatpush3.bf16.msra.mxu0 %v1747_v48  ;;  %v98_v3 = vld [vmem:[%s3131_s1 + $0x150] sm:$0xff]  ;;  %v99_v5 = vld [vmem:[%s3131_s1 + $0x158] sm:$0xff]  ;;  %v116_v8 = vld [vmem:[%s3131_s1 + $0x1e0] sm:$0xff]  ;;  %v1755_v10 = vpack.c.bf16 %v67_v2, %v66_v1  ;;  %v1757_v14 = vpack.c.bf16 %v85_v7, %v84_v6 }
  0x12   :  { %1750 = vmatprep.subr.bf16.mxu0 %v1749_v52  ;;  %v117_v9 = vld [vmem:[%s3131_s1 + $0x1e8] sm:$0xff]  ;;  %v68_v11 = vld [vmem:[%s3131_s1 + $0x60] sm:$0xff]  ;;  %v1787_v13 = vpack.c.bf16 %v99_v5, %v98_v3  ;;  %v86_v19 = vld [vmem:[%s3131_s1 + $0xf0] sm:$0xff] }
  0x13   :  { %1780 = vmatpush3.bf16.msra.mxu1 %v1779_v51  ;;  %v39_v12 = vld [vmem:[%s3132_s0 + $0x8] sm:$0xff]  ;;  %v100_v16 = vld [vmem:[%s3131_s1 + $0x160] sm:$0xff]  ;;  %v1789_v18 = vpack.c.bf16 %v117_v9, %v116_v8  ;;  %v87_v20 = vld [vmem:[%s3131_s1 + $0xf8] sm:$0xff] }
  0x14   :  { %1782 = vmatprep.subr.bf16.mxu1 %v1781_v56  ;;  %v69_v15 = vld [vmem:[%s3131_s1 + $0x68] sm:$0xff]  ;;  %415 = vmatprep.mubr.f32.mxu0 %v39_v12  ;;  %v41_v21 = vld [vmem:[%s3132_s0 + $0x18] sm:$0xff]  ;;  %v118_v22 = vld [vmem:[%s3131_s1 + $0x1f0] sm:$0xff]  ;;  %v1761_v26 = vpack.c.bf16 %v87_v20, %v86_v19 }
  0x15   :  { %1752 = vmatpush3.bf16.msra.mxu0 %v1751_v62  ;;  %v101_v17 = vld [vmem:[%s3131_s1 + $0x168] sm:$0xff]  ;;  %v119_v23 = vld [vmem:[%s3131_s1 + $0x1f8] sm:$0xff]  ;;  %485 = vmatprep.mubr.f32.mxu1 %v41_v21  ;;  %v1759_v24 = vpack.c.bf16 %v69_v15, %v68_v11  ;;  %v70_v27 = vld [vmem:[%s3131_s1 + $0x70] sm:$0xff] }
  0x16   :  { %1754 = vmatprep.subr.bf16.mxu0 %v1753_v0  ;;  %v1791_v25 = vpack.c.bf16 %v101_v17, %v100_v16  ;;  %v71_v28 = vld [vmem:[%s3131_s1 + $0x78] sm:$0xff]  ;;  %v102_v29 = vld [vmem:[%s3131_s1 + $0x170] sm:$0xff]  ;;  %v1793_v30 = vpack.c.bf16 %v119_v23, %v118_v22  ;;  %v136_v32 = vld [vmem:[%s3131_s1 + $0x280] sm:$0xff] }
  0x17   :  { %1784 = vmatpush3.bf16.msra.mxu1 %v1783_v63  ;;  %v103_v31 = vld [vmem:[%s3131_s1 + $0x178] sm:$0xff]  ;;  %v137_v33 = vld [vmem:[%s3131_s1 + $0x288] sm:$0xff]  ;;  %v168_v34 = vld [vmem:[%s3131_s1 + $0x380] sm:$0xff]  ;;  %v1763_v36 = vpack.c.bf16 %v71_v28, %v70_v27 }
  0x18   :  { %1786 = vmatprep.subr.bf16.mxu1 %v1785_v4  ;;  %v169_v35 = vld [vmem:[%s3131_s1 + $0x388] sm:$0xff]  ;;  %v1795_v37 = vpack.c.bf16 %v103_v31, %v102_v29  ;;  %v1797_v38 = vpack.c.bf16 %v137_v33, %v136_v32  ;;  %v120_v39 = vld [vmem:[%s3131_s1 + $0x200] sm:$0xff]  ;;  %v138_v44 = vld [vmem:[%s3131_s1 + $0x290] sm:$0xff] }
  0x19   :  { %1756 = vmatpush3.bf16.msra.mxu0 %v1755_v10  ;;  %v121_v40 = vld [vmem:[%s3131_s1 + $0x208] sm:$0xff]  ;;  %v152_v41 = vld [vmem:[%s3131_s1 + $0x300] sm:$0xff]  ;;  %v1829_v42 = vpack.c.bf16 %v169_v35, %v168_v34  ;;  %v139_v45 = vld [vmem:[%s3131_s1 + $0x298] sm:$0xff] }
  0x1a   :  { %1758 = vmatprep.subr.bf16.mxu0 %v1757_v14  ;;  %v153_v43 = vld [vmem:[%s3131_s1 + $0x308] sm:$0xff]  ;;  %v170_v46 = vld [vmem:[%s3131_s1 + $0x390] sm:$0xff]  ;;  %v171_v47 = vld [vmem:[%s3131_s1 + $0x398] sm:$0xff]  ;;  %v1799_v49 = vpack.c.bf16 %v121_v40, %v120_v39  ;;  %v1801_v52 = vpack.c.bf16 %v139_v45, %v138_v44 }
  0x1b   :  { %1788 = vmatpush3.bf16.msra.mxu1 %v1787_v13  ;;  %v38_v48 = vld [vmem:[%s3132_s0] sm:$0xff]  ;;  %v40_v50 = vld [vmem:[%s3132_s0 + $0x10] sm:$0xff]  ;;  %v1831_v51 = vpack.c.bf16 %v153_v43, %v152_v41  ;;  %v123_v54 = vld [vmem:[%s3131_s1 + $0x218] sm:$0xff]  ;;  %v1833_v56 = vpack.c.bf16 %v171_v47, %v170_v46 }
  0x1c   :  { %1790 = vmatprep.subr.bf16.mxu1 %v1789_v18  ;;  %v122_v53 = vld [vmem:[%s3131_s1 + $0x210] sm:$0xff]  ;;  %v155_v57 = vld [vmem:[%s3131_s1 + $0x318] sm:$0xff]  ;;  %v140_v58 = vld [vmem:[%s3131_s1 + $0x2a0] sm:$0xff] }
  0x1d   :  { %1760 = vmatpush3.bf16.msra.mxu0 %v1759_v24  ;;  %v154_v55 = vld [vmem:[%s3131_s1 + $0x310] sm:$0xff]  ;;  %v141_v59 = vld [vmem:[%s3131_s1 + $0x2a8] sm:$0xff]  ;;  %v172_v60 = vld [vmem:[%s3131_s1 + $0x3a0] sm:$0xff]  ;;  %v1803_v62 = vpack.c.bf16 %v123_v54, %v122_v53 }
  0x1e   :  { %1762 = vmatprep.subr.bf16.mxu0 %v1761_v26  ;;  %v173_v61 = vld [vmem:[%s3131_s1 + $0x3a8] sm:$0xff]  ;;  %v1835_v63 = vpack.c.bf16 %v155_v57, %v154_v55  ;;  %v1805_v0 = vpack.c.bf16 %v141_v59, %v140_v58  ;;  %v124_v1 = vld [vmem:[%s3131_s1 + $0x220] sm:$0xff]  ;;  %v142_v6 = vld [vmem:[%s3131_s1 + $0x2b0] sm:$0xff] }
  0x1f   :  { %1792 = vmatpush3.bf16.msra.mxu1 %v1791_v25  ;;  %v125_v2 = vld [vmem:[%s3131_s1 + $0x228] sm:$0xff]  ;;  %v156_v3 = vld [vmem:[%s3131_s1 + $0x320] sm:$0xff]  ;;  %v1837_v4 = vpack.c.bf16 %v173_v61, %v172_v60  ;;  %v143_v7 = vld [vmem:[%s3131_s1 + $0x2b8] sm:$0xff] }
  0x20   :  { %1794 = vmatprep.subr.bf16.mxu1 %v1793_v30  ;;  %v157_v5 = vld [vmem:[%s3131_s1 + $0x328] sm:$0xff]  ;;  %v174_v8 = vld [vmem:[%s3131_s1 + $0x3b0] sm:$0xff]  ;;  %v175_v9 = vld [vmem:[%s3131_s1 + $0x3b8] sm:$0xff]  ;;  %v1807_v10 = vpack.c.bf16 %v125_v2, %v124_v1  ;;  %v1809_v12 = vpack.c.bf16 %v143_v7, %v142_v6 }
  0x21   :  { %1764 = vmatpush3.bf16.msra.mxu0 %v1763_v36  ;;  %v1839_v11 = vpack.c.bf16 %v157_v5, %v156_v3  ;;  %v126_v13 = vld [vmem:[%s3131_s1 + $0x230] sm:$0xff]  ;;  %v127_v14 = vld [vmem:[%s3131_s1 + $0x238] sm:$0xff]  ;;  %v1841_v16 = vpack.c.bf16 %v175_v9, %v174_v8  ;;  %v144_v18 = vld [vmem:[%s3131_s1 + $0x2c0] sm:$0xff] }
  0x22   :  { %1798 = vmatprep.subr.bf16.mxu0 %v1797_v38  ;;  %v158_v15 = vld [vmem:[%s3131_s1 + $0x330] sm:$0xff]  ;;  %v159_v17 = vld [vmem:[%s3131_s1 + $0x338] sm:$0xff]  ;;  %v145_v19 = vld [vmem:[%s3131_s1 + $0x2c8] sm:$0xff]  ;;  %v1811_v23 = vpack.c.bf16 %v127_v14, %v126_v13 }
  0x23   :  { %1796 = vmatpush3.bf16.msra.mxu1 %v1795_v37  ;;  %v176_v20 = vld [vmem:[%s3131_s1 + $0x3c0] sm:$0xff]  ;;  %v177_v21 = vld [vmem:[%s3131_s1 + $0x3c8] sm:$0xff]  ;;  %v1843_v25 = vpack.c.bf16 %v159_v17, %v158_v15  ;;  %v1813_v26 = vpack.c.bf16 %v145_v19, %v144_v18  ;;  %v45_v29 = vld [vmem:[%s3132_s0 + $0x38] sm:$0xff] }
  0x24   :  { %1830 = vmatprep.subr.bf16.mxu1 %v1829_v42  ;;  %416 = vmatmul.mubr.f32.vlgmr.msra.gmra.mrb[0].mxu0 %v38_v48  ;;  %v43_v22 = vld [vmem:[%s3132_s0 + $0x28] sm:$0xff]  ;;  %v128_v24 = vld [vmem:[%s3131_s1 + $0x240] sm:$0xff]  ;;  %v1845_v30 = vpack.c.bf16 %v177_v21, %v176_v20  ;;  %v146_v32 = vld [vmem:[%s3131_s1 + $0x2d0] sm:$0xff] }
  0x25   :  { %1800 = vmatpush3.bf16.msra.mxu0 %v1799_v49  ;;  %555 = vmatprep.mubr.f32.mxu0 %v43_v22  ;;  %v129_v27 = vld [vmem:[%s3131_s1 + $0x248] sm:$0xff]  ;;  %v160_v28 = vld [vmem:[%s3131_s1 + $0x340] sm:$0xff]  ;;  %v147_v33 = vld [vmem:[%s3131_s1 + $0x2d8] sm:$0xff] }
  0x26   :  { %486 = vmatmul.mubr.f32.vlgmr.msra.gmra.mrb[0].mxu1 %v40_v50  ;;  %1802 = vmatprep.subr.bf16.mxu0 %v1801_v52  ;;  %v161_v31 = vld [vmem:[%s3131_s1 + $0x348] sm:$0xff]  ;;  %v178_v34 = vld [vmem:[%s3131_s1 + $0x3d0] sm:$0xff]  ;;  %v179_v35 = vld [vmem:[%s3131_s1 + $0x3d8] sm:$0xff]  ;;  %v1815_v36 = vpack.c.bf16 %v129_v27, %v128_v24  ;;  %v1817_v38 = vpack.c.bf16 %v147_v33, %v146_v32 }
  0x27   :  { %1832 = vmatpush3.bf16.msra.mxu1 %v1831_v51  ;;  %625 = vmatprep.mubr.f32.mxu1 %v45_v29  ;;  %v1847_v37 = vpack.c.bf16 %v161_v31, %v160_v28  ;;  %v130_v39 = vld [vmem:[%s3131_s1 + $0x250] sm:$0xff]  ;;  %v131_v40 = vld [vmem:[%s3131_s1 + $0x258] sm:$0xff]  ;;  %v1849_v42 = vpack.c.bf16 %v179_v35, %v178_v34  ;;  %v148_v44 = vld [vmem:[%s3131_s1 + $0x2e0] sm:$0xff] }
  0x28   :  { %1834 = vmatprep.subr.bf16.mxu1 %v1833_v56  ;;  %v162_v41 = vld [vmem:[%s3131_s1 + $0x350] sm:$0xff]  ;;  %v163_v43 = vld [vmem:[%s3131_s1 + $0x358] sm:$0xff]  ;;  %v149_v45 = vld [vmem:[%s3131_s1 + $0x2e8] sm:$0xff]  ;;  %v1819_v48 = vpack.c.bf16 %v131_v40, %v130_v39 }
  0x29   :  { %1804 = vmatpush3.bf16.msra.mxu0 %v1803_v62  ;;  %v180_v46 = vld [vmem:[%s3131_s1 + $0x3e0] sm:$0xff]  ;;  %v181_v47 = vld [vmem:[%s3131_s1 + $0x3e8] sm:$0xff]  ;;  %v1851_v49 = vpack.c.bf16 %v163_v43, %v162_v41  ;;  %v1821_v50 = vpack.c.bf16 %v149_v45, %v148_v44  ;;  %v150_v56 = vld [vmem:[%s3131_s1 + $0x2f0] sm:$0xff] }
  0x2a   :  { %1806 = vmatprep.subr.bf16.mxu0 %v1805_v0  ;;  %v132_v51 = vld [vmem:[%s3131_s1 + $0x260] sm:$0xff]  ;;  %v133_v52 = vld [vmem:[%s3131_s1 + $0x268] sm:$0xff]  ;;  %v1853_v54 = vpack.c.bf16 %v181_v47, %v180_v46  ;;  %v151_v57 = vld [vmem:[%s3131_s1 + $0x2f8] sm:$0xff] }
  0x2b   :  { %1836 = vmatpush3.bf16.msra.mxu1 %v1835_v63  ;;  %v164_v53 = vld [vmem:[%s3131_s1 + $0x360] sm:$0xff]  ;;  %v165_v55 = vld [vmem:[%s3131_s1 + $0x368] sm:$0xff]  ;;  %v182_v58 = vld [vmem:[%s3131_s1 + $0x3f0] sm:$0xff]  ;;  %v1823_v60 = vpack.c.bf16 %v133_v52, %v132_v51  ;;  %v1825_v62 = vpack.c.bf16 %v151_v57, %v150_v56 }
  0x2c   :  { %1838 = vmatprep.subr.bf16.mxu1 %v1837_v4  ;;  %v183_v59 = vld [vmem:[%s3131_s1 + $0x3f8] sm:$0xff]  ;;  %v1855_v61 = vpack.c.bf16 %v165_v55, %v164_v53  ;;  %v134_v63 = vld [vmem:[%s3131_s1 + $0x270] sm:$0xff]  ;;  %v200_v4 = vld [vmem:[%s3131_s1 + $0x480] sm:$0xff] }
  0x2d   :  { %1808 = vmatpush3.bf16.msra.mxu0 %v1807_v10  ;;  %v135_v0 = vld [vmem:[%s3131_s1 + $0x278] sm:$0xff]  ;;  %v166_v1 = vld [vmem:[%s3131_s1 + $0x370] sm:$0xff]  ;;  %v1857_v2 = vpack.c.bf16 %v183_v59, %v182_v58  ;;  %v201_v5 = vld [vmem:[%s3131_s1 + $0x488] sm:$0xff] }
  0x2e   :  { %1810 = vmatprep.subr.bf16.mxu0 %v1809_v12  ;;  %v167_v3 = vld [vmem:[%s3131_s1 + $0x378] sm:$0xff]  ;;  %v232_v6 = vld [vmem:[%s3131_s1 + $0x580] sm:$0xff]  ;;  %v233_v7 = vld [vmem:[%s3131_s1 + $0x588] sm:$0xff]  ;;  %v1827_v8 = vpack.c.bf16 %v135_v0, %v134_v63  ;;  %v1861_v10 = vpack.c.bf16 %v201_v5, %v200_v4 }
  0x2f   :  { %1840 = vmatpush3.bf16.msra.mxu1 %v1839_v11  ;;  %v1859_v9 = vpack.c.bf16 %v167_v3, %v166_v1  ;;  %v184_v11 = vld [vmem:[%s3131_s1 + $0x400] sm:$0xff]  ;;  %v185_v12 = vld [vmem:[%s3131_s1 + $0x408] sm:$0xff]  ;;  %v1893_v14 = vpack.c.bf16 %v233_v7, %v232_v6  ;;  %v203_v17 = vld [vmem:[%s3131_s1 + $0x498] sm:$0xff] }
  0x30   :  { %1842 = vmatprep.subr.bf16.mxu1 %v1841_v16  ;;  %v216_v13 = vld [vmem:[%s3131_s1 + $0x500] sm:$0xff]  ;;  %v217_v15 = vld [vmem:[%s3131_s1 + $0x508] sm:$0xff]  ;;  %v202_v16 = vld [vmem:[%s3131_s1 + $0x490] sm:$0xff]  ;;  %v1863_v21 = vpack.c.bf16 %v185_v12, %v184_v11 }
  0x31   :  { %1812 = vmatpush3.bf16.msra.mxu0 %v1811_v23  ;;  %v234_v18 = vld [vmem:[%s3131_s1 + $0x590] sm:$0xff]  ;;  %v235_v19 = vld [vmem:[%s3131_s1 + $0x598] sm:$0xff]  ;;  %v42_v20 = vld [vmem:[%s3132_s0 + $0x20] sm:$0xff]  ;;  %v1895_v23 = vpack.c.bf16 %v217_v15, %v216_v13  ;;  %v1865_v24 = vpack.c.bf16 %v203_v17, %v202_v16 }
  0x32   :  { %1814 = vmatprep.subr.bf16.mxu0 %v1813_v26  ;;  %v44_v22 = vld [vmem:[%s3132_s0 + $0x30] sm:$0xff]  ;;  %v187_v26 = vld [vmem:[%s3131_s1 + $0x418] sm:$0xff]  ;;  %v1897_v28 = vpack.c.bf16 %v235_v19, %v234_v18  ;;  %v205_v31 = vld [vmem:[%s3131_s1 + $0x4a8] sm:$0xff] }
  0x33   :  { %1844 = vmatpush3.bf16.msra.mxu1 %v1843_v25  ;;  %v186_v25 = vld [vmem:[%s3131_s1 + $0x410] sm:$0xff]  ;;  %v219_v29 = vld [vmem:[%s3131_s1 + $0x518] sm:$0xff]  ;;  %v236_v32 = vld [vmem:[%s3131_s1 + $0x5a0] sm:$0xff] }
  0x34   :  { %1846 = vmatprep.subr.bf16.mxu1 %v1845_v30  ;;  %v218_v27 = vld [vmem:[%s3131_s1 + $0x510] sm:$0xff]  ;;  %v204_v30 = vld [vmem:[%s3131_s1 + $0x4a0] sm:$0xff]  ;;  %v237_v33 = vld [vmem:[%s3131_s1 + $0x5a8] sm:$0xff]  ;;  %v1867_v35 = vpack.c.bf16 %v187_v26, %v186_v25 }
  0x35   :  { %1816 = vmatpush3.bf16.msra.mxu0 %v1815_v36  ;;  %v47_v34 = vld [vmem:[%s3132_s0 + $0x48] sm:$0xff]  ;;  %v49_v36 = vld [vmem:[%s3132_s0 + $0x58] sm:$0xff]  ;;  %v188_v39 = vld [vmem:[%s3131_s1 + $0x420] sm:$0xff] }
  0x36   :  { %1818 = vmatprep.subr.bf16.mxu0 %v1817_v38  ;;  %v1869_v38 = vpack.c.bf16 %v205_v31, %v204_v30  ;;  %v189_v40 = vld [vmem:[%s3131_s1 + $0x428] sm:$0xff]  ;;  %v220_v41 = vld [vmem:[%s3131_s1 + $0x520] sm:$0xff]  ;;  %v206_v44 = vld [vmem:[%s3131_s1 + $0x4b0] sm:$0xff] }
  0x37   :  { %1848 = vmatpush3.bf16.msra.mxu1 %v1847_v37  ;;  %v1899_v37 = vpack.c.bf16 %v219_v29, %v218_v27  ;;  %v221_v43 = vld [vmem:[%s3131_s1 + $0x528] sm:$0xff]  ;;  %v207_v45 = vld [vmem:[%s3131_s1 + $0x4b8] sm:$0xff]  ;;  %v238_v46 = vld [vmem:[%s3131_s1 + $0x5b0] sm:$0xff] }
  0x38   :  { %1850 = vmatprep.subr.bf16.mxu1 %v1849_v42  ;;  %v1901_v42 = vpack.c.bf16 %v237_v33, %v236_v32  ;;  %v239_v47 = vld [vmem:[%s3131_s1 + $0x5b8] sm:$0xff]  ;;  %v190_v51 = vld [vmem:[%s3131_s1 + $0x430] sm:$0xff]  ;;  %v208_v56 = vld [vmem:[%s3131_s1 + $0x4c0] sm:$0xff] }
  0x39   :  { %1820 = vmatpush3.bf16.msra.mxu0 %v1819_v48  ;;  %v1871_v48 = vpack.c.bf16 %v189_v40, %v188_v39  ;;  %v191_v52 = vld [vmem:[%s3131_s1 + $0x438] sm:$0xff]  ;;  %v222_v53 = vld [vmem:[%s3131_s1 + $0x530] sm:$0xff]  ;;  %v209_v57 = vld [vmem:[%s3131_s1 + $0x4c8] sm:$0xff] }
  0x3a   :  { %1822 = vmatprep.subr.bf16.mxu0 %v1821_v50  ;;  %v1873_v50 = vpack.c.bf16 %v207_v45, %v206_v44  ;;  %v223_v55 = vld [vmem:[%s3131_s1 + $0x538] sm:$0xff]  ;;  %v240_v58 = vld [vmem:[%s3131_s1 + $0x5c0] sm:$0xff]  ;;  %v241_v59 = vld [vmem:[%s3131_s1 + $0x5c8] sm:$0xff] }
  0x3b   :  { %1852 = vmatpush3.bf16.msra.mxu1 %v1851_v49  ;;  %v1903_v49 = vpack.c.bf16 %v221_v43, %v220_v41  ;;  %v192_v63 = vld [vmem:[%s3131_s1 + $0x440] sm:$0xff]  ;;  %v193_v0 = vld [vmem:[%s3131_s1 + $0x448] sm:$0xff]  ;;  %v210_v4 = vld [vmem:[%s3131_s1 + $0x4d0] sm:$0xff] }
  0x3c   :  { %1854 = vmatprep.subr.bf16.mxu1 %v1853_v54  ;;  %v1905_v54 = vpack.c.bf16 %v239_v47, %v238_v46  ;;  %v224_v1 = vld [vmem:[%s3131_s1 + $0x540] sm:$0xff]  ;;  %v225_v3 = vld [vmem:[%s3131_s1 + $0x548] sm:$0xff]  ;;  %v211_v5 = vld [vmem:[%s3131_s1 + $0x4d8] sm:$0xff] }
  0x3d   :  { %1824 = vmatpush3.bf16.msra.mxu0 %v1823_v60  ;;  %v1875_v60 = vpack.c.bf16 %v191_v52, %v190_v51  ;;  %v242_v6 = vld [vmem:[%s3131_s1 + $0x5d0] sm:$0xff]  ;;  %v243_v7 = vld [vmem:[%s3131_s1 + $0x5d8] sm:$0xff]  ;;  %v212_v16 = vld [vmem:[%s3131_s1 + $0x4e0] sm:$0xff] }
  0x3e   :  { %1826 = vmatprep.subr.bf16.mxu0 %v1825_v62  ;;  %v1877_v62 = vpack.c.bf16 %v209_v57, %v208_v56  ;;  %v194_v11 = vld [vmem:[%s3131_s1 + $0x450] sm:$0xff]  ;;  %v195_v12 = vld [vmem:[%s3131_s1 + $0x458] sm:$0xff]  ;;  %v213_v17 = vld [vmem:[%s3131_s1 + $0x4e8] sm:$0xff] }
  0x3f   :  { %1856 = vmatpush3.bf16.msra.mxu1 %v1855_v61  ;;  %v1907_v61 = vpack.c.bf16 %v223_v55, %v222_v53  ;;  %v226_v13 = vld [vmem:[%s3131_s1 + $0x550] sm:$0xff]  ;;  %v227_v15 = vld [vmem:[%s3131_s1 + $0x558] sm:$0xff]  ;;  %v244_v18 = vld [vmem:[%s3131_s1 + $0x5e0] sm:$0xff] }
  0x40   :  { %1858 = vmatprep.subr.bf16.mxu1 %v1857_v2  ;;  %v1909_v2 = vpack.c.bf16 %v241_v59, %v240_v58  ;;  %v245_v19 = vld [vmem:[%s3131_s1 + $0x5e8] sm:$0xff]  ;;  %v228_v25 = vld [vmem:[%s3131_s1 + $0x560] sm:$0xff]  ;;  %v215_v29 = vld [vmem:[%s3131_s1 + $0x4f8] sm:$0xff] }
  0x41   :  { %1828 = vmatpush3.bf16.msra.mxu0 %v1827_v8  ;;  %v1879_v8 = vpack.c.bf16 %v193_v0, %v192_v63  ;;  %v1917_v26 = vpack.c.bf16 %v245_v19, %v244_v18  ;;  %v229_v27 = vld [vmem:[%s3131_s1 + $0x568] sm:$0xff]  ;;  %v246_v30 = vld [vmem:[%s3131_s1 + $0x5f0] sm:$0xff]  ;;  %v247_v31 = vld [vmem:[%s3131_s1 + $0x5f8] sm:$0xff] }
  0x42   :  { %1862 = vmatprep.subr.bf16.mxu0 %v1861_v10  ;;  %v1881_v10 = vpack.c.bf16 %v211_v5, %v210_v4  ;;  %v1919_v33 = vpack.c.bf16 %v229_v27, %v228_v25  ;;  %v231_v39 = vld [vmem:[%s3131_s1 + $0x578] sm:$0xff]  ;;  %v264_v40 = vld [vmem:[%s3131_s1 + $0x680] sm:$0xff]  ;;  %v265_v41 = vld [vmem:[%s3131_s1 + $0x688] sm:$0xff] }
  0x43   :  { %1860 = vmatpush3.bf16.msra.mxu1 %v1859_v9  ;;  %v1911_v9 = vpack.c.bf16 %v225_v3, %v224_v1  ;;  %v297_v43 = vld [vmem:[%s3131_s1 + $0x788] sm:$0xff]  ;;  %v1925_v46 = vpack.c.bf16 %v265_v41, %v264_v40  ;;  %v248_v47 = vld [vmem:[%s3131_s1 + $0x600] sm:$0xff]  ;;  %v266_v52 = vld [vmem:[%s3131_s1 + $0x690] sm:$0xff] }
  0x44   :  { %1894 = vmatprep.subr.bf16.mxu1 %v1893_v14  ;;  %556 = vmatmul.mubr.f32.vlgmr.msra.gmra.mrb[2].mxu0 %v42_v20  ;;  %v1913_v14 = vpack.c.bf16 %v243_v7, %v242_v6  ;;  %v1883_v20 = vpack.c.bf16 %v195_v12, %v194_v11  ;;  %v281_v51 = vld [vmem:[%s3131_s1 + $0x708] sm:$0xff]  ;;  %v267_v53 = vld [vmem:[%s3131_s1 + $0x698] sm:$0xff]  ;;  %v46_v56 = vld [vmem:[%s3132_s0 + $0x40] sm:$0xff] }
  0x45   :  { %1864 = vmatpush3.bf16.msra.mxu0 %v1863_v21  ;;  %695 = vmatprep.mubr.f32.mxu0 %v47_v34  ;;  %v1915_v21 = vpack.c.bf16 %v227_v15, %v226_v13  ;;  %v299_v55 = vld [vmem:[%s3131_s1 + $0x798] sm:$0xff]  ;;  %v48_v58 = vld [vmem:[%s3132_s0 + $0x50] sm:$0xff]  ;;  %v269_v3 = vld [vmem:[%s3131_s1 + $0x6a8] sm:$0xff] }
  0x46   :  { %626 = vmatmul.mubr.f32.vlgmr.msra.gmra.mrb[2].mxu1 %v44_v22  ;;  %1866 = vmatprep.subr.bf16.mxu0 %v1865_v24  ;;  %v1885_v22 = vpack.c.bf16 %v213_v17, %v212_v16  ;;  %v197_v24 = vld [vmem:[%s3131_s1 + $0x468] sm:$0xff]  ;;  %v282_v63 = vld [vmem:[%s3131_s1 + $0x710] sm:$0xff]  ;;  %v283_v1 = vld [vmem:[%s3131_s1 + $0x718] sm:$0xff] }
  0x47   :  { %1896 = vmatpush3.bf16.msra.mxu1 %v1895_v23  ;;  %765 = vmatprep.mubr.f32.mxu1 %v49_v36  ;;  %v196_v23 = vld [vmem:[%s3131_s1 + $0x460] sm:$0xff]  ;;  %v199_v36 = vld [vmem:[%s3131_s1 + $0x478] sm:$0xff]  ;;  %v301_v5 = vld [vmem:[%s3131_s1 + $0x7a8] sm:$0xff] }
  0x48   :  { %1898 = vmatprep.subr.bf16.mxu1 %v1897_v28  ;;  %v214_v28 = vld [vmem:[%s3131_s1 + $0x4f0] sm:$0xff]  ;;  %v1887_v32 = vpack.c.bf16 %v197_v24, %v196_v23  ;;  %v300_v4 = vld [vmem:[%s3131_s1 + $0x7a0] sm:$0xff]  ;;  %v51_v6 = vld [vmem:[%s3132_s0 + $0x68] sm:$0xff] }
  0x49   :  { %1868 = vmatpush3.bf16.msra.mxu0 %v1867_v35  ;;  %v1889_v34 = vpack.c.bf16 %v215_v29, %v214_v28  ;;  %v198_v35 = vld [vmem:[%s3131_s1 + $0x470] sm:$0xff]  ;;  %v252_v11 = vld [vmem:[%s3131_s1 + $0x620] sm:$0xff]  ;;  %v253_v12 = vld [vmem:[%s3131_s1 + $0x628] sm:$0xff] }
  0x4a   :  { %1870 = vmatprep.subr.bf16.mxu0 %v1869_v38  ;;  %v1921_v38 = vpack.c.bf16 %v247_v31, %v246_v30  ;;  %v1891_v44 = vpack.c.bf16 %v199_v36, %v198_v35  ;;  %v284_v13 = vld [vmem:[%s3131_s1 + $0x720] sm:$0xff]  ;;  %v285_v15 = vld [vmem:[%s3131_s1 + $0x728] sm:$0xff]  ;;  %v270_v16 = vld [vmem:[%s3131_s1 + $0x6b0] sm:$0xff] }
  0x4b   :  { %1900 = vmatpush3.bf16.msra.mxu1 %v1899_v37  ;;  %v230_v37 = vld [vmem:[%s3131_s1 + $0x570] sm:$0xff]  ;;  %v271_v17 = vld [vmem:[%s3131_s1 + $0x6b8] sm:$0xff]  ;;  %v272_v28 = vld [vmem:[%s3131_s1 + $0x6c0] sm:$0xff] }
  0x4c   :  { %1902 = vmatprep.subr.bf16.mxu1 %v1901_v42  ;;  %v296_v42 = vld [vmem:[%s3131_s1 + $0x780] sm:$0xff]  ;;  %v1923_v45 = vpack.c.bf16 %v231_v39, %v230_v37  ;;  %v302_v18 = vld [vmem:[%s3131_s1 + $0x7b0] sm:$0xff]  ;;  %v303_v19 = vld [vmem:[%s3131_s1 + $0x7b8] sm:$0xff] }
  0x4d   :  { %1872 = vmatpush3.bf16.msra.mxu0 %v1871_v48  ;;  %v249_v48 = vld [vmem:[%s3131_s1 + $0x608] sm:$0xff]  ;;  %v254_v23 = vld [vmem:[%s3131_s1 + $0x630] sm:$0xff]  ;;  %v255_v24 = vld [vmem:[%s3131_s1 + $0x638] sm:$0xff] }
  0x4e   :  { %1874 = vmatprep.subr.bf16.mxu0 %v1873_v50  ;;  %v1957_v50 = vpack.c.bf16 %v297_v43, %v296_v42  ;;  %v1927_v57 = vpack.c.bf16 %v249_v48, %v248_v47  ;;  %v286_v25 = vld [vmem:[%s3131_s1 + $0x730] sm:$0xff]  ;;  %v287_v27 = vld [vmem:[%s3131_s1 + $0x738] sm:$0xff]  ;;  %v273_v29 = vld [vmem:[%s3131_s1 + $0x6c8] sm:$0xff] }
  0x4f   :  { %1904 = vmatpush3.bf16.msra.mxu1 %v1903_v49  ;;  %v280_v49 = vld [vmem:[%s3131_s1 + $0x700] sm:$0xff]  ;;  %v305_v31 = vld [vmem:[%s3131_s1 + $0x7c8] sm:$0xff]  ;;  %v274_v40 = vld [vmem:[%s3131_s1 + $0x6d0] sm:$0xff] }
  0x50   :  { %1906 = vmatprep.subr.bf16.mxu1 %v1905_v54  ;;  %v298_v54 = vld [vmem:[%s3131_s1 + $0x790] sm:$0xff]  ;;  %v1959_v59 = vpack.c.bf16 %v281_v51, %v280_v49  ;;  %v304_v30 = vld [vmem:[%s3131_s1 + $0x7c0] sm:$0xff]  ;;  %v257_v36 = vld [vmem:[%s3131_s1 + $0x648] sm:$0xff] }
  0x51   :  { %1876 = vmatpush3.bf16.msra.mxu0 %v1875_v60  ;;  %v1929_v60 = vpack.c.bf16 %v267_v53, %v266_v52  ;;  %v1961_v0 = vpack.c.bf16 %v299_v55, %v298_v54  ;;  %v256_v35 = vld [vmem:[%s3131_s1 + $0x640] sm:$0xff]  ;;  %v289_v39 = vld [vmem:[%s3131_s1 + $0x748] sm:$0xff]  ;;  %v275_v41 = vld [vmem:[%s3131_s1 + $0x6d8] sm:$0xff] }
  0x52   :  { %1878 = vmatprep.subr.bf16.mxu0 %v1877_v62  ;;  %v251_v62 = vld [vmem:[%s3131_s1 + $0x618] sm:$0xff]  ;;  %v288_v37 = vld [vmem:[%s3131_s1 + $0x740] sm:$0xff]  ;;  %v306_v42 = vld [vmem:[%s3131_s1 + $0x7d0] sm:$0xff] }
  0x53   :  { %1908 = vmatpush3.bf16.msra.mxu1 %v1907_v61  ;;  %v250_v61 = vld [vmem:[%s3131_s1 + $0x610] sm:$0xff]  ;;  %v307_v43 = vld [vmem:[%s3131_s1 + $0x7d8] sm:$0xff]  ;;  %v276_v52 = vld [vmem:[%s3131_s1 + $0x6e0] sm:$0xff] }
  0x54   :  { %1910 = vmatprep.subr.bf16.mxu1 %v1909_v2  ;;  %v268_v2 = vld [vmem:[%s3131_s1 + $0x6a0] sm:$0xff]  ;;  %v1931_v7 = vpack.c.bf16 %v251_v62, %v250_v61  ;;  %v258_v47 = vld [vmem:[%s3131_s1 + $0x650] sm:$0xff]  ;;  %v259_v48 = vld [vmem:[%s3131_s1 + $0x658] sm:$0xff] }
  0x55   :  { %1880 = vmatpush3.bf16.msra.mxu0 %v1879_v8  ;;  %v53_v8 = vld [vmem:[%s3132_s0 + $0x78] sm:$0xff]  ;;  %v290_v49 = vld [vmem:[%s3131_s1 + $0x750] sm:$0xff]  ;;  %v277_v53 = vld [vmem:[%s3131_s1 + $0x6e8] sm:$0xff] }
  0x56   :  { %1882 = vmatprep.subr.bf16.mxu0 %v1881_v10  ;;  %v1933_v10 = vpack.c.bf16 %v269_v3, %v268_v2  ;;  %v291_v51 = vld [vmem:[%s3131_s1 + $0x758] sm:$0xff]  ;;  %v308_v54 = vld [vmem:[%s3131_s1 + $0x7e0] sm:$0xff]  ;;  %v309_v55 = vld [vmem:[%s3131_s1 + $0x7e8] sm:$0xff] }
  0x57   :  { %1912 = vmatpush3.bf16.msra.mxu1 %v1911_v9  ;;  %v1963_v9 = vpack.c.bf16 %v283_v1, %v282_v63  ;;  %v292_v61 = vld [vmem:[%s3131_s1 + $0x760] sm:$0xff]  ;;  %v1981_v62 = vpack.c.bf16 %v309_v55, %v308_v54  ;;  %v293_v63 = vld [vmem:[%s3131_s1 + $0x768] sm:$0xff]  ;;  %v279_v1 = vld [vmem:[%s3131_s1 + $0x6f8] sm:$0xff] }
  0x58   :  { %1914 = vmatprep.subr.bf16.mxu1 %v1913_v14  ;;  %v1965_v14 = vpack.c.bf16 %v301_v5, %v300_v4  ;;  %v310_v2 = vld [vmem:[%s3131_s1 + $0x7f0] sm:$0xff]  ;;  %v311_v3 = vld [vmem:[%s3131_s1 + $0x7f8] sm:$0xff]  ;;  %v1983_v5 = vpack.c.bf16 %v293_v63, %v292_v61 }
  0x59   :  { %1884 = vmatpush3.bf16.msra.mxu0 %v1883_v20  ;;  %v1935_v20 = vpack.c.bf16 %v253_v12, %v252_v11  ;;  %v295_v11 = vld [vmem:[%s3131_s1 + $0x778] sm:$0xff]  ;;  %v328_v12 = vld [vmem:[%s3131_s1 + $0x880] sm:$0xff] }
  0x5a   :  { %1886 = vmatprep.subr.bf16.mxu0 %v1885_v22  ;;  %v1937_v22 = vpack.c.bf16 %v271_v17, %v270_v16  ;;  %v312_v17 = vld [vmem:[%s3131_s1 + $0x800] sm:$0xff]  ;;  %v327_v63 = vld [vmem:[%s3131_s1 + $0x878] sm:$0xff] }
  0x5b   :  { %1916 = vmatpush3.bf16.msra.mxu1 %v1915_v21  ;;  %v1967_v21 = vpack.c.bf16 %v285_v15, %v284_v13  ;;  %v329_v13 = vld [vmem:[%s3131_s1 + $0x888] sm:$0xff] }
  0x5c   :  { %1918 = vmatprep.subr.bf16.mxu1 %v1917_v26  ;;  %v1969_v26 = vpack.c.bf16 %v303_v19, %v302_v18  ;;  %v1989_v16 = vpack.c.bf16 %v329_v13, %v328_v12  ;;  %v313_v18 = vld [vmem:[%s3131_s1 + $0x808] sm:$0xff]  ;;  %v330_v19 = vld [vmem:[%s3131_s1 + $0x890] sm:$0xff]  ;;  %v1333_v13 = vld [vmem:[%s3134_s2] ss:$0 sm:$0xff] }
  0x5d   :  { %1888 = vmatpush3.bf16.msra.mxu0 %v1887_v32  ;;  %v1939_v32 = vpack.c.bf16 %v255_v24, %v254_v23  ;;  %v52_v23 = vld [vmem:[%s3132_s0 + $0x70] sm:$0xff] }
  0x5e   :  { %1890 = vmatprep.subr.bf16.mxu0 %v1889_v34  ;;  %v1941_v34 = vpack.c.bf16 %v273_v29, %v272_v28  ;;  %v333_v28 = vld [vmem:[%s3131_s1 + $0x8a8] sm:$0xff] }
  0x5f   :  { %1920 = vmatpush3.bf16.msra.mxu1 %v1919_v33  ;;  %v1971_v33 = vpack.c.bf16 %v287_v27, %v286_v25  ;;  %v314_v25 = vld [vmem:[%s3131_s1 + $0x810] sm:$0xff]  ;;  %v332_v27 = vld [vmem:[%s3131_s1 + $0x8a0] sm:$0xff]  ;;  %v55_v29 = vld [vmem:[%s3132_s0 + $0x88] sm:$0xff] }
  0x60   :  { %1922 = vmatprep.subr.bf16.mxu1 %v1921_v38  ;;  %v1973_v38 = vpack.c.bf16 %v305_v31, %v304_v30  ;;  %v1997_v31 = vpack.c.bf16 %v333_v28, %v332_v27 }
  0x61   :  { %1892 = vmatpush3.bf16.msra.mxu0 %v1891_v44  ;;  %v1943_v44 = vpack.c.bf16 %v257_v36, %v256_v35  ;;  %v335_v35 = vld [vmem:[%s3131_s1 + $0x8b8] sm:$0xff] }
  0x62   :  { %1926 = vmatprep.subr.bf16.mxu0 %v1925_v46  ;;  %v1945_v46 = vpack.c.bf16 %v275_v41, %v274_v40  ;;  %v336_v40 = vld [vmem:[%s3131_s1 + $0x8c0] sm:$0xff]  ;;  %v337_v41 = vld [vmem:[%s3131_s1 + $0x8c8] sm:$0xff] }
  0x63   :  { %1924 = vmatpush3.bf16.msra.mxu1 %v1923_v45  ;;  %v1975_v45 = vpack.c.bf16 %v289_v39, %v288_v37  ;;  %v319_v39 = vld [vmem:[%s3131_s1 + $0x838] sm:$0xff] }
  0x64   :  { %1958 = vmatprep.subr.bf16.mxu1 %v1957_v50  ;;  %696 = vmatmul.mubr.f32.vlgmr.msra.gmra.mrb[4].mxu0 %v46_v56  ;;  %v1977_v50 = vpack.c.bf16 %v307_v43, %v306_v42  ;;  %v1947_v56 = vpack.c.bf16 %v259_v48, %v258_v47  ;;  %v2005_v43 = vpack.c.bf16 %v337_v41, %v336_v40  ;;  %v339_v47 = vld [vmem:[%s3131_s1 + $0x8d8] sm:$0xff] }
  0x65   :  { %1928 = vmatpush3.bf16.msra.mxu0 %v1927_v57  ;;  %835 = vmatprep.mubr.f32.mxu0 %v51_v6  ;;  %v1979_v57 = vpack.c.bf16 %v291_v51, %v290_v49  ;;  %v323_v51 = vld [vmem:[%s3131_s1 + $0x858] sm:$0xff] }
  0x66   :  { %766 = vmatmul.mubr.f32.vlgmr.msra.gmra.mrb[4].mxu1 %v48_v58  ;;  %1930 = vmatprep.subr.bf16.mxu0 %v1929_v60  ;;  %v1949_v58 = vpack.c.bf16 %v277_v53, %v276_v52  ;;  %v261_v60 = vld [vmem:[%s3131_s1 + $0x668] sm:$0xff]  ;;  %v340_v52 = vld [vmem:[%s3131_s1 + $0x8e0] sm:$0xff] }
  0x67   :  { %1960 = vmatpush3.bf16.msra.mxu1 %v1959_v59  ;;  %905 = vmatprep.mubr.f32.mxu1 %v53_v8  ;;  %v260_v59 = vld [vmem:[%s3131_s1 + $0x660] sm:$0xff]  ;;  %v263_v8 = vld [vmem:[%s3131_s1 + $0x678] sm:$0xff]  ;;  %v341_v53 = vld [vmem:[%s3131_s1 + $0x8e8] sm:$0xff] }
  0x68   :  { %1962 = vmatprep.subr.bf16.mxu1 %v1961_v0  ;;  %v278_v0 = vld [vmem:[%s3131_s1 + $0x6f0] sm:$0xff]  ;;  %v1951_v4 = vpack.c.bf16 %v261_v60, %v260_v59  ;;  %v2013_v55 = vpack.c.bf16 %v341_v53, %v340_v52  ;;  %v343_v59 = vld [vmem:[%s3131_s1 + $0x8f8] sm:$0xff]  ;;  %v1072_v52 = vld [vmem:[%s3135_s5] sm:$0xff] }
  0x69   :  { %1932 = vmatpush3.bf16.msra.mxu0 %v1931_v7  ;;  %v1953_v6 = vpack.c.bf16 %v279_v1, %v278_v0  ;;  %v262_v7 = vld [vmem:[%s3131_s1 + $0x670] sm:$0xff]  ;;  %v54_v1 = vld [vmem:[%s3132_s0 + $0x80] sm:$0xff]  ;;  %v1073_v53 = vld [vmem:[%s3135_s5 + $0x8] sm:$0xff] }
  0x6a   :  { %1934 = vmatprep.subr.bf16.mxu0 %v1933_v10  ;;  %v1985_v10 = vpack.c.bf16 %v311_v3, %v310_v2  ;;  %v2054_v2 = vmov 0.0|0.0   ;;  %v982_v3 = vld [vmem:[%s3133_s3] sm:$0xff] }
  0x6b   :  { %1964 = vmatpush3.bf16.msra.mxu1 %v1963_v9  ;;  %v294_v9 = vld [vmem:[%s3131_s1 + $0x770] sm:$0xff] }
  0x6c   :  { %1966 = vmatprep.subr.bf16.mxu1 %v1965_v14  ;;  %v1955_v14 = vpack.c.bf16 %v263_v8, %v262_v7  ;;  %v1987_v15 = vpack.c.bf16 %v295_v11, %v294_v9  ;;  %v985_v7 = vld [vmem:[%s3133_s3 + $0x18] sm:$0xff]  ;;  %v986_v9 = vld [vmem:[%s3133_s3 + $0x20] sm:$0xff] }
  0x6d   :  { %1936 = vmatpush3.bf16.msra.mxu0 %v1935_v20  ;;  %v331_v20 = vld [vmem:[%s3131_s1 + $0x898] sm:$0xff] }
  0x6e   :  { %1938 = vmatprep.subr.bf16.mxu0 %v1937_v22  ;;  %v1991_v22 = vpack.c.bf16 %v313_v18, %v312_v17  ;;  %v1993_v24 = vpack.c.bf16 %v331_v20, %v330_v19  ;;  %v988_v18 = vld [vmem:[%s3133_s3 + $0x30] sm:$0xff]  ;;  %v989_v19 = vld [vmem:[%s3133_s3 + $0x38] sm:$0xff] }
  0x6f   :  { %1968 = vmatpush3.bf16.msra.mxu1 %v1967_v21  ;;  %v50_v21 = vld [vmem:[%s3132_s0 + $0x60] sm:$0xff] }
  0x70   :  { %1970 = vmatprep.subr.bf16.mxu1 %v1969_v26  ;;  %v315_v26 = vld [vmem:[%s3131_s1 + $0x818] sm:$0xff] }
  0x71   :  { %1940 = vmatpush3.bf16.msra.mxu0 %v1939_v32  ;;  %v1995_v30 = vpack.c.bf16 %v315_v26, %v314_v25  ;;  %v316_v32 = vld [vmem:[%s3131_s1 + $0x820] sm:$0xff] }
  0x72   :  { %1942 = vmatprep.subr.bf16.mxu0 %v1941_v34  ;;  %v334_v34 = vld [vmem:[%s3131_s1 + $0x8b0] sm:$0xff] }
  0x73   :  { %1972 = vmatpush3.bf16.msra.mxu1 %v1971_v33  ;;  %v317_v33 = vld [vmem:[%s3131_s1 + $0x828] sm:$0xff]  ;;  %v2001_v37 = vpack.c.bf16 %v335_v35, %v334_v34 }
  0x74   :  { %1974 = vmatprep.subr.bf16.mxu1 %v1973_v38  ;;  %v1999_v36 = vpack.c.bf16 %v317_v33, %v316_v32  ;;  %v318_v38 = vld [vmem:[%s3131_s1 + $0x830] sm:$0xff] }
  0x75   :  { %1944 = vmatpush3.bf16.msra.mxu0 %v1943_v44  ;;  %v2003_v42 = vpack.c.bf16 %v319_v39, %v318_v38  ;;  %v320_v44 = vld [vmem:[%s3131_s1 + $0x840] sm:$0xff] }
  0x76   :  { %1946 = vmatprep.subr.bf16.mxu0 %v1945_v46  ;;  %v338_v46 = vld [vmem:[%s3131_s1 + $0x8d0] sm:$0xff] }
  0x77   :  { %1976 = vmatpush3.bf16.msra.mxu1 %v1975_v45  ;;  %v321_v45 = vld [vmem:[%s3131_s1 + $0x848] sm:$0xff]  ;;  %v2009_v49 = vpack.c.bf16 %v339_v47, %v338_v46 }
  0x78   :  { %1978 = vmatprep.subr.bf16.mxu1 %v1977_v50  ;;  %v2007_v48 = vpack.c.bf16 %v321_v45, %v320_v44  ;;  %v322_v50 = vld [vmem:[%s3131_s1 + $0x850] sm:$0xff] }
  0x79   :  { %1948 = vmatpush3.bf16.msra.mxu0 %v1947_v56  ;;  %v2011_v54 = vpack.c.bf16 %v323_v51, %v322_v50  ;;  %v324_v56 = vld [vmem:[%s3131_s1 + $0x860] sm:$0xff] }
  0x7a   :  { %1950 = vmatprep.subr.bf16.mxu0 %v1949_v58  ;;  %v342_v58 = vld [vmem:[%s3131_s1 + $0x8f0] sm:$0xff] }
  0x7b   :  { %1980 = vmatpush3.bf16.msra.mxu1 %v1979_v57  ;;  %v325_v57 = vld [vmem:[%s3131_s1 + $0x868] sm:$0xff]  ;;  %v2017_v61 = vpack.c.bf16 %v343_v59, %v342_v58  ;;  %v1075_v58 = vld [vmem:[%s3135_s5 + $0x18] sm:$0xff] }
  0x7c   :  { %1982 = vmatprep.subr.bf16.mxu1 %v1981_v62  ;;  %v2015_v60 = vpack.c.bf16 %v325_v57, %v324_v56  ;;  %v326_v62 = vld [vmem:[%s3131_s1 + $0x870] sm:$0xff] }
  0x7d   :  { %1952 = vmatpush3.bf16.msra.mxu0 %v1951_v4  ;;  %v2019_v0 = vpack.c.bf16 %v327_v63, %v326_v62  ;;  %v983_v4 = vld [vmem:[%s3133_s3 + $0x8] sm:$0xff]  ;;  %v1074_v57 = vld [vmem:[%s3135_s5 + $0x10] sm:$0xff] }
  0x7e   :  { %1954 = vmatprep.subr.bf16.mxu0 %v1953_v6  ;;  %v2022_v6 = vpack.c.bf16 %v983_v4, %v982_v3  ;;  %v2037_v59 = vpack.c.bf16 %v1075_v58, %v1074_v57  ;;  %v1159_v62 = vld [vmem:[%s3137_s7 + $0x8] sm:$0xff] }
  0x7f   :  { %1984 = vmatpush3.bf16.msra.mxu1 %v1983_v5  ;;  %v984_v5 = vld [vmem:[%s3133_s3 + $0x10] sm:$0xff] }
  0x80   :  { %1986 = vmatprep.subr.bf16.mxu1 %v1985_v10  ;;  %v2025_v8 = vpack.c.bf16 %v985_v7, %v984_v5  ;;  %v987_v10 = vld [vmem:[%s3133_s3 + $0x28] sm:$0xff]  ;;  %v1160_v5 = vld [vmem:[%s3137_s7 + $0x10] sm:$0xff] }
  0x81   :  { %1956 = vmatpush3.bf16.msra.mxu0 %v1955_v14  ;;  %v2028_v11 = vpack.c.bf16 %v987_v10, %v986_v9  ;;  %v1244_v9 = vld [vmem:[%s3138_s9 + $0x8] sm:$0xff] }
  0x82   :  { %1990 = vmatprep.subr.bf16.mxu0 %v1989_v16 }
  0x83   :  { %1988 = vmatpush3.bf16.msra.mxu1 %v1987_v15 }
  0x84   :  { %836 = vmatmul.mubr.f32.vlgmr.msra.gmra.mrb[6].mxu0 %v50_v21  ;;  %2021 = vmatprep.subr.bf16.mxu1 %v2054_v2  ;;  %v2031_v21 = vpack.c.bf16 %v989_v19, %v988_v18 }
  0x85   :  { %1992 = vmatpush3.bf16.msra.mxu0 %v1991_v22  ;;  %975 = vmatprep.mubr.f32.mxu0 %v55_v29 }
  0x86   :  { %906 = vmatmul.mubr.f32.vlgmr.msra.gmra.mrb[6].mxu1 %v52_v23  ;;  %1994 = vmatprep.subr.bf16.mxu0 %v1993_v24  ;;  %v2056_v24 = vmov 0.0  }
  0x87   :  { %2023 = vmatpush3.bf16.msra.mxu1 %v2022_v6  ;;  %1697 = vmatprep.mubr.msk.f32.mxu1 %vm2055_vm0, %v2056_v24  ;;  %v1161_v6 = vld [vmem:[%s3137_s7 + $0x18] sm:$0xff] }
  0x88   :  { %2024 = vmatprep.subr.bf16.mxu1 %v2054_v2  ;;  %v2043_v7 = vpack.c.bf16 %v1161_v6, %v1160_v5 }
  0x89   :  { %1996 = vmatpush3.bf16.msra.mxu0 %v1995_v30 }
  0x8a   :  { %1998 = vmatprep.subr.bf16.mxu0 %v1997_v31 }
  0x8b   :  { %2026 = vmatpush3.bf16.msra.mxu1 %v2025_v8  ;;  %v1243_v8 = vld [vmem:[%s3138_s9] sm:$0xff] }
  0x8c   :  { %2027 = vmatprep.subr.bf16.mxu1 %v2054_v2  ;;  %v2046_v10 = vpack.c.bf16 %v1244_v9, %v1243_v8 }
  0x8d   :  { %2000 = vmatpush3.bf16.msra.mxu0 %v1999_v36 }
  0x8e   :  { %2002 = vmatprep.subr.bf16.mxu0 %v2001_v37 }
  0x8f   :  { %2029 = vmatpush3.bf16.msra.mxu1 %v2028_v11  ;;  %v1336_v11 = vld [vmem:[%s3139_s6] ss:$0 sm:$0xff] }
  0x90   :  { %2030 = vmatprep.subr.bf16.mxu1 %v2054_v2 }
  0x91   :  { %2004 = vmatpush3.bf16.msra.mxu0 %v2003_v42 }
  0x92   :  { %2006 = vmatprep.subr.bf16.mxu0 %v2005_v43 }
  0x93   :  { %2032 = vmatpush3.bf16.msra.mxu1 %v2031_v21 }
  0x94   :  { %2033 = vmatprep.subr.bf16.mxu1 %v2054_v2 }
  0x95   :  { %2008 = vmatpush3.bf16.msra.mxu0 %v2007_v48 }
  0x96   :  { %2010 = vmatprep.subr.bf16.mxu0 %v2009_v49 }
  0x99   :  { %2012 = vmatpush3.bf16.msra.mxu0 %v2011_v54 }
  0x9a   :  { %2014 = vmatprep.subr.bf16.mxu0 %v2013_v55  ;;  %v2034_v55 = vpack.c.bf16 %v1073_v53, %v1072_v52 }
  0x9d   :  { %2016 = vmatpush3.bf16.msra.mxu0 %v2015_v60  ;;  %v1334_v60 = vld [vmem:[%s3136_s4] ss:$0 sm:$0xff] }
  0x9e   :  { %2018 = vmatprep.subr.bf16.mxu0 %v2017_v61  ;;  %v1158_v61 = vld [vmem:[%s3137_s7] sm:$0xff] }
  0x9f   :  { %v2040_v3 = vpack.c.bf16 %v1159_v62, %v1158_v61 }
  0xa1   :  { %2020 = vmatpush3.bf16.msra.mxu0 %v2019_v0 }
  0xa2   :  { %2045 = vmatprep.subr.bf16.mxu0 %v2054_v2 }
  0xa4   :  { %976 = vmatmul.mubr.f32.vlgmr.msra.gmra.mrb[8].mxu0 %v54_v1 }
  0xa5   :  { %1730 = vmatprep.mubr.msk.f32.mxu0 %vm2055_vm0, %v2056_v24  ;;  %2047 = vmatpush3.bf16.msra.mxu0 %v2046_v10 }
  0xa6   :  { %2048 = vmatprep.subr.bf16.mxu0 %v2054_v2 }
  0xf7   :  { %v1374_v12 = vpop.f32.mrb[0].mxu0 }
  0xf8   :  { %v1375_v14 = vpop.f32.mrb[1].mxu0 }
  0xf9   :  { %v1409_v15 = vpop.f32.mrb[0].mxu1  ;;  %v1376_v16 = vadd.f32 %v1375_v14, %v1374_v12 }
  0xfa   :  { %v1410_v17 = vpop.f32.mrb[1].mxu1 }
  0xfb   :  { %v1411_v20 = vadd.f32 %v1410_v17, %v1409_v15  ;;  %v418_v22 = vadd.f32 %v1376_v16, %v1333_v13  ;;  %v1245_v16 = vld [vmem:[%s3138_s9 + $0x10] sm:$0xff]  ;;  %v1246_v17 = vld [vmem:[%s3138_s9 + $0x18] sm:$0xff] }
  0xfc   :  { %v2049_v18 = vpack.c.bf16 %v1246_v17, %v1245_v16 }
  0xfd   :  { %v488_v23 = vadd.f32 %v1411_v20, %v418_v22 }
  0xfe   :  { %2050 = vmatpush3.bf16.msra.mxu0 %v2049_v18 }
 0x117   :  { %v1444_v25 = vpop.f32.mrb[2].mxu0 }
 0x118   :  { %v1445_v26 = vpop.f32.mrb[3].mxu0 }
 0x119   :  { %v1479_v27 = vpop.f32.mrb[2].mxu1  ;;  %v1446_v28 = vadd.f32 %v1445_v26, %v1444_v25 }
 0x11a   :  { %v1480_v29 = vpop.f32.mrb[3].mxu1 }
 0x11b   :  { %v1481_v30 = vadd.f32 %v1480_v29, %v1479_v27  ;;  %v558_v31 = vadd.f32 %v1446_v28, %v488_v23  ;;  %v1340_v23 = vld [vmem:[%s3141_s10] ss:$0 sm:$0xff] }
 0x11d   :  { %v628_v32 = vadd.f32 %v1481_v30, %v558_v31 }
 0x137   :  { %v1514_v33 = vpop.f32.mrb[4].mxu0 }
 0x138   :  { %v1515_v34 = vpop.f32.mrb[5].mxu0 }
 0x139   :  { %v1549_v35 = vpop.f32.mrb[4].mxu1  ;;  %v1516_v36 = vadd.f32 %v1515_v34, %v1514_v33 }
 0x13a   :  { %v1550_v37 = vpop.f32.mrb[5].mxu1 }
 0x13b   :  { %v1551_v38 = vadd.f32 %v1550_v37, %v1549_v35  ;;  %v698_v39 = vadd.f32 %v1516_v36, %v628_v32 }
 0x13d   :  { %v768_v40 = vadd.f32 %v1551_v38, %v698_v39 }
 0x157   :  { %v1584_v41 = vpop.f32.mrb[6].mxu0 }
 0x158   :  { %v1585_v42 = vpop.f32.mrb[7].mxu0 }
 0x159   :  { %v1619_v43 = vpop.f32.mrb[6].mxu1  ;;  %v1586_v44 = vadd.f32 %v1585_v42, %v1584_v41 }
 0x15a   :  { %v1620_v45 = vpop.f32.mrb[7].mxu1 }
 0x15b   :  { %v1621_v46 = vadd.f32 %v1620_v45, %v1619_v43  ;;  %v838_v47 = vadd.f32 %v1586_v44, %v768_v40 }
 0x15d   :  { %v908_v48 = vadd.f32 %v1621_v46, %v838_v47 }
 0x177   :  { %v1654_v49 = vpop.f32.mrb[8].mxu0 }
 0x178   :  { %v1655_v50 = vpop.f32.mrb[9].mxu0 }
 0x179   :  { %v1656_v51 = vadd.f32 %v1655_v50, %v1654_v49 }
 0x17b   :  { %v978_v54 = vadd.f32 %v1656_v51, %v908_v48 }
 0x17d   :  { %v981_v56 = vmax.f32 %v978_v54, 0.0 }
 0x17f   :  { %1698 = vmatmul.mubr.msk.f32.vlgmr.msra.gmra.mrb[8].mxu1 %vm997_vm1, %v981_v56 }
 0x180   :  { %2035 = vmatpush3.bf16.msra.mxu1 %v2034_v55  ;;  %1708 = vmatprep.mubr.msk.f32.mxu1 %vm2055_vm0, %v2056_v24 }
 0x181   :  { %2036 = vmatprep.subr.bf16.mxu1 %v2054_v2 }
 0x184   :  { %2038 = vmatpush3.bf16.msra.mxu1 %v2037_v59 }
 0x185   :  { %2039 = vmatprep.subr.bf16.mxu1 %v2054_v2 }
 0x252   :  { %v1067_v63 = vpop.f32.mrb[8].mxu1 }
 0x253   :  { %v1068_v0 = vadd.f32 %v1334_v60, %v1067_v63  ;;  %v1699_v1 = vpop.f32.mrb[9].mxu1 }
 0x255   :  { %v1071_v4 = vmax.f32 %v1068_v0, 0.0 }
 0x257   :  { %1709 = vmatmul.mubr.msk.f32.vlgmr.msra.gmra.mrb[10].mxu1 %vm1083_vm2, %v1071_v4 }
 0x258   :  { %2041 = vmatpush3.bf16.msra.mxu1 %v2040_v3  ;;  %1719 = vmatprep.mubr.msk.f32.mxu1 %vm2055_vm0, %v2056_v24 }
 0x259   :  { %2042 = vmatprep.subr.bf16.mxu1 %v2054_v2  ;;  %v1338_v2 = vld [vmem:[%s3140_s8] ss:$0 sm:$0xff] }
 0x25c   :  { %2044 = vmatpush3.bf16.msra.mxu1 %v2043_v7 }
 0x32a   :  { %v1153_v12 = vpop.f32.mrb[10].mxu1 }
 0x32b   :  { %v1154_v13 = vadd.f32 %v1336_v11, %v1153_v12  ;;  %v1710_v14 = vpop.f32.mrb[11].mxu1 }
 0x32d   :  { %v1157_v15 = vmax.f32 %v1154_v13, 0.0 }
 0x32f   :  { %1720 = vmatmul.mubr.msk.f32.vlgmr.msra.gmra.mrb[12].mxu1 %vm1083_vm2, %v1157_v15 }
 0x402   :  { %v1238_v19 = vpop.f32.mrb[12].mxu1 }
 0x403   :  { %v1239_v20 = vadd.f32 %v1338_v2, %v1238_v19  ;;  %v1721_v21 = vpop.f32.mrb[13].mxu1 }
 0x405   :  { %v1242_v22 = vmax.f32 %v1239_v20, 0.0 }
 0x407   :  { %1731 = vmatmul.mubr.msk.f32.vlgmr.msra.gmra.mrb[10].mxu0 %vm1083_vm2, %v1242_v22 }
 0x4da   :  { %v1323_v24 = vpop.f32.mrb[10].mxu0 }
 0x4db   :  { %v1324_v25 = vadd.f32 %v1340_v23, %v1323_v24  ;;  %v1732_v26 = vpop.f32.mrb[11].mxu0 }
 0x4dd   :  { %v1327_v27 = vmax.f32 %v1324_v25, 0.0 }
 0x4df   :  { %1328 = vst.msk [vmem:[%s3142_s11] sm:$0xff] %vm1083_vm2, %v1327_v27 }

// kernel: encoder_forward.11
= control target key start
LH: loop header
LB: loop body
LE: loop exit
PB: predicated region body
PF: predicated region fallthrough
CT: control target
= control target key end

     0   :  { %8 = vsyncpa [#allocation3], 0  ;;  %s577_s0 = inlined_call_operand.vmem [shape: f32[2,16,32], index: 0, kind: input, shape index: {}]   ;;  %s578_s1 = inlined_call_operand.hbm [shape: f32[1,32], index: 1, kind: input, shape index: {}]   ;;  %s579_s2 = inlined_call_operand.hbm [shape: f32[1,32], index: 2, kind: input, shape index: {}]   ;;  %s580_s3 = inlined_call_operand.vmem [shape: f32[2,16,32], index: 3, kind: output, shape index: {}]  }
   0x1   :  { %9 = vsyncpa [#allocation5], 0  ;;  %s470_s12 = smov 0  }
   0x2 LB: > { %s476_s13 = sadd.s32 4294967295, %s446_s12   ;;  %p326_p0 = scmp.ge.s32.totalorder %s446_s12, 1  ;;  %s446_s12 = sphi %s470_s12, %s15_s12  }
   0x3   : > { %p114_p1 = scmp.lt.s32.totalorder %s446_s12, 3  ;;  %p581_p2 = scmp.eq.s32.totalorder %s476_s13, 0 }
   0x4   : > { %s448_s15 = smov [#allocation2]   ;;  %s449_s17 = smov [#allocation4]  }
   0x5   : > { %p481_p3 = pnand %p326_p0, %p114_p1  ;;  %s127_s16 = sshll.u32 %s448_s15, 4  ;;  %s128_s16 = int_to_ptr.vmem [resolvable:$true] %s127_s16 }
   0x6   : > { %s138_s18 = sshll.u32 %s449_s17, 4  ;;  %s376_s22 = scalar_lea.hbm %s578_s1, 16  ;;  %s493_s18 = int_to_ptr.vmem [resolvable:$true] %s138_s18 }
   0x7   : > { %s583_s14 = scalar_select %p481_p3, 1, 0 }
   0x8   : > { %p351_p4 = pneg %p481_p3  ;;  %p377_p6 = scmp.ne.s32.totalorder %s578_s1, %s376_s22 }
   0x9   : > { %p383_p10 = scmp.lt.u32.totalorder %s376_s22, %s578_s1 }
   0xa   : > { %p489_p5 = pnand %p581_p2, %p351_p4 }
   0xc   : > { %p378_p7 = pneg %p489_p5 }
   0xe   : > { %p379_p8 = pnand %p378_p7, %p377_p6 }
  0x10   : > { %p380_p9 = pneg %p379_p8 }
  0x12   : > { %p385_p11 = pnand %p383_p10, %p380_p9 }
  0x14   : > { %388 = shalt.err (!%p385_p11)
}
  0x15   : > { %s389_s27 = scalar_lea.vmem %s128_s16, 16  ;;  %s396_s28 = scalar_lea.vmem %s128_s16, 32 }
  0x16   : > { %p390_p12 = scmp.ne.s32.totalorder %s128_s16, %s389_s27  ;;  %p397_p1 = scmp.lt.s32.totalorder %s128_s16, %s128_s16 }
  0x17   : > { %p398_p4 = scmp.lt.s32.totalorder %s396_s28, %s389_s27 }
  0x18   : > { %p392_p13 = pnand %p390_p12, %p378_p7 }
  0x19   : > { %p399_p2 = por %p398_p4, %p397_p1 }
  0x1a   : > { %p393_p0 = pneg %p392_p13 }
  0x1c   : > { %p400_p3 = pnand %p399_p2, %p393_p0 }
  0x1e   : > { %403 = shalt.err (!%p400_p3)
}
  0x1f   : > { %354 = dma.hbm_to_vmem [thread:$0]  (!%p489_p5), %s578_s1, 16, %s128_s16, [#allocation3]  }
  0x20   : > { %s404_s6 = scalar_lea.hbm %s579_s2, 16 }
  0x21   : > { %p405_p6 = scmp.ne.s32.totalorder %s579_s2, %s404_s6  ;;  %p411_p3 = scmp.lt.u32.totalorder %s404_s6, %s579_s2 }
  0x23   : > { %p407_p8 = pnand %p405_p6, %p378_p7 }
  0x25   : > { %p408_p2 = pneg %p407_p8 }
  0x27   : > { %p413_p9 = pnand %p411_p3, %p408_p2 }
  0x29   : > { %416 = shalt.err (!%p413_p9)
}
  0x2a   : > { %s417_s11 = scalar_lea.vmem %s493_s18, 16  ;;  %s424_s15 = scalar_lea.vmem %s493_s18, 32 }
  0x2b   : > { %p418_p10 = scmp.ne.s32.totalorder %s493_s18, %s417_s11  ;;  %p425_p13 = scmp.lt.s32.totalorder %s493_s18, %s493_s18 }
  0x2c   : > { %p426_p0 = scmp.lt.s32.totalorder %s424_s15, %s417_s11 }
  0x2d   : > { %p420_p11 = pnand %p418_p10, %p378_p7 }
  0x2e   : > { %p427_p1 = por %p426_p0, %p425_p13 }
  0x2f   : > { %p421_p12 = pneg %p420_p11 }
  0x31   : > { %p428_p4 = pnand %p427_p1, %p421_p12 }
  0x33   : > { %431 = shalt.err (!%p428_p4)
}
  0x34   : > { %357 = dma.hbm_to_vmem [thread:$0]  (!%p489_p5), %s579_s2, 16, %s493_s18, [#allocation5]  }
  0x35   : > { %p585_p6 = scmp.ne.s32.totalorder %s583_s14, 0 }
  0x36   : > { %p586_p7 = scmp.eq.s32.totalorder (!%p585_p6), %s476_s13, 0 }
  0x37   : > { %159 = sbr.rel (%p585_p6) target bundleno = 390 (0x186), region = 32 }
  0x3e   : > { %437 = dma.done.wait (%p586_p7), [#allocation3], 16   ;;  %p587_p8 = pmov %p586_p7 }
  0x3f   : > { %p588_p2 = pmov %p586_p7 }
  0x40   : > { %439 = vsyncadd (%p587_p8), [#allocation3], 4294967280 }
  0x41   : > { %441 = dma.done.wait (%p588_p2), [#allocation5], 16   ;;  %p589_p3 = pmov %p588_p2 }
  0x42   : > { %p187_p9 = scmp.lt.s32.totalorder %s476_s13, 1  ;;  %vm201_vm0 = vcmask 261120   ;;  %v337_v21 = vld [vmem:[#allocation2] ss:$0 sm:$0xff]  ;;  %v338_v23 = vld [vmem:[#allocation4] ss:$0 sm:$0xff] }
  0x43   : > { %443 = vsyncadd (%p589_p3), [#allocation5], 4294967280 }
  0x44   : > { %s591_s13 = smov (!%p187_p9, %s476_s13), 1 }
  0x45   : > { %s341_s14 = sshll.u32 %s591_s13, 4 }
  0x46   : > { %s191_s20 = scalar_lea.vmem %s577_s0, %s341_s14  ;;  %s196_s23 = scalar_lea.vmem %s580_s3, %s341_s14 }
  0x47   : > { %v197_v0 = vld [vmem:[%s191_s20] sm:$0xff]  ;;  %v198_v1 = vld [vmem:[%s191_s20 + $0x8] sm:$0xff] }
  0x48   : > { %v202_v2 = vsel %vm201_vm0, %v197_v0, 0.0  ;;  %v205_v3 = vsel %vm201_vm0, %v198_v1, 0.0 }
  0x49   : > { %203 = vadd.xlane.f32.xlu0 %v202_v2 }
  0x4d   : > { %206 = vadd.xlane.f32.xlu0 %v205_v3 }
  0xd6   : > { %v204_v4 = vpop.xlane.xlu0 %203 }
  0xd7   : > { %v209_v5 = vmul.f32 0.03125, %v204_v4 }
  0xd9   : > { %v211_v6 = vsub.f32 %v197_v0, %v209_v5 }
  0xda   : > { %v207_v7 = vpop.xlane.xlu0 %206 }
  0xdb   : > { %v210_v8 = vmul.f32 0.03125, %v207_v7  ;;  %v213_v9 = vmul.f32 %v211_v6, %v211_v6 }
  0xdd   : > { %v212_v10 = vsub.f32 %v198_v1, %v210_v8  ;;  %v215_v11 = vsel %vm201_vm0, %v213_v9, 0.0 }
  0xde   : > { %216 = vadd.xlane.f32.xlu1 %v215_v11 }
  0xdf   : > { %v214_v12 = vmul.f32 %v212_v10, %v212_v10 }
  0xe1   : > { %v218_v13 = vsel %vm201_vm0, %v214_v12, 0.0 }
  0xe2   : > { %219 = vadd.xlane.f32.xlu1 %v218_v13 }
 0x16b   : > { %v217_v14 = vpop.xlane.xlu1 %216 }
 0x16c   : > { %v221_v15 = vmul.f32 0.03125, %v217_v14 }
 0x16e   : > { %v223_v16 = vadd.f32 1e-05, %v221_v15 }
 0x16f   : > { %v220_v17 = vpop.xlane.xlu1 %219 }
 0x170   : > { %372 = vrsqrt.f32 %v223_v16  ;;  %v222_v18 = vmul.f32 0.03125, %v220_v17 }
 0x172   : > { %v224_v19 = vadd.f32 1e-05, %v222_v18 }
 0x174   : > { %374 = vrsqrt.f32 %v224_v19 }
 0x17a   : > { %v373_v20 = vpop.eup %372 }
 0x17b   : > { %v227_v22 = vmul.f32 %v373_v20, %v211_v6 }
 0x17d   : > { %v235_v24 = vmul.f32 %v337_v21, %v227_v22 }
 0x17e   : > { %v375_v25 = vpop.eup %374 }
 0x17f   : > { %v243_v26 = vadd.f32 %v338_v23, %v235_v24  ;;  %v228_v27 = vmul.f32 %v375_v25, %v212_v10 }
 0x181   : > { %245 = vst.msk [vmem:[%s196_s23] sm:$0xff] %vm201_vm0, %v243_v26  ;;  %v236_v28 = vmul.f32 %v337_v21, %v228_v27 }
 0x183   : > { %v244_v29 = vadd.f32 %v338_v23, %v236_v28 }
 0x185   : > { %246 = vst.msk [vmem:[%s196_s23 + $0x8] sm:$0xff] %vm201_vm0, %v244_v29 }
 0x186 PF: > { %s15_s12 = sadd.s32 1, %s446_s12  }
 0x187   : > { %p12_p5 = scmp.ge.s32.totalorder %s15_s12, 4  }
 0x189   :  { %14 = sbr.rel (!%p12_p5) target bundleno = 2 (0x2), region = 71 }
 0x190   :  { %268 = vsyncpa [#allocation3], 1 }
 0x191   :  { %270 = vsyncpa [#allocation3 + $0x1], 1 }
 0x192   :  { %271 = vsyncpa [#allocation5], 1 }

// kernel: encoder_forward.10
= control target key start
LH: loop header
LB: loop body
LE: loop exit
PB: predicated region body
PF: predicated region fallthrough
CT: control target
= control target key end

     0   :  { %18 = vsyncpa [#allocation3], 0  ;;  %s2726_s0 = inlined_call_operand.vmem [shape: f32[2,16,32], index: 0, kind: input, shape index: {}]   ;;  %s2727_s1 = inlined_call_operand.vmem [shape: f32[1,32], index: 1, kind: input, shape index: {}]   ;;  %s2728_s2 = inlined_call_operand.vmem [shape: f32[1,32], index: 2, kind: input, shape index: {}]   ;;  %s2729_s3 = inlined_call_operand.vmem [shape: bf16[32,96], index: 3, kind: input, shape index: {}]   ;;  %s2730_s4 = inlined_call_operand.hbm [shape: f32[1,96], index: 4, kind: input, shape index: {}]   ;;  %s2731_s5 = inlined_call_operand.vmem [shape: bf16[32,32], index: 5, kind: input, shape index: {}]   ;;  %s2732_s6 = inlined_call_operand.hbm [shape: f32[1,32], index: 6, kind: input, shape index: {}]   ;;  %s2733_s7 = inlined_call_operand.hbm [shape: f32[1,32], index: 7, kind: input, shape index: {}]   ;;  %s2734_s8 = inlined_call_operand.hbm [shape: f32[1,32], index: 8, kind: input, shape index: {}]   ;;  %s2735_s9 = inlined_call_operand.vmem [shape: bf16[32,128], index: 9, kind: input, shape index: {}]   ;;  %s2736_s10 = inlined_call_operand.hbm [shape: f32[1,128], index: 10, kind: input, shape index: {}]   ;;  %s2737_s11 = inlined_call_operand.vmem [shape: bf16[128,32], index: 11, kind: input, shape index: {}]   ;;  %s2738_s12 = inlined_call_operand.hbm [shape: f32[1,32], index: 12, kind: input, shape index: {}]   ;;  %s2739_s13 = inlined_call_operand.vmem [shape: f32[2,16,32], index: 13, kind: output, shape index: {}]  }
   0x1   :  { %19 = vsyncpa [#allocation5], 0 }
   0x2   :  { %20 = vsyncpa [#allocation8], 0 }
   0x3   :  { %21 = vsyncpa [#allocation11], 0  ;;  %s2323_s25 = smov 0  }
   0x4 LB: > { %2743 = sst [smem:[#allocation16_spill]] %s2232_s25  ;;  %s2234_s26 = smov [#allocation4]   ;;  %s2232_s25 = sphi %s2323_s25, %s27_s25  }
   0x5   : > { %s372_s27 = sshll.u32 %s2234_s26, 4  ;;  %s2329_s28 = sadd.s32 4294967295, %s2232_s25   ;;  %s2334_s27 = int_to_ptr.vmem [resolvable:$true] %s372_s27 }
   0x6   : > { %p1700_p0 = scmp.ge.s32.totalorder %s2232_s25, 1  ;;  %p336_p1 = scmp.lt.s32.totalorder %s2232_s25, 3 }
   0x7   : > { %p2741_p2 = scmp.eq.s32.totalorder %s2329_s28, 0  ;;  %s2235_s30 = smov [#allocation7]  }
   0x8   : > { %p2336_p3 = pnand %p1700_p0, %p336_p1  ;;  %s394_s14 = sshll.u32 %s2235_s30, 4  ;;  %s2342_s14 = int_to_ptr.vmem [resolvable:$true] %s394_s14 }
   0x9   : > { %s2236_s15 = smov [#allocation2]   ;;  %s2237_s18 = smov [#allocation6]  }
   0xa   : > { %s2744_s29 = scalar_select %p2336_p3, 1, 0 }
   0xb   : > { %p1928_p4 = pneg %p2336_p3  ;;  %s358_s16 = sshll.u32 %s2236_s15, 4  ;;  %s2350_s16 = int_to_ptr.vmem [resolvable:$true] %s358_s16 }
   0xc   : > { %s383_s19 = sshll.u32 %s2237_s18, 4  ;;  %s2042_s22 = scalar_lea.hbm %s2732_s6, 16  ;;  %s2352_s19 = int_to_ptr.vmem [resolvable:$true] %s383_s19 }
   0xd   : > { %p2346_p5 = pnand %p2741_p2, %p1928_p4  ;;  %p2043_p6 = scmp.ne.s32.totalorder %s2732_s6, %s2042_s22 }
   0xe   : > { %p2049_p10 = scmp.lt.u32.totalorder %s2042_s22, %s2732_s6 }
   0xf   : > { %p2362_p7 = pneg %p2346_p5 }
  0x11   : > { %p2045_p8 = pnand %p2362_p7, %p2043_p6 }
  0x13   : > { %p2046_p9 = pneg %p2045_p8 }
  0x15   : > { %p2051_p11 = pnand %p2049_p10, %p2046_p9 }
  0x17   : > { %2054 = shalt.err (!%p2051_p11)
}
  0x18   : > { %s2055_s18 = scalar_lea.vmem %s2334_s27, 16  ;;  %s2062_s20 = scalar_lea.vmem %s2334_s27, 32 }
  0x19   : > { %p2056_p12 = scmp.ne.s32.totalorder %s2334_s27, %s2055_s18  ;;  %p2063_p1 = scmp.lt.s32.totalorder %s2334_s27, %s2334_s27 }
  0x1a   : > { %p2064_p4 = scmp.lt.s32.totalorder %s2062_s20, %s2055_s18 }
  0x1b   : > { %p2058_p13 = pnand %p2056_p12, %p2362_p7 }
  0x1c   : > { %p2065_p6 = por %p2064_p4, %p2063_p1 }
  0x1d   : > { %p2059_p0 = pneg %p2058_p13 }
  0x1f   : > { %p2066_p8 = pnand %p2065_p6, %p2059_p0 }
  0x21   : > { %2069 = shalt.err (!%p2066_p8)
}
  0x22   : > { %1934 = dma.hbm_to_vmem [thread:$0]  (!%p2346_p5), %s2732_s6, 16, %s2334_s27, [#allocation5]  }
  0x23   : > { %s2070_s30 = scalar_lea.hbm %s2734_s8, 16 }
  0x24   : > { %p2071_p9 = scmp.ne.s32.totalorder %s2734_s8, %s2070_s30  ;;  %p2077_p12 = scmp.lt.u32.totalorder %s2070_s30, %s2734_s8 }
  0x26   : > { %p2073_p10 = pnand %p2071_p9, %p2362_p7 }
  0x28   : > { %p2074_p11 = pneg %p2073_p10 }
  0x2a   : > { %p2079_p13 = pnand %p2077_p12, %p2074_p11 }
  0x2c   : > { %2082 = shalt.err (!%p2079_p13)
}
  0x2d   : > { %s2083_s27 = scalar_lea.vmem %s2342_s14, 16  ;;  %s2090_s25 = scalar_lea.vmem %s2342_s14, 32 }
  0x2e   : > { %p2084_p0 = scmp.ne.s32.totalorder %s2342_s14, %s2083_s27  ;;  %p2091_p6 = scmp.lt.s32.totalorder %s2342_s14, %s2342_s14 }
  0x2f   : > { %p2092_p8 = scmp.lt.s32.totalorder %s2090_s25, %s2083_s27 }
  0x30   : > { %p2086_p1 = pnand %p2084_p0, %p2362_p7 }
  0x31   : > { %p2093_p9 = por %p2092_p8, %p2091_p6 }
  0x32   : > { %p2087_p4 = pneg %p2086_p1 }
  0x34   : > { %p2094_p10 = pnand %p2093_p9, %p2087_p4 }
  0x36   : > { %2097 = shalt.err (!%p2094_p10)
}
  0x37   : > { %1940 = dma.hbm_to_vmem [thread:$0]  (!%p2346_p5), %s2734_s8, 16, %s2342_s14, [#allocation8]  }
  0x38   : > { %s2098_s30 = scalar_lea.hbm %s2730_s4, 16 }
  0x39   : > { %p2099_p11 = scmp.ne.s32.totalorder %s2730_s4, %s2098_s30  ;;  %p2105_p0 = scmp.lt.u32.totalorder %s2098_s30, %s2730_s4 }
  0x3b   : > { %p2101_p12 = pnand %p2099_p11, %p2362_p7 }
  0x3d   : > { %p2102_p13 = pneg %p2101_p12 }
  0x3f   : > { %p2107_p1 = pnand %p2105_p0, %p2102_p13 }
  0x41   : > { %2110 = shalt.err (!%p2107_p1)
}
  0x42   : > { %s2111_s14 = scalar_lea.vmem %s2350_s16, 16  ;;  %s2118_s25 = scalar_lea.vmem %s2350_s16, 32 }
  0x43   : > { %p2112_p4 = scmp.ne.s32.totalorder %s2350_s16, %s2111_s14  ;;  %p2119_p9 = scmp.lt.s32.totalorder %s2350_s16, %s2350_s16 }
  0x44   : > { %p2120_p10 = scmp.lt.s32.totalorder %s2118_s25, %s2111_s14 }
  0x45   : > { %p2114_p6 = pnand %p2112_p4, %p2362_p7 }
  0x46   : > { %p2121_p11 = por %p2120_p10, %p2119_p9 }
  0x47   : > { %p2115_p8 = pneg %p2114_p6 }
  0x49   : > { %p2122_p12 = pnand %p2121_p11, %p2115_p8 }
  0x4b   : > { %2125 = shalt.err (!%p2122_p12)
}
  0x4c   : > { %1931 = dma.hbm_to_vmem [thread:$0]  (!%p2346_p5), %s2730_s4, 16, %s2350_s16, [#allocation3]  }
  0x4d   : > { %s2126_s30 = scalar_lea.hbm %s2733_s7, 16 }
  0x4e   : > { %p2127_p13 = scmp.ne.s32.totalorder %s2733_s7, %s2126_s30  ;;  %p2133_p4 = scmp.lt.u32.totalorder %s2126_s30, %s2733_s7 }
  0x50   : > { %p2129_p0 = pnand %p2127_p13, %p2362_p7 }
  0x52   : > { %p2130_p1 = pneg %p2129_p0 }
  0x54   : > { %p2135_p6 = pnand %p2133_p4, %p2130_p1 }
  0x56   : > { %2138 = shalt.err (!%p2135_p6)
}
  0x57   : > { %s2139_s16 = scalar_lea.vmem %s2352_s19, 16  ;;  %s2146_s14 = scalar_lea.vmem %s2352_s19, 32 }
  0x58   : > { %p2140_p8 = scmp.ne.s32.totalorder %s2352_s19, %s2139_s16  ;;  %p2147_p11 = scmp.lt.s32.totalorder %s2352_s19, %s2352_s19 }
  0x59   : > { %p2148_p12 = scmp.lt.s32.totalorder %s2146_s14, %s2139_s16 }
  0x5a   : > { %p2142_p9 = pnand %p2140_p8, %p2362_p7 }
  0x5b   : > { %p2149_p13 = por %p2148_p12, %p2147_p11 }
  0x5c   : > { %p2143_p10 = pneg %p2142_p9 }
  0x5e   : > { %p2150_p0 = pnand %p2149_p13, %p2143_p10 }
  0x60   : > { %2153 = shalt.err (!%p2150_p0)
}
  0x61   : > { %1937 = dma.hbm_to_vmem [thread:$0]  (!%p2346_p5), %s2733_s7, 16, %s2352_s19, [#allocation5]  }
  0x62   : > { %s2238_s22 = smov [#allocation9]   ;;  %s2239_s24 = smov [#allocation10]  }
  0x63   : > { %s408_s23 = sshll.u32 %s2238_s22, 4  ;;  %s422_s30 = sshll.u32 %s2239_s24, 4  ;;  %s409_s23 = int_to_ptr.vmem [resolvable:$true] %s408_s23  ;;  %s423_s30 = int_to_ptr.vmem [resolvable:$true] %s422_s30 }
  0x64   : > { %s2154_s20 = scalar_lea.hbm %s2736_s10, 16 }
  0x65   : > { %p2155_p1 = scmp.ne.s32.totalorder %s2736_s10, %s2154_s20  ;;  %p2161_p8 = scmp.lt.u32.totalorder %s2154_s20, %s2736_s10 }
  0x67   : > { %p2157_p4 = pnand %p2155_p1, %p2362_p7 }
  0x69   : > { %p2158_p6 = pneg %p2157_p4 }
  0x6b   : > { %p2163_p9 = pnand %p2161_p8, %p2158_p6 }
  0x6d   : > { %2166 = shalt.err (!%p2163_p9)
}
  0x6e   : > { %s2167_s19 = scalar_lea.vmem %s409_s23, 16  ;;  %s2174_s21 = scalar_lea.vmem %s409_s23, 32 }
  0x6f   : > { %p2168_p10 = scmp.ne.s32.totalorder %s409_s23, %s2167_s19  ;;  %p2175_p13 = scmp.lt.s32.totalorder %s409_s23, %s409_s23 }
  0x70   : > { %p2176_p0 = scmp.lt.s32.totalorder %s2174_s21, %s2167_s19 }
  0x71   : > { %p2170_p11 = pnand %p2168_p10, %p2362_p7 }
  0x72   : > { %p2177_p2 = por %p2176_p0, %p2175_p13 }
  0x73   : > { %p2171_p12 = pneg %p2170_p11 }
  0x75   : > { %p2178_p3 = pnand %p2177_p2, %p2171_p12 }
  0x77   : > { %2181 = shalt.err (!%p2178_p3)
}
  0x78   : > { %1943 = dma.hbm_to_vmem [thread:$0]  (!%p2346_p5), %s2736_s10, 16, %s409_s23, [#allocation8]  }
  0x79   : > { %s2182_s20 = scalar_lea.hbm %s2738_s12, 16 }
  0x7a   : > { %p2183_p1 = scmp.ne.s32.totalorder %s2738_s12, %s2182_s20  ;;  %p2189_p3 = scmp.lt.u32.totalorder %s2182_s20, %s2738_s12 }
  0x7c   : > { %p2185_p4 = pnand %p2183_p1, %p2362_p7 }
  0x7e   : > { %p2186_p2 = pneg %p2185_p4 }
  0x80   : > { %p2191_p6 = pnand %p2189_p3, %p2186_p2 }
  0x82   : > { %2194 = shalt.err (!%p2191_p6)
}
  0x83   : > { %s2195_s19 = scalar_lea.vmem %s423_s30, 16  ;;  %s2202_s23 = scalar_lea.vmem %s423_s30, 32 }
  0x84   : > { %p2196_p8 = scmp.ne.s32.totalorder %s423_s30, %s2195_s19  ;;  %p2203_p11 = scmp.lt.s32.totalorder %s423_s30, %s423_s30 }
  0x85   : > { %p2204_p12 = scmp.lt.s32.totalorder %s2202_s23, %s2195_s19 }
  0x86   : > { %p2198_p9 = pnand %p2196_p8, %p2362_p7 }
  0x87   : > { %p2205_p13 = por %p2204_p12, %p2203_p11 }
  0x88   : > { %p2199_p10 = pneg %p2198_p9 }
  0x8a   : > { %p2206_p0 = pnand %p2205_p13, %p2199_p10 }
  0x8c   : > { %2209 = shalt.err (!%p2206_p0)
}
  0x8d   : > { %1946 = dma.hbm_to_vmem [thread:$0]  (!%p2346_p5), %s2738_s12, 16, %s423_s30, [#allocation11]  }
  0x8e   : > { %p2747_p1 = scmp.ne.s32.totalorder %s2744_s29, 0 }
  0x8f   : > { %p2748_p4 = scmp.eq.s32.totalorder (!%p2747_p1), %s2329_s28, 0 }
  0x90   : > { %443 = sbr.rel (%p2747_p1) target bundleno = 4410 (0x113a), region = 72 }
  0x97   : > { %2215 = dma.done.wait (%p2748_p4), [#allocation3], 16   ;;  %p2749_p7 = pmov %p2748_p4 }
  0x98   : > { %p2750_p2 = pmov %p2748_p4 }
  0x99   : > { %2217 = vsyncadd (%p2749_p7), [#allocation3], 4294967280 }
  0x9a   : > { %2219 = dma.done.wait (%p2750_p2), [#allocation5], 32   ;;  %p2751_p3 = pmov %p2750_p2 }
  0x9b   : > { %p2752_p6 = pmov %p2750_p2 }
  0x9c   : > { %2221 = vsyncadd (%p2751_p3), [#allocation5], 4294967264 }
  0x9d   : > { %2223 = dma.done.wait (%p2752_p6), [#allocation8], 32   ;;  %p2753_p5 = pmov %p2750_p2 }
  0x9e   : > { %p2754_p8 = pmov %p2750_p2 }
  0x9f   : > { %2225 = vsyncadd (%p2753_p5), [#allocation8], 4294967264 }
  0xa0   : > { %2227 = dma.done.wait (%p2754_p8), [#allocation11], 16   ;;  %p2755_p9 = pmov %p2750_p2 }
  0xa1   : > { %p507_p10 = scmp.lt.s32.totalorder %s2329_s28, 1  ;;  %vm522_vm0 = vcmask 261120   ;;  %v1986_v14 = vld [vmem:[%s2729_s3] sm:$0xff]   ;;  %v2240_v15 = vmov 0.0   ;;  %v1987_v16 = vld [vmem:[%s2729_s3 + $0x8] sm:$0xff]   ;;  %vm2241_vm1 = vmmov 0  }
  0xa2   : > { %2229 = vsyncadd (%p2755_p9), [#allocation11], 4294967280  ;;  %1796 = vmatprep.subr.bf16.mxu1 %v2240_v15  ;;  %1822 = vmatprep.subr.bf16.mxu0 %v2240_v15  ;;  %v1719_v25 = vld [vmem:[%s2727_s1] ss:$0 sm:$0xff]  ;;  %s2242_s19 = smov 96   ;;  %s2243_s23 = smov 88  }
  0xa3   : > { %s2758_s28 = smov (!%p507_p10, %s2329_s28), 1  ;;  %1797 = vmatpush3.bf16.msra.mxu1 %v1986_v14  ;;  %1800 = vmatprep.mubr.msk.bf16.mxu1 %vm2241_vm1, %v2240_v15  ;;  %v1720_v29 = vld [vmem:[%s2728_s2] ss:$0 sm:$0xff]  ;;  %s2244_s21 = smov 120   ;;  %vm641_vm2 = vcmask 64512   ;;  %vm689_vm3 = vcmask 130048  }
  0xa4   : > { %s1755_s29 = sshll.u32 %s2758_s28, 4  ;;  %1798 = vmatprep.subr.bf16.mxu1 %v2240_v15  ;;  %1824 = vmatprep.mubr.msk.bf16.mxu0 %vm2241_vm1, %v2240_v15  ;;  %v1721_v34 = vld [vmem:[#allocation2] ss:$0 sm:$0xff]  ;;  %s2245_s22 = smov 64   ;;  %vm889_vm4 = vcmask 1043456  }
  0xa5   : > { %s511_s30 = scalar_lea.vmem %s2726_s0, %s1755_s29  ;;  %s2246_s17 = smov 80  }
  0xa6   : > { %v2520_v0 = vld [vmem:[%s511_s30] sm:$0xff]  ;;  %v2522_v1 = vld [vmem:[%s511_s30 + $0x8] sm:$0xff]  ;;  %s2247_s26 = smov 112   ;;  %s2248_s30 = smov 56  }
  0xa7   : > { %v523_v2 = vsel %vm522_vm0, %v2520_v0, 0.0  ;;  %v526_v3 = vsel %vm522_vm0, %v2522_v1, 0.0  ;;  %1799 = vmatpush3.bf16.msra.mxu1 %v1987_v16  ;;  %s2249_s27 = smov 48   ;;  %s2250_s16 = smov 104  }
  0xa8   : > { %524 = vadd.xlane.f32.xlu0 %v523_v2  ;;  %1804 = vmatprep.subr.bf16.mxu1 %v2240_v15  ;;  %s2251_s14 = smov 72  }
  0xac   : > { %527 = vadd.xlane.f32.xlu0 %v526_v3 }
 0x135   : > { %v525_v4 = vpop.xlane.xlu0 %524 }
 0x136   : > { %v530_v5 = vmul.f32 0.03125, %v525_v4 }
 0x138   : > { %v532_v6 = vsub.f32 %v2520_v0, %v530_v5 }
 0x139   : > { %v528_v7 = vpop.xlane.xlu0 %527 }
 0x13a   : > { %v531_v8 = vmul.f32 0.03125, %v528_v7  ;;  %v534_v9 = vmul.f32 %v532_v6, %v532_v6 }
 0x13c   : > { %v533_v10 = vsub.f32 %v2522_v1, %v531_v8  ;;  %v536_v11 = vsel %vm522_vm0, %v534_v9, 0.0 }
 0x13d   : > { %537 = vadd.xlane.f32.xlu1 %v536_v11 }
 0x13e   : > { %v535_v12 = vmul.f32 %v533_v10, %v533_v10 }
 0x140   : > { %v539_v13 = vsel %vm522_vm0, %v535_v12, 0.0 }
 0x141   : > { %540 = vadd.xlane.f32.xlu1 %v539_v13 }
 0x1ca   : > { %v538_v17 = vpop.xlane.xlu1 %537 }
 0x1cb   : > { %v542_v18 = vmul.f32 0.03125, %v538_v17 }
 0x1cd   : > { %v544_v19 = vadd.f32 1e-05, %v542_v18 }
 0x1ce   : > { %v541_v20 = vpop.xlane.xlu1 %540 }
 0x1cf   : > { %1998 = vrsqrt.f32 %v544_v19  ;;  %v543_v21 = vmul.f32 0.03125, %v541_v20 }
 0x1d1   : > { %v545_v22 = vadd.f32 1e-05, %v543_v21 }
 0x1d3   : > { %2000 = vrsqrt.f32 %v545_v22 }
 0x1d9   : > { %v1999_v23 = vpop.eup %1998 }
 0x1da   : > { %v548_v24 = vmul.f32 %v1999_v23, %v532_v6 }
 0x1dc   : > { %v556_v28 = vmul.f32 %v1719_v25, %v548_v24 }
 0x1dd   : > { %v2001_v26 = vpop.eup %2000 }
 0x1de   : > { %v549_v27 = vmul.f32 %v2001_v26, %v533_v10  ;;  %v564_v31 = vadd.f32 %v1720_v29, %v556_v28 }
 0x1e0   : > { %v557_v30 = vmul.f32 %v1719_v25, %v549_v27 }
 0x1e2   : > { %v565_v32 = vadd.f32 %v1720_v29, %v557_v30 }
 0x1e4   : > { %v566_v33 = vpack.c.bf16 %v565_v32, %v564_v31 }
 0x1e6   : > { %1801 = vmatmul.mubr.msk.bf16.vlgmr.msra.gmra.mrb[0].mxu1 %vm522_vm0, %v566_v33 }
 0x1e7   : > { %1806 = vmatprep.mubr.msk.bf16.mxu1 %vm2241_vm1, %v2240_v15 }
 0x2b9   : > { %v627_v35 = vpop.f32.mrb[0].mxu1 }
 0x2ba   : > { %v628_v36 = vadd.f32 %v1721_v34, %v627_v35  ;;  %v1802_v37 = vpop.f32.mrb[1].mxu1 }
 0x2bb   : > { %v630_v38 = vpop.f32.mrb[2].mxu1 }
 0x2bc   : > { %v631_v39 = vadd.f32 %v1721_v34, %v630_v38  ;;  %v1803_v40 = vpop.f32.mrb[3].mxu1  ;;  %v634_v41 = vmul.f32 0.35355338, %v628_v36  ;;  %v884_v34 = vld [vmem:[%s2731_s5 + $0x4] sm:$0xf] }
 0x2bd   : > { %v891_v35 = vsel %vm889_vm4, %v884_v34, 0 }
 0x2be   : > { %v635_v42 = vmul.f32 0.35355338, %v631_v39  ;;  %v2555_v43 = vpack.c.bf16 %v631_v39, %v628_v36 }
 0x2c0   : > { %v2557_v44 = vpack.c.bf16 %v635_v42, %v634_v41  ;;  %639 = vrot.lane.b32.xlu0 %v2555_v43, %s2242_s19  ;;  %v760_v41 = vld [vmem:[%s2731_s5] sm:$0xf] }
 0x2c4   : > { %765 = vrot.lane.b32.xlu0 %v2555_v43, %s2243_s23  ;;  %s2252_s23 = smov 40  }
 0x2c8   : > { %763 = vrot.lane.b32.xlu0 %v2557_v44, %s2244_s21 }
 0x332   : > { %v640_v45 = vpop.permute.xlu0 %639 }
 0x333   : > { %v646_v46 = vsel %vm641_vm2, %v640_v45, 0 }
 0x334   : > { %1805 = vmatpush3.bf16.xpose.msra.mxu1 %v646_v46 }
 0x335   : > { %1810 = vmatprep.subr.bf16.mxu1 %v2240_v15 }
 0x336   : > { %v766_v8 = vpop.permute.xlu0 %765 }
 0x337   : > { %v771_v10 = vsel %vm641_vm2, %v766_v8, 0 }
 0x33a   : > { %v764_v11 = vpop.permute.xlu0 %763 }
 0x33b   : > { %1807 = vmatmul.mubr.msk.bf16.vlgmr.msra.gmra.mrb[4].mxu1 %vm641_vm2, %v2557_v44 }
 0x33c   : > { %1812 = vmatprep.mubr.msk.bf16.mxu1 %vm2241_vm1, %v2240_v15 }
 0x40e   : > { %v682_v47 = vpop.f32.mrb[4].mxu1 }
 0x40f   : > { %v1808_v48 = vpop.f32.mrb[5].mxu1  ;;  %v690_v49 = vsel %vm689_vm3, %v682_v47, -inf }
 0x410   : > { %691 = vmax.xlane.f32.xlu1 %v690_v49  ;;  %v685_v50 = vpop.f32.mrb[6].mxu1 }
 0x411   : > { %v1809_v51 = vpop.f32.mrb[7].mxu1  ;;  %v693_v52 = vsel %vm689_vm3, %v685_v50, -inf }
 0x414   : > { %694 = vmax.xlane.f32.xlu1 %v693_v52 }
 0x49d   : > { %v692_v53 = vpop.xlane.xlu1 %691 }
 0x49e   : > { %v696_v54 = vsub.f32 %v682_v47, %v692_v53  ;;  %v938_v47 = vsel %vm889_vm4, %v760_v41, 0 }
 0x4a0   : > { %v698_v55 = vmul.f32 1.442695, %v696_v54 }
 0x4a1   : > { %v695_v56 = vpop.xlane.xlu1 %694 }
 0x4a2   : > { %2002 = vpow2.f32 %v698_v55  ;;  %v697_v57 = vsub.f32 %v685_v50, %v695_v56 }
 0x4a4   : > { %v700_v58 = vmul.f32 1.442695, %v697_v57 }
 0x4a6   : > { %2004 = vpow2.f32 %v700_v58 }
 0x4ac   : > { %v2003_v59 = vpop.eup %2002 }
 0x4ad   : > { %v702_v60 = vsel %vm689_vm3, %v2003_v59, 0.0 }
 0x4ae   : > { %703 = vadd.xlane.f32.xlu1 %v702_v60 }
 0x4b0   : > { %v2005_v61 = vpop.eup %2004 }
 0x4b1   : > { %v705_v62 = vsel %vm689_vm3, %v2005_v61, 0.0 }
 0x4b2   : > { %706 = vadd.xlane.f32.xlu1 %v705_v62 }
 0x4c3   : > { %713 = vrot.lane.b32.xlu1 %v2555_v43, %s2245_s22 }
 0x53b   : > { %v704_v63 = vpop.xlane.xlu1 %703 }
 0x53c   : > { %2006 = vrcp.f32 %v704_v63 }
 0x53f   : > { %v707_v2 = vpop.xlane.xlu1 %706 }
 0x540   : > { %2008 = vrcp.f32 %v707_v2 }
 0x543   : > { %v714_v3 = vpop.permute.xlu1 %713 }
 0x544   : > { %1811 = vmatpush3.bf16.msra.mxu1 %v714_v3 }
 0x545   : > { %1816 = vmatprep.subr.bf16.mxu1 %v2240_v15 }
 0x546   : > { %v2007_v4 = vpop.eup %2006 }
 0x547   : > { %v710_v6 = vmul.f32 %v2007_v4, %v2003_v59 }
 0x54a   : > { %v2009_v5 = vpop.eup %2008 }
 0x54b   : > { %v711_v7 = vmul.f32 %v2009_v5, %v2005_v61 }
 0x54d   : > { %v712_v9 = vpack.c.bf16 %v711_v7, %v710_v6 }
 0x54f   : > { %1813 = vmatmul.mubr.msk.bf16.vlgmr.msra.gmra.mrb[8].mxu1 %vm689_vm3, %v712_v9 }
 0x550   : > { %1817 = vmatpush3.bf16.xpose.msra.mxu1 %v771_v10  ;;  %1818 = vmatprep.mubr.msk.bf16.mxu1 %vm2241_vm1, %v2240_v15 }
 0x551   : > { %1828 = vmatprep.subr.bf16.mxu1 %v2240_v15 }
 0x557   : > { %1819 = vmatmul.mubr.msk.bf16.vlgmr.msra.gmra.mrb[12].mxu1 %vm641_vm2, %v764_v11 }
 0x558   : > { %1830 = vmatprep.mubr.msk.bf16.mxu1 %vm2241_vm1, %v2240_v15  ;;  %1829 = vmatpush3.bf16.msra.mxu1 %v891_v35 }
 0x559   : > { %1840 = vmatprep.subr.bf16.mxu1 %v2240_v15 }
 0x622   : > { %v753_v12 = vpop.f32.mrb[8].mxu1 }
 0x623   : > { %v1814_v13 = vpop.f32.mrb[9].mxu1 }
 0x624   : > { %v756_v14 = vpop.f32.mrb[10].mxu1 }
 0x625   : > { %v761_v16 = vpack.c.bf16 %v756_v14, %v753_v12  ;;  %v1815_v17 = vpop.f32.mrb[11].mxu1 }
 0x62a   : > { %v807_v18 = vpop.f32.mrb[12].mxu1 }
 0x62b   : > { %v1820_v19 = vpop.f32.mrb[13].mxu1  ;;  %v814_v20 = vsel %vm689_vm3, %v807_v18, -inf }
 0x62c   : > { %815 = vmax.xlane.f32.xlu0 %v814_v20  ;;  %v810_v21 = vpop.f32.mrb[14].mxu1 }
 0x62d   : > { %v1821_v22 = vpop.f32.mrb[15].mxu1  ;;  %v817_v23 = vsel %vm689_vm3, %v810_v21, -inf }
 0x62e   : > { %818 = vmax.xlane.f32.xlu1 %v817_v23 }
 0x63f   : > { %983 = vrot.lane.b32.xlu1 %v2555_v43, %s2246_s17 }
 0x643   : > { %981 = vrot.lane.b32.xlu1 %v2557_v44, %s2247_s26 }
 0x6b9   : > { %v816_v24 = vpop.xlane.xlu0 %815 }
 0x6ba   : > { %v820_v25 = vsub.f32 %v807_v18, %v816_v24 }
 0x6bb   : > { %v819_v26 = vpop.xlane.xlu1 %818 }
 0x6bc   : > { %v822_v27 = vmul.f32 1.442695, %v820_v25  ;;  %v821_v28 = vsub.f32 %v810_v21, %v819_v26 }
 0x6be   : > { %2010 = vpow2.f32 %v822_v27  ;;  %v824_v29 = vmul.f32 1.442695, %v821_v28 }
 0x6bf   : > { %v984_v50 = vpop.permute.xlu1 %983 }
 0x6c0   : > { %2012 = vpow2.f32 %v824_v29  ;;  %v989_v54 = vsel %vm641_vm2, %v984_v50, 0 }
 0x6c3   : > { %v982_v59 = vpop.permute.xlu1 %981 }
 0x6c8   : > { %v2011_v30 = vpop.eup %2010 }
 0x6c9   : > { %v826_v31 = vsel %vm689_vm3, %v2011_v30, 0.0 }
 0x6ca   : > { %v2013_v32 = vpop.eup %2012  ;;  %827 = vadd.xlane.f32.xlu0 %v826_v31  ;;  %v1102_v31 = vld [vmem:[%s2731_s5 + $0x8] sm:$0xf] }
 0x6cb   : > { %v829_v33 = vsel %vm689_vm3, %v2013_v32, 0.0 }
 0x6ce   : > { %830 = vadd.xlane.f32.xlu0 %v829_v33 }
 0x6e4   : > { %837 = vrot.lane.b32.xlu0 %v2555_v43, %s2248_s30 }
 0x757   : > { %v828_v36 = vpop.xlane.xlu0 %827 }
 0x758   : > { %2014 = vrcp.f32 %v828_v36 }
 0x75b   : > { %v831_v37 = vpop.xlane.xlu0 %830 }
 0x75c   : > { %2016 = vrcp.f32 %v831_v37 }
 0x75f   : > { %v838_v38 = vpop.permute.xlu0 %837 }
 0x760   : > { %1823 = vmatpush3.bf16.msra.mxu0 %v838_v38 }
 0x761   : > { %1834 = vmatprep.subr.bf16.mxu0 %v2240_v15 }
 0x762   : > { %v2015_v39 = vpop.eup %2014 }
 0x763   : > { %v834_v42 = vmul.f32 %v2015_v39, %v2011_v30 }
 0x766   : > { %v2017_v40 = vpop.eup %2016 }
 0x767   : > { %v835_v45 = vmul.f32 %v2017_v40, %v2013_v32  ;;  %v1108_v32 = vsel %vm889_vm4, %v1102_v31, 0 }
 0x769   : > { %v836_v46 = vpack.c.bf16 %v835_v45, %v834_v42 }
 0x76b   : > { %1825 = vmatmul.mubr.msk.bf16.vlgmr.msra.gmra.mrb[0].mxu0 %vm689_vm3, %v836_v46 }
 0x76c   : > { %1835 = vmatpush3.bf16.msra.mxu0 %v938_v47  ;;  %1836 = vmatprep.mubr.msk.bf16.mxu0 %vm2241_vm1, %v2240_v15 }
 0x76d   : > { %1846 = vmatprep.subr.bf16.mxu0 %v2240_v15 }
 0x773   : > { %1837 = vmatmul.mubr.msk.bf16.vlgmr.msra.gmra.mrb[4].mxu0 %vm641_vm2, %v761_v16 }
 0x774   : > { %1848 = vmatprep.mubr.msk.bf16.mxu0 %vm2241_vm1, %v2240_v15 }
 0x83e   : > { %v877_v48 = vpop.f32.mrb[0].mxu0 }
 0x83f   : > { %v1826_v49 = vpop.f32.mrb[1].mxu0 }
 0x840   : > { %v880_v51 = vpop.f32.mrb[2].mxu0 }
 0x841   : > { %v885_v52 = vpack.c.bf16 %v880_v51, %v877_v48  ;;  %v1827_v53 = vpop.f32.mrb[3].mxu0 }
 0x843   : > { %1831 = vmatmul.mubr.msk.bf16.vlgmr.msra.gmra.mrb[16].mxu1 %vm641_vm2, %v885_v52 }
 0x844   : > { %1841 = vmatpush3.bf16.xpose.msra.mxu1 %v989_v54  ;;  %1842 = vmatprep.mubr.msk.bf16.mxu1 %vm2241_vm1, %v2240_v15 }
 0x845   : > { %1852 = vmatprep.subr.bf16.mxu1 %v2240_v15 }
 0x846   : > { %v974_v55 = vpop.f32.mrb[4].mxu0 }
 0x847   : > { %v1838_v56 = vpop.f32.mrb[5].mxu0 }
 0x848   : > { %v977_v57 = vpop.f32.mrb[6].mxu0  ;;  %v1274_v56 = vld [vmem:[%s2731_s5 + $0xc] sm:$0xf] }
 0x849   : > { %v1839_v58 = vpop.f32.mrb[7].mxu0 }
 0x84b   : > { %1843 = vmatmul.mubr.msk.bf16.vlgmr.msra.gmra.mrb[20].mxu1 %vm641_vm2, %v982_v59 }
 0x84c   : > { %1854 = vmatprep.mubr.msk.bf16.mxu1 %vm2241_vm1, %v2240_v15  ;;  %1853 = vmatpush3.bf16.msra.mxu1 %v1108_v32 }
 0x84d   : > { %1864 = vmatprep.subr.bf16.mxu1 %v2240_v15 }
 0x916   : > { %v927_v60 = vpop.f32.mrb[16].mxu1 }
 0x917   : > { %v2614_v61 = vadd.f32 %v974_v55, %v927_v60  ;;  %v1832_v62 = vpop.f32.mrb[17].mxu1 }
 0x918   : > { %v930_v63 = vpop.f32.mrb[18].mxu1 }
 0x919   : > { %v2616_v2 = vadd.f32 %v977_v57, %v930_v63  ;;  %v1833_v3 = vpop.f32.mrb[19].mxu1  ;;  %v1280_v57 = vsel %vm889_vm4, %v1274_v56, 0  ;;  %v1990_v56 = vld [vmem:[%s2737_s11] sm:$0xff]  }
 0x91e   : > { %v1025_v4 = vpop.f32.mrb[20].mxu1 }
 0x91f   : > { %v1844_v5 = vpop.f32.mrb[21].mxu1  ;;  %v1032_v6 = vsel %vm689_vm3, %v1025_v4, -inf }
 0x920   : > { %1033 = vmax.xlane.f32.xlu1 %v1032_v6  ;;  %v1028_v7 = vpop.f32.mrb[22].mxu1 }
 0x921   : > { %v1845_v8 = vpop.f32.mrb[23].mxu1  ;;  %v1035_v9 = vsel %vm689_vm3, %v1028_v7, -inf }
 0x922   : > { %1036 = vmax.xlane.f32.xlu0 %v1035_v9 }
 0x931   : > { %1055 = vrot.lane.b32.xlu1 %v2555_v43, %s2249_s27  ;;  %s516_s27 = scalar_lea.vmem %s2739_s13, %s1755_s29 }
 0x935   : > { %1153 = vrot.lane.b32.xlu1 %v2557_v44, %s2250_s16 }
 0x9ad   : > { %v1034_v10 = vpop.xlane.xlu1 %1033 }
 0x9ae   : > { %v1038_v11 = vsub.f32 %v1025_v4, %v1034_v10 }
 0x9af   : > { %v1037_v12 = vpop.xlane.xlu0 %1036 }
 0x9b0   : > { %v1040_v13 = vmul.f32 1.442695, %v1038_v11  ;;  %v1039_v14 = vsub.f32 %v1028_v7, %v1037_v12 }
 0x9b1   : > { %v1056_v16 = vpop.permute.xlu1 %1055 }
 0x9b2   : > { %2018 = vpow2.f32 %v1040_v13  ;;  %v1042_v17 = vmul.f32 1.442695, %v1039_v14  ;;  %1847 = vmatpush3.bf16.msra.mxu0 %v1056_v16 }
 0x9b3   : > { %1858 = vmatprep.subr.bf16.mxu0 %v2240_v15 }
 0x9b4   : > { %2020 = vpow2.f32 %v1042_v17 }
 0x9b5   : > { %v1154_v30 = vpop.permute.xlu1 %1153 }
 0x9bc   : > { %v2019_v18 = vpop.eup %2018 }
 0x9bd   : > { %v1044_v19 = vsel %vm689_vm3, %v2019_v18, 0.0 }
 0x9be   : > { %v2021_v20 = vpop.eup %2020  ;;  %1045 = vadd.xlane.f32.xlu0 %v1044_v19 }
 0x9bf   : > { %v1047_v21 = vsel %vm689_vm3, %v2021_v20, 0.0 }
 0x9c2   : > { %1048 = vadd.xlane.f32.xlu0 %v1047_v21 }
 0x9d8   : > { %1155 = vrot.lane.b32.xlu0 %v2555_v43, %s2251_s14 }
 0xa4b   : > { %v1046_v44 = vpop.xlane.xlu0 %1045 }
 0xa4c   : > { %2022 = vrcp.f32 %v1046_v44 }
 0xa4f   : > { %v1049_v22 = vpop.xlane.xlu0 %1048 }
 0xa50   : > { %2024 = vrcp.f32 %v1049_v22 }
 0xa53   : > { %v1156_v27 = vpop.permute.xlu0 %1155 }
 0xa54   : > { %v1161_v29 = vsel %vm641_vm2, %v1156_v27, 0 }
 0xa56   : > { %v2023_v23 = vpop.eup %2022 }
 0xa57   : > { %v1052_v25 = vmul.f32 %v2023_v23, %v2019_v18  ;;  %v1737_v18 = vld [vmem:[#allocation4] ss:$0 sm:$0xff] }
 0xa5a   : > { %v2025_v24 = vpop.eup %2024 }
 0xa5b   : > { %v1053_v26 = vmul.f32 %v2025_v24, %v2021_v20 }
 0xa5d   : > { %v1054_v28 = vpack.c.bf16 %v1053_v26, %v1052_v25 }
 0xa5f   : > { %1849 = vmatmul.mubr.msk.bf16.vlgmr.msra.gmra.mrb[8].mxu0 %vm689_vm3, %v1054_v28 }
 0xa60   : > { %1859 = vmatpush3.bf16.xpose.msra.mxu0 %v1161_v29  ;;  %1860 = vmatprep.mubr.msk.bf16.mxu0 %vm2241_vm1, %v2240_v15 }
 0xa61   : > { %1870 = vmatprep.subr.bf16.mxu0 %v2240_v15 }
 0xa67   : > { %1861 = vmatmul.mubr.msk.bf16.vlgmr.msra.gmra.mrb[12].mxu0 %vm641_vm2, %v1154_v30 }
 0xa68   : > { %1872 = vmatprep.mubr.msk.bf16.mxu0 %vm2241_vm1, %v2240_v15  ;;  %1871 = vmatpush3.bf16.msra.mxu0 %v1280_v57  ;;  %v1991_v57 = vld [vmem:[%s2737_s11 + $0x8] sm:$0xff]  }
 0xa69   : > { %1884 = vmatprep.subr.bf16.mxu0 %v2240_v15 }
 0xb32   : > { %v1095_v33 = vpop.f32.mrb[8].mxu0 }
 0xb33   : > { %v1850_v34 = vpop.f32.mrb[9].mxu0 }
 0xb34   : > { %v1098_v35 = vpop.f32.mrb[10].mxu0 }
 0xb35   : > { %v1103_v36 = vpack.c.bf16 %v1098_v35, %v1095_v33  ;;  %v1851_v37 = vpop.f32.mrb[11].mxu0  ;;  %v1988_v35 = vld [vmem:[%s2735_s9] sm:$0xff]  }
 0xb37   : > { %1855 = vmatmul.mubr.msk.bf16.vlgmr.msra.gmra.mrb[24].mxu1 %vm641_vm2, %v1103_v36  ;;  %v1989_v36 = vld [vmem:[%s2735_s9 + $0x8] sm:$0xff]  }
 0xb38   : > { %1866 = vmatprep.mubr.msk.bf16.mxu1 %vm2241_vm1, %v2240_v15 }
 0xb3a   : > { %v1197_v38 = vpop.f32.mrb[12].mxu0 }
 0xb3b   : > { %v1862_v39 = vpop.f32.mrb[13].mxu0  ;;  %v1204_v40 = vsel %vm689_vm3, %v1197_v38, -inf }
 0xb3c   : > { %1205 = vmax.xlane.f32.xlu1 %v1204_v40  ;;  %v1200_v41 = vpop.f32.mrb[14].mxu0 }
 0xb3d   : > { %v1863_v42 = vpop.f32.mrb[15].mxu0  ;;  %v1207_v45 = vsel %vm689_vm3, %v1200_v41, -inf }
 0xb3e   : > { %1208 = vmax.xlane.f32.xlu0 %v1207_v45 }
 0xbc9   : > { %v1206_v46 = vpop.xlane.xlu1 %1205 }
 0xbca   : > { %v1210_v47 = vsub.f32 %v1197_v38, %v1206_v46 }
 0xbcb   : > { %v1209_v48 = vpop.xlane.xlu0 %1208 }
 0xbcc   : > { %v1212_v49 = vmul.f32 1.442695, %v1210_v47  ;;  %v1211_v50 = vsub.f32 %v1200_v41, %v1209_v48  ;;  %v1738_v47 = vld [vmem:[#allocation6] ss:$0 sm:$0xff] }
 0xbce   : > { %2026 = vpow2.f32 %v1212_v49  ;;  %v1214_v51 = vmul.f32 1.442695, %v1211_v50 }
 0xbd0   : > { %2028 = vpow2.f32 %v1214_v51  ;;  %v1739_v51 = vld [vmem:[#allocation7] ss:$0 sm:$0xff] }
 0xbd8   : > { %v2027_v52 = vpop.eup %2026 }
 0xbd9   : > { %v1216_v53 = vsel %vm689_vm3, %v2027_v52, 0.0 }
 0xbda   : > { %v2029_v54 = vpop.eup %2028  ;;  %1217 = vadd.xlane.f32.xlu0 %v1216_v53 }
 0xbdb   : > { %v1219_v55 = vsel %vm689_vm3, %v2029_v54, 0.0 }
 0xbdc   : > { %1220 = vadd.xlane.f32.xlu1 %v1219_v55 }
 0xbf0   : > { %1227 = vrot.lane.b32.xlu0 %v2555_v43, %s2252_s23 }
 0xc0a   : > { %v1144_v58 = vpop.f32.mrb[24].mxu1 }
 0xc0b   : > { %v1151_v59 = vadd.f32 %v1144_v58, %v2614_v61  ;;  %v1856_v60 = vpop.f32.mrb[25].mxu1  ;;  %v1992_v58 = vld [vmem:[%s2737_s11 + $0x10] sm:$0xff]  }
 0xc0c   : > { %v1147_v62 = vpop.f32.mrb[26].mxu1  ;;  %v1994_v60 = vld [vmem:[%s2737_s11 + $0x20] sm:$0xff]  }
 0xc0d   : > { %v1152_v63 = vadd.f32 %v1147_v62, %v2616_v2  ;;  %v1857_v3 = vpop.f32.mrb[27].mxu1  ;;  %v1995_v62 = vld [vmem:[%s2737_s11 + $0x28] sm:$0xff]  }
 0xc0e   : > { %v1997_v3 = vld [vmem:[%s2737_s11 + $0x38] sm:$0xff]  }
 0xc67   : > { %v1218_v4 = vpop.xlane.xlu0 %1217 }
 0xc68   : > { %2030 = vrcp.f32 %v1218_v4  ;;  %v1740_v4 = vld [vmem:[#allocation9] ss:$0 sm:$0xff] }
 0xc69   : > { %v1221_v43 = vpop.xlane.xlu1 %1220 }
 0xc6a   : > { %2032 = vrcp.f32 %v1221_v43 }
 0xc6b   : > { %v1228_v5 = vpop.permute.xlu0 %1227 }
 0xc6c   : > { %1865 = vmatpush3.bf16.msra.mxu1 %v1228_v5 }
 0xc6d   : > { %1876 = vmatprep.subr.bf16.mxu1 %v2240_v15 }
 0xc72   : > { %v2031_v6 = vpop.eup %2030 }
 0xc73   : > { %v1224_v8 = vmul.f32 %v2031_v6, %v2027_v52 }
 0xc74   : > { %v2033_v7 = vpop.eup %2032 }
 0xc75   : > { %v1225_v9 = vmul.f32 %v2033_v7, %v2029_v54 }
 0xc77   : > { %v1226_v10 = vpack.c.bf16 %v1225_v9, %v1224_v8 }
 0xc79   : > { %1867 = vmatmul.mubr.msk.bf16.vlgmr.msra.gmra.mrb[28].mxu1 %vm689_vm3, %v1226_v10 }
 0xc7a   : > { %1880 = vmatprep.mubr.msk.bf16.mxu1 %vm2241_vm1, %v2240_v15  ;;  %1877 = vmatpush3.bf16.msra.mxu1 %v1988_v35 }
 0xc7b   : > { %1878 = vmatprep.subr.bf16.mxu1 %v2240_v15 }
 0xc7e   : > { %1879 = vmatpush3.bf16.msra.mxu1 %v1989_v36 }
 0xd4c   : > { %v1267_v61 = vpop.f32.mrb[28].mxu1 }
 0xd4d   : > { %v1868_v2 = vpop.f32.mrb[29].mxu1 }
 0xd4e   : > { %v1270_v11 = vpop.f32.mrb[30].mxu1 }
 0xd4f   : > { %v1275_v12 = vpack.c.bf16 %v1270_v11, %v1267_v61  ;;  %v1869_v13 = vpop.f32.mrb[31].mxu1 }
 0xd51   : > { %1873 = vmatmul.mubr.msk.bf16.vlgmr.msra.gmra.mrb[16].mxu0 %vm641_vm2, %v1275_v12 }
 0xd52   : > { %1900 = vmatprep.mubr.msk.bf16.mxu0 %vm2241_vm1, %v2240_v15  ;;  %1885 = vmatpush3.bf16.msra.mxu0 %v1990_v56 }
 0xd53   : > { %1886 = vmatprep.subr.bf16.mxu0 %v2240_v15 }
 0xd56   : > { %1887 = vmatpush3.bf16.msra.mxu0 %v1991_v57 }
 0xd57   : > { %1888 = vmatprep.subr.bf16.mxu0 %v2240_v15 }
 0xd5a   : > { %1889 = vmatpush3.bf16.msra.mxu0 %v1992_v58 }
 0xd5b   : > { %1890 = vmatprep.subr.bf16.mxu0 %v2240_v15 }
 0xe24   : > { %v1316_v14 = vpop.f32.mrb[16].mxu0 }
 0xe25   : > { %v1323_v16 = vadd.f32 %v1316_v14, %v1151_v59  ;;  %v1874_v17 = vpop.f32.mrb[17].mxu0  ;;  %v1993_v59 = vld [vmem:[%s2737_s11 + $0x18] sm:$0xff]  }
 0xe26   : > { %v1319_v19 = vpop.f32.mrb[18].mxu0  ;;  %1891 = vmatpush3.bf16.msra.mxu0 %v1993_v59 }
 0xe27   : > { %v1325_v20 = vadd.f32 %v1323_v16, %v2520_v0  ;;  %v1324_v21 = vadd.f32 %v1319_v19, %v1152_v63  ;;  %v1875_v44 = vpop.f32.mrb[19].mxu0  ;;  %1892 = vmatprep.subr.bf16.mxu0 %v2240_v15  ;;  %v1996_v63 = vld [vmem:[%s2737_s11 + $0x30] sm:$0xff]  }
 0xe29   : > { %v2662_v22 = vadd.f32 %v1737_v18, %v1325_v20  ;;  %v1326_v23 = vadd.f32 %v1324_v21, %v2522_v1 }
 0xe2a   : > { %1893 = vmatpush3.bf16.msra.mxu0 %v1994_v60 }
 0xe2b   : > { %v2665_v24 = vadd.f32 %v1737_v18, %v1326_v23  ;;  %v1338_v25 = vsel %vm522_vm0, %v2662_v22, 0.0  ;;  %1894 = vmatprep.subr.bf16.mxu0 %v2240_v15 }
 0xe2c   : > { %1339 = vadd.xlane.f32.xlu1 %v1338_v25 }
 0xe2d   : > { %v1341_v26 = vsel %vm522_vm0, %v2665_v24, 0.0 }
 0xe2e   : > { %1895 = vmatpush3.bf16.msra.mxu0 %v1995_v62 }
 0xe2f   : > { %1896 = vmatprep.subr.bf16.mxu0 %v2240_v15 }
 0xe30   : > { %1342 = vadd.xlane.f32.xlu1 %v1341_v26 }
 0xe32   : > { %1897 = vmatpush3.bf16.msra.mxu0 %v1996_v63 }
 0xe33   : > { %1898 = vmatprep.subr.bf16.mxu0 %v2240_v15 }
 0xe36   : > { %1899 = vmatpush3.bf16.msra.mxu0 %v1997_v3 }
 0xeb9   : > { %v1340_v27 = vpop.xlane.xlu1 %1339 }
 0xeba   : > { %v1344_v28 = vmul.f32 0.03125, %v1340_v27 }
 0xebc   : > { %v1346_v0 = vsub.f32 %v2662_v22, %v1344_v28  ;;  %v1744_v28 = vld [vmem:[#allocation10] ss:$0 sm:$0xff] }
 0xebd   : > { %v1343_v29 = vpop.xlane.xlu1 %1342 }
 0xebe   : > { %v1345_v30 = vmul.f32 0.03125, %v1343_v29  ;;  %v1348_v31 = vmul.f32 %v1346_v0, %v1346_v0 }
 0xec0   : > { %v1347_v32 = vsub.f32 %v2665_v24, %v1345_v30  ;;  %v1350_v1 = vsel %vm522_vm0, %v1348_v31, 0.0 }
 0xec1   : > { %1351 = vadd.xlane.f32.xlu1 %v1350_v1 }
 0xec2   : > { %v1349_v33 = vmul.f32 %v1347_v32, %v1347_v32 }
 0xec4   : > { %v1353_v34 = vsel %vm522_vm0, %v1349_v33, 0.0 }
 0xec5   : > { %1354 = vadd.xlane.f32.xlu1 %v1353_v34 }
 0xf4e   : > { %v1352_v37 = vpop.xlane.xlu1 %1351 }
 0xf4f   : > { %v1356_v38 = vmul.f32 0.03125, %v1352_v37 }
 0xf51   : > { %v1358_v39 = vadd.f32 1e-05, %v1356_v38 }
 0xf52   : > { %v1355_v40 = vpop.xlane.xlu1 %1354 }
 0xf53   : > { %2034 = vrsqrt.f32 %v1358_v39  ;;  %v1357_v41 = vmul.f32 0.03125, %v1355_v40 }
 0xf55   : > { %v1359_v42 = vadd.f32 1e-05, %v1357_v41 }
 0xf57   : > { %2036 = vrsqrt.f32 %v1359_v42 }
 0xf5d   : > { %v2035_v45 = vpop.eup %2034 }
 0xf5e   : > { %v1362_v46 = vmul.f32 %v2035_v45, %v1346_v0 }
 0xf60   : > { %v1370_v49 = vmul.f32 %v1738_v47, %v1362_v46 }
 0xf61   : > { %v2037_v48 = vpop.eup %2036 }
 0xf62   : > { %v1363_v50 = vmul.f32 %v2037_v48, %v1347_v32  ;;  %v1378_v53 = vadd.f32 %v1739_v51, %v1370_v49 }
 0xf64   : > { %v1371_v52 = vmul.f32 %v1738_v47, %v1363_v50 }
 0xf66   : > { %v1379_v54 = vadd.f32 %v1739_v51, %v1371_v52 }
 0xf68   : > { %v1380_v55 = vpack.c.bf16 %v1379_v54, %v1378_v53 }
 0xf6a   : > { %1881 = vmatmul.mubr.msk.bf16.vlgmr.msra.gmra.mrb[32].mxu1 %vm522_vm0, %v1380_v55 }
0x103d   : > { %v1441_v43 = vpop.f32.mrb[32].mxu1 }
0x103e   : > { %v1442_v5 = vadd.f32 %v1740_v4, %v1441_v43  ;;  %v1882_v6 = vpop.f32.mrb[33].mxu1 }
0x103f   : > { %v1444_v7 = vpop.f32.mrb[34].mxu1 }
0x1040   : > { %v1448_v8 = vmul.f32 %v1442_v5, %v1442_v5  ;;  %v1445_v9 = vadd.f32 %v1740_v4, %v1444_v7  ;;  %v1883_v10 = vpop.f32.mrb[35].mxu1 }
0x1042   : > { %v1450_v61 = vmul.f32 %v1448_v8, %v1442_v5  ;;  %v1449_v2 = vmul.f32 %v1445_v9, %v1445_v9 }
0x1044   : > { %v1452_v11 = vmul.f32 0.044715, %v1450_v61  ;;  %v1451_v12 = vmul.f32 %v1449_v2, %v1445_v9 }
0x1046   : > { %v1454_v13 = vadd.f32 %v1452_v11, %v1442_v5  ;;  %v1453_v14 = vmul.f32 0.044715, %v1451_v12 }
0x1048   : > { %v1456_v15 = vmul.f32 0.7978846, %v1454_v13  ;;  %v1455_v16 = vadd.f32 %v1453_v14, %v1445_v9 }
0x104a   : > { %2038 = vtanh.f32 %v1456_v15  ;;  %v1457_v17 = vmul.f32 0.7978846, %v1455_v16 }
0x104c   : > { %2040 = vtanh.f32 %v1457_v17 }
0x1054   : > { %v2039_v18 = vpop.eup %2038 }
0x1055   : > { %v1460_v19 = vadd.f32 1.0, %v2039_v18 }
0x1056   : > { %v2041_v20 = vpop.eup %2040 }
0x1057   : > { %v1462_v21 = vmul.f32 0.5, %v1460_v19  ;;  %v1461_v44 = vadd.f32 1.0, %v2041_v20 }
0x1059   : > { %v1463_v23 = vmul.f32 0.5, %v1461_v44  ;;  %v1464_v25 = vmul.f32 %v1462_v21, %v1442_v5 }
0x105b   : > { %v1465_v26 = vmul.f32 %v1463_v23, %v1445_v9 }
0x105d   : > { %v1466_v27 = vpack.c.bf16 %v1465_v26, %v1464_v25 }
0x105f   : > { %1901 = vmatmul.mubr.bf16.vlgmr.msra.gmra.mrb[20].mxu0 %v1466_v27 }
0x1132   : > { %v1572_v0 = vpop.f32.mrb[20].mxu0 }
0x1133   : > { %v1573_v29 = vadd.f32 %v1744_v28, %v1572_v0  ;;  %v1902_v30 = vpop.f32.mrb[21].mxu0 }
0x1134   : > { %v1575_v31 = vpop.f32.mrb[22].mxu0 }
0x1135   : > { %v1579_v32 = vadd.f32 %v1573_v29, %v2662_v22  ;;  %v1576_v1 = vadd.f32 %v1744_v28, %v1575_v31  ;;  %v1903_v33 = vpop.f32.mrb[23].mxu0 }
0x1137   : > { %1581 = vst.msk [vmem:[%s516_s27] sm:$0xff] %vm522_vm0, %v1579_v32  ;;  %v1580_v34 = vadd.f32 %v1576_v1, %v2665_v24 }
0x1139   : > { %1582 = vst.msk [vmem:[%s516_s27 + $0x8] sm:$0xff] %vm522_vm0, %v1580_v34 }
0x113a PF: > { %s2756_s16 = sld [smem:[#allocation16_spill]] }
0x1140   : > { %s27_s25 = sadd.s32 1, %s2756_s16  }
0x1141   : > { %p24_p11 = scmp.ge.s32.totalorder %s27_s25, 4  }
0x1143   :  { %26 = sbr.rel (!%p24_p11) target bundleno = 4 (0x4), region = 127 }
0x114a   :  { %1604 = vsyncpa [#allocation3], 1 }
0x114b   :  { %1606 = vsyncpa [#allocation3 + $0x1], 1 }
0x114c   :  { %1607 = vsyncpa [#allocation5], 1 }
0x114d   :  { %1608 = vsyncpa [#allocation8], 1 }
0x114e   :  { %1609 = vsyncpa [#allocation11], 1 }

// kernel: encoder_forward.9
= control target key start
LH: loop header
LB: loop body
LE: loop exit
PB: predicated region body
PF: predicated region fallthrough
CT: control target
= control target key end

     0   :  { %s1924_s25 = smov 0   ;;  %s2164_s0 = inlined_call_operand.vmem [shape: f32[2,16,32], index: 0, kind: input, shape index: {}]   ;;  %s2165_s1 = inlined_call_operand.vmem [shape: f32[1,32], index: 1, kind: input, shape index: {}]   ;;  %s2166_s2 = inlined_call_operand.vmem [shape: f32[1,32], index: 2, kind: input, shape index: {}]   ;;  %s2167_s3 = inlined_call_operand.vmem [shape: bf16[32,96], index: 3, kind: input, shape index: {}]   ;;  %s2168_s4 = inlined_call_operand.vmem [shape: f32[1,96], index: 4, kind: input, shape index: {}]   ;;  %s2169_s5 = inlined_call_operand.vmem [shape: bf16[32,32], index: 5, kind: input, shape index: {}]   ;;  %s2170_s6 = inlined_call_operand.vmem [shape: f32[1,32], index: 6, kind: input, shape index: {}]   ;;  %s2171_s7 = inlined_call_operand.vmem [shape: f32[1,32], index: 7, kind: input, shape index: {}]   ;;  %s2172_s8 = inlined_call_operand.vmem [shape: f32[1,32], index: 8, kind: input, shape index: {}]   ;;  %s2173_s9 = inlined_call_operand.vmem [shape: bf16[32,128], index: 9, kind: input, shape index: {}]   ;;  %s2174_s10 = inlined_call_operand.vmem [shape: f32[1,128], index: 10, kind: input, shape index: {}]   ;;  %s2175_s11 = inlined_call_operand.vmem [shape: bf16[128,32], index: 11, kind: input, shape index: {}]   ;;  %s2176_s12 = inlined_call_operand.vmem [shape: f32[1,32], index: 12, kind: input, shape index: {}]   ;;  %s2177_s13 = inlined_call_operand.vmem [shape: f32[2,16,32], index: 13, kind: output, shape index: {}]  }
   0x1 LB: > { %s1562_s26 = sadd.s32 4294967295, %s1839_s25   ;;  %p1566_p0 = scmp.ge.s32.totalorder %s1839_s25, 1  ;;  %s1839_s25 = sphi %s1924_s25, %s23_s25  }
   0x2   : > { %p387_p1 = scmp.lt.s32.totalorder %s1839_s25, 3 }
   0x4   : > { %p388_p2 = pnand %p1566_p0, %p387_p1 }
   0x5   : > { %p431_p3 = scmp.lt.s32.totalorder (!%p388_p2), %s1562_s26, 1  ;;  %vm446_vm0 = vcmask (!%p388_p2), 261120   ;;  %v1777_v14 = vld [vmem:[%s2167_s3] sm:$0xff] (!%p388_p2)   ;;  %v1841_v15 = vmov (!%p388_p2), 0.0   ;;  %v1778_v16 = vld [vmem:[%s2167_s3 + $0x8] sm:$0xff] (!%p388_p2)   ;;  %vm1842_vm1 = vmmov (!%p388_p2), 0  }
   0x6   : > { %391 = sbr.rel (%p388_p2) target bundleno = 4260 (0x10a4), region = 72  ;;  %1648 = vmatprep.subr.bf16.mxu1 (!%p388_p2), %v1841_v15  ;;  %1674 = vmatprep.subr.bf16.mxu0 (!%p388_p2), %v1841_v15  ;;  %v1571_v25 = vld [vmem:[%s2165_s1] ss:$0 sm:$0xff] (!%p388_p2)  ;;  %s1843_s24 = smov (!%p388_p2), 96   ;;  %vm565_vm2 = vcmask (!%p388_p2), 64512   ;;  %vm613_vm3 = vcmask (!%p388_p2), 130048  }
   0x7   : > { %1649 = vmatpush3.bf16.msra.mxu1 (!%p388_p2), %v1777_v14  ;;  %1652 = vmatprep.mubr.msk.bf16.mxu1 (!%p388_p2), %vm1842_vm1, %v1841_v15  ;;  %v1572_v29 = vld [vmem:[%s2166_s2] ss:$0 sm:$0xff] (!%p388_p2)  ;;  %s1844_s28 = smov (!%p388_p2), 88   ;;  %s1845_s29 = smov (!%p388_p2), 120   ;;  %vm813_vm4 = vcmask (!%p388_p2), 1043456  }
   0x8   : > { %1650 = vmatprep.subr.bf16.mxu1 (!%p388_p2), %v1841_v15  ;;  %1676 = vmatprep.mubr.msk.bf16.mxu0 (!%p388_p2), %vm1842_vm1, %v1841_v15  ;;  %v1573_v34 = vld [vmem:[%s2168_s4] ss:$0 sm:$0xff] (!%p388_p2)  ;;  %s1847_s14 = smov (!%p388_p2), 80   ;;  %s1848_s15 = smov (!%p388_p2), 112  }
   0x9   : > { %s1849_s16 = smov (!%p388_p2), 56   ;;  %s1850_s21 = smov (!%p388_p2), 48  }
   0xa   : > { %s1851_s22 = smov (!%p388_p2), 104   ;;  %s1852_s23 = smov (!%p388_p2), 72  }
   0xb   : > { %1651 = vmatpush3.bf16.msra.mxu1 (!%p388_p2), %v1778_v16 }
   0xc   : > { %1656 = vmatprep.subr.bf16.mxu1 (!%p388_p2), %v1841_v15 }
   0xd   : > { %s2179_s26 = smov (!%p431_p3, %s1562_s26), 1 }
   0xe   : > { %s1607_s27 = sshll.u32 %s2179_s26, 4 }
   0xf   : > { %s435_s30 = scalar_lea.vmem %s2164_s0, %s1607_s27  ;;  %s440_s19 = scalar_lea.vmem %s2177_s13, %s1607_s27 }
  0x10   : > { %v1940_v0 = vld [vmem:[%s435_s30] sm:$0xff]  ;;  %v1942_v1 = vld [vmem:[%s435_s30 + $0x8] sm:$0xff]  ;;  %s1846_s30 = smov 64  }
  0x11   : > { %v447_v2 = vsel %vm446_vm0, %v1940_v0, 0.0  ;;  %v450_v3 = vsel %vm446_vm0, %v1942_v1, 0.0 }
  0x12   : > { %448 = vadd.xlane.f32.xlu0 %v447_v2 }
  0x16   : > { %451 = vadd.xlane.f32.xlu0 %v450_v3 }
  0x9f   : > { %v449_v4 = vpop.xlane.xlu0 %448 }
  0xa0   : > { %v454_v5 = vmul.f32 0.03125, %v449_v4 }
  0xa2   : > { %v456_v6 = vsub.f32 %v1940_v0, %v454_v5 }
  0xa3   : > { %v452_v7 = vpop.xlane.xlu0 %451 }
  0xa4   : > { %v455_v8 = vmul.f32 0.03125, %v452_v7  ;;  %v458_v9 = vmul.f32 %v456_v6, %v456_v6 }
  0xa6   : > { %v457_v10 = vsub.f32 %v1942_v1, %v455_v8  ;;  %v460_v11 = vsel %vm446_vm0, %v458_v9, 0.0 }
  0xa7   : > { %461 = vadd.xlane.f32.xlu1 %v460_v11 }
  0xa8   : > { %v459_v12 = vmul.f32 %v457_v10, %v457_v10 }
  0xaa   : > { %v463_v13 = vsel %vm446_vm0, %v459_v12, 0.0 }
  0xab   : > { %464 = vadd.xlane.f32.xlu1 %v463_v13 }
 0x134   : > { %v462_v17 = vpop.xlane.xlu1 %461 }
 0x135   : > { %v466_v18 = vmul.f32 0.03125, %v462_v17 }
 0x137   : > { %v468_v19 = vadd.f32 1e-05, %v466_v18 }
 0x138   : > { %v465_v20 = vpop.xlane.xlu1 %464 }
 0x139   : > { %1789 = vrsqrt.f32 %v468_v19  ;;  %v467_v21 = vmul.f32 0.03125, %v465_v20 }
 0x13b   : > { %v469_v22 = vadd.f32 1e-05, %v467_v21 }
 0x13d   : > { %1791 = vrsqrt.f32 %v469_v22 }
 0x143   : > { %v1790_v23 = vpop.eup %1789 }
 0x144   : > { %v472_v24 = vmul.f32 %v1790_v23, %v456_v6 }
 0x146   : > { %v480_v28 = vmul.f32 %v1571_v25, %v472_v24 }
 0x147   : > { %v1792_v26 = vpop.eup %1791 }
 0x148   : > { %v473_v27 = vmul.f32 %v1792_v26, %v457_v10  ;;  %v488_v31 = vadd.f32 %v1572_v29, %v480_v28 }
 0x14a   : > { %v481_v30 = vmul.f32 %v1571_v25, %v473_v27 }
 0x14c   : > { %v489_v32 = vadd.f32 %v1572_v29, %v481_v30 }
 0x14e   : > { %v490_v33 = vpack.c.bf16 %v489_v32, %v488_v31 }
 0x150   : > { %1653 = vmatmul.mubr.msk.bf16.vlgmr.msra.gmra.mrb[0].mxu1 %vm446_vm0, %v490_v33 }
 0x151   : > { %1658 = vmatprep.mubr.msk.bf16.mxu1 %vm1842_vm1, %v1841_v15 }
 0x223   : > { %v551_v35 = vpop.f32.mrb[0].mxu1 }
 0x224   : > { %v552_v36 = vadd.f32 %v1573_v34, %v551_v35  ;;  %v1654_v37 = vpop.f32.mrb[1].mxu1 }
 0x225   : > { %v554_v38 = vpop.f32.mrb[2].mxu1 }
 0x226   : > { %v555_v39 = vadd.f32 %v1573_v34, %v554_v38  ;;  %v1655_v40 = vpop.f32.mrb[3].mxu1  ;;  %v558_v41 = vmul.f32 0.35355338, %v552_v36  ;;  %v808_v34 = vld [vmem:[%s2169_s5 + $0x4] sm:$0xf] }
 0x227   : > { %v815_v35 = vsel %vm813_vm4, %v808_v34, 0 }
 0x228   : > { %v559_v42 = vmul.f32 0.35355338, %v555_v39  ;;  %v1978_v43 = vpack.c.bf16 %v555_v39, %v552_v36 }
 0x22a   : > { %v1980_v44 = vpack.c.bf16 %v559_v42, %v558_v41  ;;  %563 = vrot.lane.b32.xlu0 %v1978_v43, %s1843_s24  ;;  %v684_v41 = vld [vmem:[%s2169_s5] sm:$0xf] }
 0x22e   : > { %689 = vrot.lane.b32.xlu0 %v1978_v43, %s1844_s28 }
 0x232   : > { %687 = vrot.lane.b32.xlu0 %v1980_v44, %s1845_s29  ;;  %s1853_s29 = smov 40  }
 0x29c   : > { %v564_v45 = vpop.permute.xlu0 %563 }
 0x29d   : > { %v570_v46 = vsel %vm565_vm2, %v564_v45, 0 }
 0x29e   : > { %1657 = vmatpush3.bf16.xpose.msra.mxu1 %v570_v46 }
 0x29f   : > { %1662 = vmatprep.subr.bf16.mxu1 %v1841_v15 }
 0x2a0   : > { %v690_v8 = vpop.permute.xlu0 %689 }
 0x2a1   : > { %v695_v10 = vsel %vm565_vm2, %v690_v8, 0 }
 0x2a4   : > { %v688_v11 = vpop.permute.xlu0 %687 }
 0x2a5   : > { %1659 = vmatmul.mubr.msk.bf16.vlgmr.msra.gmra.mrb[4].mxu1 %vm565_vm2, %v1980_v44 }
 0x2a6   : > { %1664 = vmatprep.mubr.msk.bf16.mxu1 %vm1842_vm1, %v1841_v15 }
 0x378   : > { %v606_v47 = vpop.f32.mrb[4].mxu1 }
 0x379   : > { %v1660_v48 = vpop.f32.mrb[5].mxu1  ;;  %v614_v49 = vsel %vm613_vm3, %v606_v47, -inf }
 0x37a   : > { %615 = vmax.xlane.f32.xlu1 %v614_v49  ;;  %v609_v50 = vpop.f32.mrb[6].mxu1 }
 0x37b   : > { %v1661_v51 = vpop.f32.mrb[7].mxu1  ;;  %v617_v52 = vsel %vm613_vm3, %v609_v50, -inf }
 0x37e   : > { %618 = vmax.xlane.f32.xlu1 %v617_v52 }
 0x407   : > { %v616_v53 = vpop.xlane.xlu1 %615 }
 0x408   : > { %v620_v54 = vsub.f32 %v606_v47, %v616_v53  ;;  %v862_v47 = vsel %vm813_vm4, %v684_v41, 0 }
 0x40a   : > { %v622_v55 = vmul.f32 1.442695, %v620_v54 }
 0x40b   : > { %v619_v56 = vpop.xlane.xlu1 %618 }
 0x40c   : > { %1793 = vpow2.f32 %v622_v55  ;;  %v621_v57 = vsub.f32 %v609_v50, %v619_v56 }
 0x40e   : > { %v624_v58 = vmul.f32 1.442695, %v621_v57 }
 0x410   : > { %1795 = vpow2.f32 %v624_v58 }
 0x416   : > { %v1794_v59 = vpop.eup %1793 }
 0x417   : > { %v626_v60 = vsel %vm613_vm3, %v1794_v59, 0.0 }
 0x418   : > { %627 = vadd.xlane.f32.xlu1 %v626_v60 }
 0x41a   : > { %v1796_v61 = vpop.eup %1795 }
 0x41b   : > { %v629_v62 = vsel %vm613_vm3, %v1796_v61, 0.0 }
 0x41c   : > { %630 = vadd.xlane.f32.xlu1 %v629_v62 }
 0x42d   : > { %637 = vrot.lane.b32.xlu1 %v1978_v43, %s1846_s30 }
 0x4a5   : > { %v628_v63 = vpop.xlane.xlu1 %627 }
 0x4a6   : > { %1797 = vrcp.f32 %v628_v63 }
 0x4a9   : > { %v631_v2 = vpop.xlane.xlu1 %630 }
 0x4aa   : > { %1799 = vrcp.f32 %v631_v2 }
 0x4ad   : > { %v638_v3 = vpop.permute.xlu1 %637 }
 0x4ae   : > { %1663 = vmatpush3.bf16.msra.mxu1 %v638_v3 }
 0x4af   : > { %1668 = vmatprep.subr.bf16.mxu1 %v1841_v15 }
 0x4b0   : > { %v1798_v4 = vpop.eup %1797 }
 0x4b1   : > { %v634_v6 = vmul.f32 %v1798_v4, %v1794_v59 }
 0x4b4   : > { %v1800_v5 = vpop.eup %1799 }
 0x4b5   : > { %v635_v7 = vmul.f32 %v1800_v5, %v1796_v61 }
 0x4b7   : > { %v636_v9 = vpack.c.bf16 %v635_v7, %v634_v6 }
 0x4b9   : > { %1665 = vmatmul.mubr.msk.bf16.vlgmr.msra.gmra.mrb[8].mxu1 %vm613_vm3, %v636_v9 }
 0x4ba   : > { %1669 = vmatpush3.bf16.xpose.msra.mxu1 %v695_v10  ;;  %1670 = vmatprep.mubr.msk.bf16.mxu1 %vm1842_vm1, %v1841_v15 }
 0x4bb   : > { %1680 = vmatprep.subr.bf16.mxu1 %v1841_v15 }
 0x4c1   : > { %1671 = vmatmul.mubr.msk.bf16.vlgmr.msra.gmra.mrb[12].mxu1 %vm565_vm2, %v688_v11 }
 0x4c2   : > { %1682 = vmatprep.mubr.msk.bf16.mxu1 %vm1842_vm1, %v1841_v15  ;;  %1681 = vmatpush3.bf16.msra.mxu1 %v815_v35 }
 0x4c3   : > { %1692 = vmatprep.subr.bf16.mxu1 %v1841_v15 }
 0x58c   : > { %v677_v12 = vpop.f32.mrb[8].mxu1 }
 0x58d   : > { %v1666_v13 = vpop.f32.mrb[9].mxu1 }
 0x58e   : > { %v680_v14 = vpop.f32.mrb[10].mxu1 }
 0x58f   : > { %v685_v16 = vpack.c.bf16 %v680_v14, %v677_v12  ;;  %v1667_v17 = vpop.f32.mrb[11].mxu1 }
 0x594   : > { %v731_v18 = vpop.f32.mrb[12].mxu1 }
 0x595   : > { %v1672_v19 = vpop.f32.mrb[13].mxu1  ;;  %v738_v20 = vsel %vm613_vm3, %v731_v18, -inf }
 0x596   : > { %739 = vmax.xlane.f32.xlu0 %v738_v20  ;;  %v734_v21 = vpop.f32.mrb[14].mxu1 }
 0x597   : > { %v1673_v22 = vpop.f32.mrb[15].mxu1  ;;  %v741_v23 = vsel %vm613_vm3, %v734_v21, -inf }
 0x598   : > { %742 = vmax.xlane.f32.xlu1 %v741_v23 }
 0x5a9   : > { %907 = vrot.lane.b32.xlu1 %v1978_v43, %s1847_s14 }
 0x5ad   : > { %905 = vrot.lane.b32.xlu1 %v1980_v44, %s1848_s15 }
 0x623   : > { %v740_v24 = vpop.xlane.xlu0 %739 }
 0x624   : > { %v744_v25 = vsub.f32 %v731_v18, %v740_v24 }
 0x625   : > { %v743_v26 = vpop.xlane.xlu1 %742 }
 0x626   : > { %v746_v27 = vmul.f32 1.442695, %v744_v25  ;;  %v745_v28 = vsub.f32 %v734_v21, %v743_v26 }
 0x628   : > { %1801 = vpow2.f32 %v746_v27  ;;  %v748_v29 = vmul.f32 1.442695, %v745_v28 }
 0x629   : > { %v908_v50 = vpop.permute.xlu1 %907 }
 0x62a   : > { %1803 = vpow2.f32 %v748_v29  ;;  %v913_v54 = vsel %vm565_vm2, %v908_v50, 0 }
 0x62d   : > { %v906_v59 = vpop.permute.xlu1 %905 }
 0x632   : > { %v1802_v30 = vpop.eup %1801 }
 0x633   : > { %v750_v31 = vsel %vm613_vm3, %v1802_v30, 0.0 }
 0x634   : > { %v1804_v32 = vpop.eup %1803  ;;  %751 = vadd.xlane.f32.xlu0 %v750_v31  ;;  %v1026_v31 = vld [vmem:[%s2169_s5 + $0x8] sm:$0xf] }
 0x635   : > { %v753_v33 = vsel %vm613_vm3, %v1804_v32, 0.0 }
 0x638   : > { %754 = vadd.xlane.f32.xlu0 %v753_v33 }
 0x64e   : > { %761 = vrot.lane.b32.xlu0 %v1978_v43, %s1849_s16 }
 0x6c1   : > { %v752_v36 = vpop.xlane.xlu0 %751 }
 0x6c2   : > { %1805 = vrcp.f32 %v752_v36 }
 0x6c5   : > { %v755_v37 = vpop.xlane.xlu0 %754 }
 0x6c6   : > { %1807 = vrcp.f32 %v755_v37 }
 0x6c9   : > { %v762_v38 = vpop.permute.xlu0 %761 }
 0x6ca   : > { %1675 = vmatpush3.bf16.msra.mxu0 %v762_v38 }
 0x6cb   : > { %1686 = vmatprep.subr.bf16.mxu0 %v1841_v15 }
 0x6cc   : > { %v1806_v39 = vpop.eup %1805 }
 0x6cd   : > { %v758_v42 = vmul.f32 %v1806_v39, %v1802_v30 }
 0x6d0   : > { %v1808_v40 = vpop.eup %1807 }
 0x6d1   : > { %v759_v45 = vmul.f32 %v1808_v40, %v1804_v32  ;;  %v1032_v32 = vsel %vm813_vm4, %v1026_v31, 0 }
 0x6d3   : > { %v760_v46 = vpack.c.bf16 %v759_v45, %v758_v42 }
 0x6d5   : > { %1677 = vmatmul.mubr.msk.bf16.vlgmr.msra.gmra.mrb[0].mxu0 %vm613_vm3, %v760_v46 }
 0x6d6   : > { %1687 = vmatpush3.bf16.msra.mxu0 %v862_v47  ;;  %1688 = vmatprep.mubr.msk.bf16.mxu0 %vm1842_vm1, %v1841_v15 }
 0x6d7   : > { %1698 = vmatprep.subr.bf16.mxu0 %v1841_v15 }
 0x6dd   : > { %1689 = vmatmul.mubr.msk.bf16.vlgmr.msra.gmra.mrb[4].mxu0 %vm565_vm2, %v685_v16 }
 0x6de   : > { %1700 = vmatprep.mubr.msk.bf16.mxu0 %vm1842_vm1, %v1841_v15 }
 0x7a8   : > { %v801_v48 = vpop.f32.mrb[0].mxu0 }
 0x7a9   : > { %v1678_v49 = vpop.f32.mrb[1].mxu0 }
 0x7aa   : > { %v804_v51 = vpop.f32.mrb[2].mxu0 }
 0x7ab   : > { %v809_v52 = vpack.c.bf16 %v804_v51, %v801_v48  ;;  %v1679_v53 = vpop.f32.mrb[3].mxu0 }
 0x7ad   : > { %1683 = vmatmul.mubr.msk.bf16.vlgmr.msra.gmra.mrb[16].mxu1 %vm565_vm2, %v809_v52 }
 0x7ae   : > { %1693 = vmatpush3.bf16.xpose.msra.mxu1 %v913_v54  ;;  %1694 = vmatprep.mubr.msk.bf16.mxu1 %vm1842_vm1, %v1841_v15 }
 0x7af   : > { %1704 = vmatprep.subr.bf16.mxu1 %v1841_v15 }
 0x7b0   : > { %v898_v55 = vpop.f32.mrb[4].mxu0 }
 0x7b1   : > { %v1690_v56 = vpop.f32.mrb[5].mxu0 }
 0x7b2   : > { %v901_v57 = vpop.f32.mrb[6].mxu0  ;;  %v1198_v56 = vld [vmem:[%s2169_s5 + $0xc] sm:$0xf] }
 0x7b3   : > { %v1691_v58 = vpop.f32.mrb[7].mxu0 }
 0x7b5   : > { %1695 = vmatmul.mubr.msk.bf16.vlgmr.msra.gmra.mrb[20].mxu1 %vm565_vm2, %v906_v59 }
 0x7b6   : > { %1706 = vmatprep.mubr.msk.bf16.mxu1 %vm1842_vm1, %v1841_v15  ;;  %1705 = vmatpush3.bf16.msra.mxu1 %v1032_v32 }
 0x7b7   : > { %1716 = vmatprep.subr.bf16.mxu1 %v1841_v15 }
 0x880   : > { %v851_v60 = vpop.f32.mrb[16].mxu1 }
 0x881   : > { %v2037_v61 = vadd.f32 %v898_v55, %v851_v60  ;;  %v1684_v62 = vpop.f32.mrb[17].mxu1 }
 0x882   : > { %v854_v63 = vpop.f32.mrb[18].mxu1 }
 0x883   : > { %v2039_v2 = vadd.f32 %v901_v57, %v854_v63  ;;  %v1685_v3 = vpop.f32.mrb[19].mxu1  ;;  %v1204_v57 = vsel %vm813_vm4, %v1198_v56, 0  ;;  %v1781_v56 = vld [vmem:[%s2175_s11] sm:$0xff]  }
 0x888   : > { %v949_v4 = vpop.f32.mrb[20].mxu1 }
 0x889   : > { %v1696_v5 = vpop.f32.mrb[21].mxu1  ;;  %v956_v6 = vsel %vm613_vm3, %v949_v4, -inf }
 0x88a   : > { %957 = vmax.xlane.f32.xlu1 %v956_v6  ;;  %v952_v7 = vpop.f32.mrb[22].mxu1 }
 0x88b   : > { %v1697_v8 = vpop.f32.mrb[23].mxu1  ;;  %v959_v9 = vsel %vm613_vm3, %v952_v7, -inf }
 0x88c   : > { %960 = vmax.xlane.f32.xlu0 %v959_v9 }
 0x89b   : > { %979 = vrot.lane.b32.xlu1 %v1978_v43, %s1850_s21 }
 0x89f   : > { %1077 = vrot.lane.b32.xlu1 %v1980_v44, %s1851_s22 }
 0x917   : > { %v958_v10 = vpop.xlane.xlu1 %957 }
 0x918   : > { %v962_v11 = vsub.f32 %v949_v4, %v958_v10 }
 0x919   : > { %v961_v12 = vpop.xlane.xlu0 %960 }
 0x91a   : > { %v964_v13 = vmul.f32 1.442695, %v962_v11  ;;  %v963_v14 = vsub.f32 %v952_v7, %v961_v12 }
 0x91b   : > { %v980_v16 = vpop.permute.xlu1 %979 }
 0x91c   : > { %1809 = vpow2.f32 %v964_v13  ;;  %v966_v17 = vmul.f32 1.442695, %v963_v14  ;;  %1699 = vmatpush3.bf16.msra.mxu0 %v980_v16 }
 0x91d   : > { %1710 = vmatprep.subr.bf16.mxu0 %v1841_v15 }
 0x91e   : > { %1811 = vpow2.f32 %v966_v17 }
 0x91f   : > { %v1078_v30 = vpop.permute.xlu1 %1077 }
 0x926   : > { %v1810_v18 = vpop.eup %1809 }
 0x927   : > { %v968_v19 = vsel %vm613_vm3, %v1810_v18, 0.0 }
 0x928   : > { %v1812_v20 = vpop.eup %1811  ;;  %969 = vadd.xlane.f32.xlu0 %v968_v19 }
 0x929   : > { %v971_v21 = vsel %vm613_vm3, %v1812_v20, 0.0 }
 0x92c   : > { %972 = vadd.xlane.f32.xlu0 %v971_v21 }
 0x942   : > { %1079 = vrot.lane.b32.xlu0 %v1978_v43, %s1852_s23 }
 0x9b5   : > { %v970_v44 = vpop.xlane.xlu0 %969 }
 0x9b6   : > { %1813 = vrcp.f32 %v970_v44 }
 0x9b9   : > { %v973_v22 = vpop.xlane.xlu0 %972 }
 0x9ba   : > { %1815 = vrcp.f32 %v973_v22 }
 0x9bd   : > { %v1080_v27 = vpop.permute.xlu0 %1079 }
 0x9be   : > { %v1085_v29 = vsel %vm565_vm2, %v1080_v27, 0 }
 0x9c0   : > { %v1814_v23 = vpop.eup %1813 }
 0x9c1   : > { %v976_v25 = vmul.f32 %v1814_v23, %v1810_v18  ;;  %v1589_v18 = vld [vmem:[%s2170_s6] ss:$0 sm:$0xff] }
 0x9c4   : > { %v1816_v24 = vpop.eup %1815 }
 0x9c5   : > { %v977_v26 = vmul.f32 %v1816_v24, %v1812_v20 }
 0x9c7   : > { %v978_v28 = vpack.c.bf16 %v977_v26, %v976_v25 }
 0x9c9   : > { %1701 = vmatmul.mubr.msk.bf16.vlgmr.msra.gmra.mrb[8].mxu0 %vm613_vm3, %v978_v28 }
 0x9ca   : > { %1711 = vmatpush3.bf16.xpose.msra.mxu0 %v1085_v29  ;;  %1712 = vmatprep.mubr.msk.bf16.mxu0 %vm1842_vm1, %v1841_v15 }
 0x9cb   : > { %1722 = vmatprep.subr.bf16.mxu0 %v1841_v15 }
 0x9d1   : > { %1713 = vmatmul.mubr.msk.bf16.vlgmr.msra.gmra.mrb[12].mxu0 %vm565_vm2, %v1078_v30 }
 0x9d2   : > { %1724 = vmatprep.mubr.msk.bf16.mxu0 %vm1842_vm1, %v1841_v15  ;;  %1723 = vmatpush3.bf16.msra.mxu0 %v1204_v57  ;;  %v1782_v57 = vld [vmem:[%s2175_s11 + $0x8] sm:$0xff]  }
 0x9d3   : > { %1736 = vmatprep.subr.bf16.mxu0 %v1841_v15 }
 0xa9c   : > { %v1019_v33 = vpop.f32.mrb[8].mxu0 }
 0xa9d   : > { %v1702_v34 = vpop.f32.mrb[9].mxu0 }
 0xa9e   : > { %v1022_v35 = vpop.f32.mrb[10].mxu0 }
 0xa9f   : > { %v1027_v36 = vpack.c.bf16 %v1022_v35, %v1019_v33  ;;  %v1703_v37 = vpop.f32.mrb[11].mxu0  ;;  %v1779_v35 = vld [vmem:[%s2173_s9] sm:$0xff]  }
 0xaa1   : > { %1707 = vmatmul.mubr.msk.bf16.vlgmr.msra.gmra.mrb[24].mxu1 %vm565_vm2, %v1027_v36  ;;  %v1780_v36 = vld [vmem:[%s2173_s9 + $0x8] sm:$0xff]  }
 0xaa2   : > { %1718 = vmatprep.mubr.msk.bf16.mxu1 %vm1842_vm1, %v1841_v15 }
 0xaa4   : > { %v1121_v38 = vpop.f32.mrb[12].mxu0 }
 0xaa5   : > { %v1714_v39 = vpop.f32.mrb[13].mxu0  ;;  %v1128_v40 = vsel %vm613_vm3, %v1121_v38, -inf }
 0xaa6   : > { %1129 = vmax.xlane.f32.xlu1 %v1128_v40  ;;  %v1124_v41 = vpop.f32.mrb[14].mxu0 }
 0xaa7   : > { %v1715_v42 = vpop.f32.mrb[15].mxu0  ;;  %v1131_v45 = vsel %vm613_vm3, %v1124_v41, -inf }
 0xaa8   : > { %1132 = vmax.xlane.f32.xlu0 %v1131_v45 }
 0xb33   : > { %v1130_v46 = vpop.xlane.xlu1 %1129 }
 0xb34   : > { %v1134_v47 = vsub.f32 %v1121_v38, %v1130_v46 }
 0xb35   : > { %v1133_v48 = vpop.xlane.xlu0 %1132 }
 0xb36   : > { %v1136_v49 = vmul.f32 1.442695, %v1134_v47  ;;  %v1135_v50 = vsub.f32 %v1124_v41, %v1133_v48  ;;  %v1590_v47 = vld [vmem:[%s2171_s7] ss:$0 sm:$0xff] }
 0xb38   : > { %1817 = vpow2.f32 %v1136_v49  ;;  %v1138_v51 = vmul.f32 1.442695, %v1135_v50 }
 0xb3a   : > { %1819 = vpow2.f32 %v1138_v51  ;;  %v1591_v51 = vld [vmem:[%s2172_s8] ss:$0 sm:$0xff] }
 0xb42   : > { %v1818_v52 = vpop.eup %1817 }
 0xb43   : > { %v1140_v53 = vsel %vm613_vm3, %v1818_v52, 0.0 }
 0xb44   : > { %v1820_v54 = vpop.eup %1819  ;;  %1141 = vadd.xlane.f32.xlu0 %v1140_v53 }
 0xb45   : > { %v1143_v55 = vsel %vm613_vm3, %v1820_v54, 0.0 }
 0xb46   : > { %1144 = vadd.xlane.f32.xlu1 %v1143_v55 }
 0xb5a   : > { %1151 = vrot.lane.b32.xlu0 %v1978_v43, %s1853_s29 }
 0xb74   : > { %v1068_v58 = vpop.f32.mrb[24].mxu1 }
 0xb75   : > { %v1075_v59 = vadd.f32 %v1068_v58, %v2037_v61  ;;  %v1708_v60 = vpop.f32.mrb[25].mxu1  ;;  %v1783_v58 = vld [vmem:[%s2175_s11 + $0x10] sm:$0xff]  }
 0xb76   : > { %v1071_v62 = vpop.f32.mrb[26].mxu1  ;;  %v1785_v60 = vld [vmem:[%s2175_s11 + $0x20] sm:$0xff]  }
 0xb77   : > { %v1076_v63 = vadd.f32 %v1071_v62, %v2039_v2  ;;  %v1709_v3 = vpop.f32.mrb[27].mxu1  ;;  %v1786_v62 = vld [vmem:[%s2175_s11 + $0x28] sm:$0xff]  }
 0xb78   : > { %v1788_v3 = vld [vmem:[%s2175_s11 + $0x38] sm:$0xff]  }
 0xbd1   : > { %v1142_v4 = vpop.xlane.xlu0 %1141 }
 0xbd2   : > { %1821 = vrcp.f32 %v1142_v4  ;;  %v1592_v4 = vld [vmem:[%s2174_s10] ss:$0 sm:$0xff] }
 0xbd3   : > { %v1145_v43 = vpop.xlane.xlu1 %1144 }
 0xbd4   : > { %1823 = vrcp.f32 %v1145_v43 }
 0xbd5   : > { %v1152_v5 = vpop.permute.xlu0 %1151 }
 0xbd6   : > { %1717 = vmatpush3.bf16.msra.mxu1 %v1152_v5 }
 0xbd7   : > { %1728 = vmatprep.subr.bf16.mxu1 %v1841_v15 }
 0xbdc   : > { %v1822_v6 = vpop.eup %1821 }
 0xbdd   : > { %v1148_v8 = vmul.f32 %v1822_v6, %v1818_v52 }
 0xbde   : > { %v1824_v7 = vpop.eup %1823 }
 0xbdf   : > { %v1149_v9 = vmul.f32 %v1824_v7, %v1820_v54 }
 0xbe1   : > { %v1150_v10 = vpack.c.bf16 %v1149_v9, %v1148_v8 }
 0xbe3   : > { %1719 = vmatmul.mubr.msk.bf16.vlgmr.msra.gmra.mrb[28].mxu1 %vm613_vm3, %v1150_v10 }
 0xbe4   : > { %1732 = vmatprep.mubr.msk.bf16.mxu1 %vm1842_vm1, %v1841_v15  ;;  %1729 = vmatpush3.bf16.msra.mxu1 %v1779_v35 }
 0xbe5   : > { %1730 = vmatprep.subr.bf16.mxu1 %v1841_v15 }
 0xbe8   : > { %1731 = vmatpush3.bf16.msra.mxu1 %v1780_v36 }
 0xcb6   : > { %v1191_v61 = vpop.f32.mrb[28].mxu1 }
 0xcb7   : > { %v1720_v2 = vpop.f32.mrb[29].mxu1 }
 0xcb8   : > { %v1194_v11 = vpop.f32.mrb[30].mxu1 }
 0xcb9   : > { %v1199_v12 = vpack.c.bf16 %v1194_v11, %v1191_v61  ;;  %v1721_v13 = vpop.f32.mrb[31].mxu1 }
 0xcbb   : > { %1725 = vmatmul.mubr.msk.bf16.vlgmr.msra.gmra.mrb[16].mxu0 %vm565_vm2, %v1199_v12 }
 0xcbc   : > { %1752 = vmatprep.mubr.msk.bf16.mxu0 %vm1842_vm1, %v1841_v15  ;;  %1737 = vmatpush3.bf16.msra.mxu0 %v1781_v56 }
 0xcbd   : > { %1738 = vmatprep.subr.bf16.mxu0 %v1841_v15 }
 0xcc0   : > { %1739 = vmatpush3.bf16.msra.mxu0 %v1782_v57 }
 0xcc1   : > { %1740 = vmatprep.subr.bf16.mxu0 %v1841_v15 }
 0xcc4   : > { %1741 = vmatpush3.bf16.msra.mxu0 %v1783_v58 }
 0xcc5   : > { %1742 = vmatprep.subr.bf16.mxu0 %v1841_v15 }
 0xd8e   : > { %v1240_v14 = vpop.f32.mrb[16].mxu0 }
 0xd8f   : > { %v1247_v16 = vadd.f32 %v1240_v14, %v1075_v59  ;;  %v1726_v17 = vpop.f32.mrb[17].mxu0  ;;  %v1784_v59 = vld [vmem:[%s2175_s11 + $0x18] sm:$0xff]  }
 0xd90   : > { %v1243_v19 = vpop.f32.mrb[18].mxu0  ;;  %1743 = vmatpush3.bf16.msra.mxu0 %v1784_v59 }
 0xd91   : > { %v1249_v20 = vadd.f32 %v1247_v16, %v1940_v0  ;;  %v1248_v21 = vadd.f32 %v1243_v19, %v1076_v63  ;;  %v1727_v44 = vpop.f32.mrb[19].mxu0  ;;  %1744 = vmatprep.subr.bf16.mxu0 %v1841_v15  ;;  %v1787_v63 = vld [vmem:[%s2175_s11 + $0x30] sm:$0xff]  }
 0xd93   : > { %v2088_v22 = vadd.f32 %v1589_v18, %v1249_v20  ;;  %v1250_v23 = vadd.f32 %v1248_v21, %v1942_v1 }
 0xd94   : > { %1745 = vmatpush3.bf16.msra.mxu0 %v1785_v60 }
 0xd95   : > { %v2091_v24 = vadd.f32 %v1589_v18, %v1250_v23  ;;  %v1262_v25 = vsel %vm446_vm0, %v2088_v22, 0.0  ;;  %1746 = vmatprep.subr.bf16.mxu0 %v1841_v15 }
 0xd96   : > { %1263 = vadd.xlane.f32.xlu1 %v1262_v25 }
 0xd97   : > { %v1265_v26 = vsel %vm446_vm0, %v2091_v24, 0.0 }
 0xd98   : > { %1747 = vmatpush3.bf16.msra.mxu0 %v1786_v62 }
 0xd99   : > { %1748 = vmatprep.subr.bf16.mxu0 %v1841_v15 }
 0xd9a   : > { %1266 = vadd.xlane.f32.xlu1 %v1265_v26 }
 0xd9c   : > { %1749 = vmatpush3.bf16.msra.mxu0 %v1787_v63 }
 0xd9d   : > { %1750 = vmatprep.subr.bf16.mxu0 %v1841_v15 }
 0xda0   : > { %1751 = vmatpush3.bf16.msra.mxu0 %v1788_v3 }
 0xe23   : > { %v1264_v27 = vpop.xlane.xlu1 %1263 }
 0xe24   : > { %v1268_v28 = vmul.f32 0.03125, %v1264_v27 }
 0xe26   : > { %v1270_v0 = vsub.f32 %v2088_v22, %v1268_v28  ;;  %v1596_v28 = vld [vmem:[%s2176_s12] ss:$0 sm:$0xff] }
 0xe27   : > { %v1267_v29 = vpop.xlane.xlu1 %1266 }
 0xe28   : > { %v1269_v30 = vmul.f32 0.03125, %v1267_v29  ;;  %v1272_v31 = vmul.f32 %v1270_v0, %v1270_v0 }
 0xe2a   : > { %v1271_v32 = vsub.f32 %v2091_v24, %v1269_v30  ;;  %v1274_v1 = vsel %vm446_vm0, %v1272_v31, 0.0 }
 0xe2b   : > { %1275 = vadd.xlane.f32.xlu1 %v1274_v1 }
 0xe2c   : > { %v1273_v33 = vmul.f32 %v1271_v32, %v1271_v32 }
 0xe2e   : > { %v1277_v34 = vsel %vm446_vm0, %v1273_v33, 0.0 }
 0xe2f   : > { %1278 = vadd.xlane.f32.xlu1 %v1277_v34 }
 0xeb8   : > { %v1276_v37 = vpop.xlane.xlu1 %1275 }
 0xeb9   : > { %v1280_v38 = vmul.f32 0.03125, %v1276_v37 }
 0xebb   : > { %v1282_v39 = vadd.f32 1e-05, %v1280_v38 }
 0xebc   : > { %v1279_v40 = vpop.xlane.xlu1 %1278 }
 0xebd   : > { %1825 = vrsqrt.f32 %v1282_v39  ;;  %v1281_v41 = vmul.f32 0.03125, %v1279_v40 }
 0xebf   : > { %v1283_v42 = vadd.f32 1e-05, %v1281_v41 }
 0xec1   : > { %1827 = vrsqrt.f32 %v1283_v42 }
 0xec7   : > { %v1826_v45 = vpop.eup %1825 }
 0xec8   : > { %v1286_v46 = vmul.f32 %v1826_v45, %v1270_v0 }
 0xeca   : > { %v1294_v49 = vmul.f32 %v1590_v47, %v1286_v46 }
 0xecb   : > { %v1828_v48 = vpop.eup %1827 }
 0xecc   : > { %v1287_v50 = vmul.f32 %v1828_v48, %v1271_v32  ;;  %v1302_v53 = vadd.f32 %v1591_v51, %v1294_v49 }
 0xece   : > { %v1295_v52 = vmul.f32 %v1590_v47, %v1287_v50 }
 0xed0   : > { %v1303_v54 = vadd.f32 %v1591_v51, %v1295_v52 }
 0xed2   : > { %v1304_v55 = vpack.c.bf16 %v1303_v54, %v1302_v53 }
 0xed4   : > { %1733 = vmatmul.mubr.msk.bf16.vlgmr.msra.gmra.mrb[32].mxu1 %vm446_vm0, %v1304_v55 }
 0xfa7   : > { %v1365_v43 = vpop.f32.mrb[32].mxu1 }
 0xfa8   : > { %v1366_v5 = vadd.f32 %v1592_v4, %v1365_v43  ;;  %v1734_v6 = vpop.f32.mrb[33].mxu1 }
 0xfa9   : > { %v1368_v7 = vpop.f32.mrb[34].mxu1 }
 0xfaa   : > { %v1372_v8 = vmul.f32 %v1366_v5, %v1366_v5  ;;  %v1369_v9 = vadd.f32 %v1592_v4, %v1368_v7  ;;  %v1735_v10 = vpop.f32.mrb[35].mxu1 }
 0xfac   : > { %v1374_v61 = vmul.f32 %v1372_v8, %v1366_v5  ;;  %v1373_v2 = vmul.f32 %v1369_v9, %v1369_v9 }
 0xfae   : > { %v1376_v11 = vmul.f32 0.044715, %v1374_v61  ;;  %v1375_v15 = vmul.f32 %v1373_v2, %v1369_v9 }
 0xfb0   : > { %v1378_v12 = vadd.f32 %v1376_v11, %v1366_v5  ;;  %v1377_v13 = vmul.f32 0.044715, %v1375_v15 }
 0xfb2   : > { %v1380_v14 = vmul.f32 0.7978846, %v1378_v12  ;;  %v1379_v16 = vadd.f32 %v1377_v13, %v1369_v9 }
 0xfb4   : > { %1829 = vtanh.f32 %v1380_v14  ;;  %v1381_v17 = vmul.f32 0.7978846, %v1379_v16 }
 0xfb6   : > { %1831 = vtanh.f32 %v1381_v17 }
 0xfbe   : > { %v1830_v18 = vpop.eup %1829 }
 0xfbf   : > { %v1384_v19 = vadd.f32 1.0, %v1830_v18 }
 0xfc0   : > { %v1832_v20 = vpop.eup %1831 }
 0xfc1   : > { %v1386_v21 = vmul.f32 0.5, %v1384_v19  ;;  %v1385_v44 = vadd.f32 1.0, %v1832_v20 }
 0xfc3   : > { %v1387_v23 = vmul.f32 0.5, %v1385_v44  ;;  %v1388_v25 = vmul.f32 %v1386_v21, %v1366_v5 }
 0xfc5   : > { %v1389_v26 = vmul.f32 %v1387_v23, %v1369_v9 }
 0xfc7   : > { %v1390_v27 = vpack.c.bf16 %v1389_v26, %v1388_v25 }
 0xfc9   : > { %1753 = vmatmul.mubr.bf16.vlgmr.msra.gmra.mrb[20].mxu0 %v1390_v27 }
0x109c   : > { %v1496_v0 = vpop.f32.mrb[20].mxu0 }
0x109d   : > { %v1497_v29 = vadd.f32 %v1596_v28, %v1496_v0  ;;  %v1754_v30 = vpop.f32.mrb[21].mxu0 }
0x109e   : > { %v1499_v31 = vpop.f32.mrb[22].mxu0 }
0x109f   : > { %v1503_v32 = vadd.f32 %v1497_v29, %v2088_v22  ;;  %v1500_v1 = vadd.f32 %v1596_v28, %v1499_v31  ;;  %v1755_v33 = vpop.f32.mrb[23].mxu0 }
0x10a1   : > { %1505 = vst.msk [vmem:[%s440_s19] sm:$0xff] %vm446_vm0, %v1503_v32  ;;  %v1504_v34 = vadd.f32 %v1500_v1, %v2091_v24 }
0x10a3   : > { %1506 = vst.msk [vmem:[%s440_s19 + $0x8] sm:$0xff] %vm446_vm0, %v1504_v34 }
0x10a4 PF: > { %s23_s25 = sadd.s32 1, %s1839_s25  }
0x10a5   : > { %p20_p4 = scmp.ge.s32.totalorder %s23_s25, 4  }
0x10a7   :  { %22 = sbr.rel (!%p20_p4) target bundleno = 1 (0x1), region = 102 }

</bundles_post_ra>
